<compile_context>
chip_gen: v7x
topology: tpu7x:2x2x1
jax: 0.10.0
libtpu: 0.0.40
codegen_flags: <defaults>
</compile_context>

<pallas_src>
import functools

import jax
import jax.numpy as jnp
from jax.experimental import pallas as pl
from jax.experimental.pallas import tpu as pltpu

LANE = 128


def _round_up(x, m):
    return -(-x // m) * m


def _vmem_limit():
    try:
        cap = int(pltpu.get_tpu_info().vmem_capacity_bytes)
    except Exception:
        cap = 128 * 1024 * 1024
    return int(min(64 * 1024 * 1024, cap * 3 // 4))


_VMEM_LIMIT = _vmem_limit()


# ---------------------------------------------------------------------------
# Pallas kernels
# ---------------------------------------------------------------------------
def _conv3x3_kernel(*refs, S, TH, WO, K, relu, has_res):
    """Fused 3x3 conv (3 dx-packed MXU matmuls, K = 3*Cinp) + BN scale/shift
    [+ bf16 residual] [+ ReLU].

    refs (in order): xrow (1,S,Hph,WO,K) bf16, w (3,K,tc) bf16, scale (1,tc) f32,
    shift (1,tc) f32, [res (1,TH,WO,tc) bf16], out (1,TH,WO,tc), acc (TH*WO,tc) f32.
    """
    if has_res:
        xrow_ref, w_ref, sc_ref, sh_ref, res_ref, o_ref, acc_ref = refs
    else:
        xrow_ref, w_ref, sc_ref, sh_ref, o_ref, acc_ref = refs
        res_ref = None

    tc = acc_ref.shape[-1]
    row0 = pl.program_id(2) * TH                  # first output row of this H-tile

    for dy in range(3):                           # dx already packed into K
        q, p = dy // S, dy % S
        lhs = xrow_ref[0, p, pl.ds(row0 + q, TH), :, :]        # (TH, WO, K) bf16
        lhs = lhs.reshape(TH * WO, K)
        acc = jnp.dot(lhs, w_ref[dy], preferred_element_type=jnp.float32)
        if dy == 0:
            acc_ref[...] = acc
        else:
            acc_ref[...] += acc

    y = acc_ref[...] * sc_ref[...] + sh_ref[...]               # f32 epilogue
    if has_res:
        y = y + res_ref[...].reshape(TH * WO, tc).astype(jnp.float32)
    if relu:
        y = jnp.maximum(y, 0.0)
    o_ref[...] = y.reshape(1, TH, WO, tc).astype(o_ref.dtype)


def _matmul_affine_kernel(x_ref, w_ref, sc_ref, sh_ref, o_ref, acc_ref, *, relu):
    """Tiled matmul with K-accumulation: o = relu?((x @ w) * scale + shift)."""
    @pl.when(pl.program_id(2) == 0)
    def _init():
        acc_ref[...] = jnp.zeros_like(acc_ref)

    acc_ref[...] += jnp.dot(x_ref[...], w_ref[...],
                            preferred_element_type=jnp.float32)

    @pl.when(pl.program_id(2) == pl.num_programs(2) - 1)
    def _finish():
        y = acc_ref[...] * sc_ref[...] + sh_ref[...]
        if relu:
            y = jnp.maximum(y, 0.0)
        o_ref[...] = y.astype(o_ref.dtype)


# ---------------------------------------------------------------------------
# Helpers
# ---------------------------------------------------------------------------
def _fold_bn(bias, bn_p):
    """Fold conv bias + inference-mode BatchNorm into per-channel scale/shift."""
    if bn_p is None:
        return jnp.ones_like(bias, jnp.float32), bias.astype(jnp.float32)
    gamma, beta, mean, var, eps = bn_p
    scale = gamma * jax.lax.rsqrt(var + eps)
    shift = beta + scale * (bias - mean)
    return scale.astype(jnp.float32), shift.astype(jnp.float32)


def _pick_h_tile(ho, wo, row_cap=1024):
    """Largest divisor of ho whose (th*wo, tcout) f32 accumulator stays small."""
    best = 1
    for th in range(1, ho + 1):
        if ho % th == 0 and th * wo <= row_cap:
            best = th
    return best


# ---------------------------------------------------------------------------
# Op wrappers
# ---------------------------------------------------------------------------
def conv3x3_bn_pallas(x_b, conv_p, bn_p, *, stride=1, relu=True, residual=None,
                      out_dtype=jnp.float32):
    """3x3 conv (pad=1) + folded BN [+ bf16 residual] [+ ReLU].

    x_b: (N, H, W, cinp) bf16, channels zero-padded to cinp % 128 == 0.
    residual (optional): (N, Ho, Wo, coutp) bf16.
    Returns (N, Ho, Wo, coutp) in out_dtype; channels [cout:coutp] are zero.
    """
    w, b = conv_p                                     # (3,3,cin,cout), (cout,)
    cin, cout = w.shape[2], w.shape[3]
    n, hh, ww, cinp = x_b.shape
    coutp = _round_up(cout, LANE)
    s = stride
    ho = (hh - 1) // s + 1
    wo = (ww - 1) // s + 1
    k = 3 * cinp

    # ---- fold BN, pad & pack weights per-dy row: (3, 3*cinp, coutp) bf16
    scale, shift = _fold_bn(b, bn_p)
    wp = jnp.pad(w, ((0, 0), (0, 0), (0, cinp - cin), (0, coutp - cout)))
    wm = wp.reshape(3, k, coutp).astype(jnp.bfloat16)
    scale_p = jnp.pad(scale, (0, coutp - cout), constant_values=1.0).reshape(1, coutp)
    shift_p = jnp.pad(shift, (0, coutp - cout)).reshape(1, coutp)

    # ---- dx-packed, H-phase-split input rows: (N, s, hph, wo, 3*cinp) bf16
    #      xrow[n, r, j, dx*cinp + c] = xpad[n, r, s*j + dx, c]
    xpad = jnp.pad(x_b, ((0, 0), (1, 1), (1, 1), (0, 0)))
    xrow = jnp.concatenate(
        [xpad[:, :, dx:dx + s * (wo - 1) + 1:s, :] for dx in range(3)], axis=-1)
    hph = ho + 2 // s
    rows_needed = s * hph
    if rows_needed > hh + 2:
        xrow = jnp.pad(xrow, ((0, 0), (0, rows_needed - (hh + 2)), (0, 0), (0, 0)))
    else:
        xrow = xrow[:, :rows_needed]
    xph = jnp.stack([xrow[:, p::s, :, :] for p in range(s)], axis=1)

    # ---- tiling: lane-dense channel tile, output H-tile; channel tile is the
    #      OUTER grid axis so weights stay resident across the batch loop.
    tcout = 256 if coutp % 256 == 0 else 128
    ct = coutp // tcout
    th = _pick_h_tile(ho, wo)
    ht = ho // th

    kern = functools.partial(_conv3x3_kernel, S=s, TH=th, WO=wo, K=k,
                             relu=relu, has_res=residual is not None)

    in_specs = [
        pl.BlockSpec((1, s, hph, wo, k), lambda ci, bi, hi: (bi, 0, 0, 0, 0)),
        pl.BlockSpec((3, k, tcout), lambda ci, bi, hi: (0, 0, ci)),
        pl.BlockSpec((1, tcout), lambda ci, bi, hi: (0, ci)),
        pl.BlockSpec((1, tcout), lambda ci, bi, hi: (0, ci)),
    ]
    args = [xph, wm, scale_p, shift_p]
    if residual is not None:
        in_specs.append(pl.BlockSpec((1, th, wo, tcout),
                                     lambda ci, bi, hi: (bi, hi, 0, ci)))
        args.append(residual)

    flops = 2 * n * ho * wo * 9 * cinp * coutp
    bytes_acc = (xph.size * 2 + wm.size * 2
                 + n * ho * wo * coutp * jnp.dtype(out_dtype).itemsize)
    if residual is not None:
        bytes_acc += residual.size * 2

    return pl.pallas_call(
        kern,
        out_shape=jax.ShapeDtypeStruct((n, ho, wo, coutp), out_dtype),
        grid=(ct, n, ht),
        in_specs=in_specs,
        out_specs=pl.BlockSpec((1, th, wo, tcout),
                               lambda ci, bi, hi: (bi, hi, 0, ci)),
        scratch_shapes=[pltpu.VMEM((th * wo, tcout), jnp.float32)],
        compiler_params=pltpu.CompilerParams(
            dimension_semantics=("parallel", "parallel", "parallel"),
            vmem_limit_bytes=_VMEM_LIMIT),
        cost_estimate=pl.CostEstimate(flops=flops, transcendentals=0,
                                      bytes_accessed=bytes_acc),
    )(*args)


def conv1x1_bn_pallas(x_b, conv_p, bn_p, *, stride=1, relu=False,
                      out_dtype=jnp.bfloat16):
    """Strided 1x1 conv + folded BN as a K-accumulating tiled MXU matmul.

    x_b: (N, H, W, cinp) bf16, channel-padded. Returns (N, Ho, Wo, coutp)."""
    w, b = conv_p                                     # (1,1,cin,cout), (cout,)
    cin, cout = w.shape[2], w.shape[3]
    n, hh, ww, cinp = x_b.shape
    coutp = _round_up(cout, LANE)
    xs = x_b[:, ::stride, ::stride, :]
    _, ho, wo, _ = xs.shape
    m = n * ho * wo

    scale, shift = _fold_bn(b, bn_p)
    wm = jnp.pad(w.reshape(cin, cout),
                 ((0, cinp - cin), (0, coutp - cout))).astype(jnp.bfloat16)
    scale_p = jnp.pad(scale, (0, coutp - cout), constant_values=1.0).reshape(1, coutp)
    shift_p = jnp.pad(shift, (0, coutp - cout)).reshape(1, coutp)

    # Row tile up to 512 (amortizes per-step overhead); lane-dense tn/tk.
    if m >= 512:
        mp, tm = _round_up(m, 512), 512
    else:
        mp, tm = _round_up(m, 8), _round_up(m, 8)
    x2 = jnp.pad(xs.reshape(m, cinp), ((0, mp - m), (0, 0)))
    tn = 256 if coutp % 256 == 0 else 128
    tk = 256 if cinp % 256 == 0 else 128
    grid = (mp // tm, coutp // tn, cinp // tk)

    y = pl.pallas_call(
        functools.partial(_matmul_affine_kernel, relu=relu),
        out_shape=jax.ShapeDtypeStruct((mp, coutp), out_dtype),
        grid=grid,
        in_specs=[
            pl.BlockSpec((tm, tk), lambda i, j, kk: (i, kk)),
            pl.BlockSpec((tk, tn), lambda i, j, kk: (kk, j)),
            pl.BlockSpec((1, tn), lambda i, j, kk: (0, j)),
            pl.BlockSpec((1, tn), lambda i, j, kk: (0, j)),
        ],
        out_specs=pl.BlockSpec((tm, tn), lambda i, j, kk: (i, j)),
        scratch_shapes=[pltpu.VMEM((tm, tn), jnp.float32)],
        compiler_params=pltpu.CompilerParams(
            dimension_semantics=("parallel", "parallel", "arbitrary"),
            vmem_limit_bytes=_VMEM_LIMIT),
        cost_estimate=pl.CostEstimate(
            flops=2 * mp * cinp * coutp, transcendentals=0,
            bytes_accessed=x2.size * 2 + wm.size * 2
            + mp * coutp * jnp.dtype(out_dtype).itemsize),
    )(x2, wm, scale_p, shift_p)
    return y[:m].reshape(n, ho, wo, coutp)


# ---------------------------------------------------------------------------
# ResNetBlock forward (NCHW in/out, like the PyTorch reference)
# ---------------------------------------------------------------------------
def resnet_block_forward(params, x_nchw, *, stride=1):
    x = jnp.transpose(x_nchw, (0, 2, 3, 1))                      # NCHW -> NHWC
    cin = x.shape[-1]
    cout = params["conv1"][0].shape[-1]
    cinp = _round_up(cin, LANE)

    # One bf16 cast + channel pad of the input; reused by conv1, the 1x1
    # downsample and (identity case) the residual stream.
    x_b = jnp.pad(x.astype(jnp.bfloat16),
                  ((0, 0), (0, 0), (0, 0), (0, cinp - cin)))

    # conv1 -> bn1 -> relu (bf16 intermediate, channels lane-padded)
    h = conv3x3_bn_pallas(x_b, params["conv1"], params["bn1"], stride=stride,
                          relu=True, residual=None, out_dtype=jnp.bfloat16)

    # shortcut branch (bf16 residual, upcast inside the conv2 epilogue)
    if params["downsample"] is not None:
        ds = params["downsample"]
        res = conv1x1_bn_pallas(x_b, ds["conv"], ds["bn"], stride=stride,
                                relu=False, out_dtype=jnp.bfloat16)
    else:
        res = x_b                       # stride == 1 and cin == cout here

    # conv2 -> bn2 -> (+ residual) -> relu, fully fused epilogue
    out = conv3x3_bn_pallas(h, params["conv2"], params["bn2"], stride=1,
                            relu=True, residual=res, out_dtype=jnp.float32)
    out = out[..., :cout]                                        # drop lane pad
    return jnp.transpose(out, (0, 3, 1, 2))                      # NHWC -> NCHW


# ---------------------------------------------------------------------------
# Parameters (mirrors init_weights: conv N(0, sqrt(2/(k*k*cout))), bias=0,
# BN gamma=1 / beta=0, inference-mode running stats mean=0 / var=1)
# ---------------------------------------------------------------------------
def make_params(key, cin, cout, stride=1, batch=True):
    k1, k2, k3 = jax.random.split(key, 3)

    def conv3(k, ci, co):
        w = jax.random.normal(k, (3, 3, ci, co), jnp.float32) * (2.0 / (9 * co)) ** 0.5
        return (w, jnp.zeros((co,), jnp.float32))

    def conv1(k, ci, co):
        w = jax.random.normal(k, (1, 1, ci, co), jnp.float32) * (2.0 / co) ** 0.5
        return (w, jnp.zeros((co,), jnp.float32))

    def bn(co):
        return (jnp.ones((co,), jnp.float32), jnp.zeros((co,), jnp.float32),
                jnp.zeros((co,), jnp.float32), jnp.ones((co,), jnp.float32), 1e-5)

    p = {
        "conv1": conv3(k1, cin, cout), "bn1": bn(cout) if batch else None,
        "conv2": conv3(k2, cout, cout), "bn2": bn(cout) if batch else None,
    }
    if stride != 1 or cin != cout:
        p["downsample"] = {"conv": conv1(k3, cin, cout),
                           "bn": bn(cout) if batch else None}
    else:
        p["downsample"] = None
    return p


# ---------------------------------------------------------------------------
# Pure-JAX reference (for correctness check)
# ---------------------------------------------------------------------------
def _ref_block(params, x_nchw, *, stride=1):
    x = jnp.transpose(x_nchw, (0, 2, 3, 1)).astype(jnp.float32)

    def conv(inp, w, b, s, k):
        pad = k // 2
        y = jax.lax.conv_general_dilated(
            inp, w, (s, s), [(pad, pad), (pad, pad)],
            dimension_numbers=("NHWC", "HWIO", "NHWC"))
        return y + b

    def bn(y, p):
        if p is None:
            return y
        g, bt, m, v, eps = p
        return (y - m) * g * jax.lax.rsqrt(v + eps) + bt

    h = jax.nn.relu(bn(conv(x, *params["conv1"], stride, 3), params["bn1"]))
    if params["downsample"] is not None:
        ds = params["downsample"]
        res = bn(conv(x, *ds["conv"], stride, 1), ds["bn"])
    else:
        res = x
    out = jax.nn.relu(bn(conv(h, *params["conv2"], 1, 3), params["bn2"]) + res)
    return jnp.transpose(out, (0, 3, 1, 2))


def _check(y, r, name):
    assert bool(jnp.all(jnp.isfinite(y))), name
    err = jnp.abs(y - r)
    tol = 0.05 * jnp.abs(r) + 0.15          # per-element, bf16-operand tolerance
    assert bool(jnp.all(err <= tol)), (name, float(jnp.max(err)))


# ---------------------------------------------------------------------------
if __name__ == "__main__":
    key = jax.random.PRNGKey(0)
    kp1, kp2, kx = jax.random.split(key, 3)

    B, C, H, W = 2, 32, 16, 16
    x = jax.random.normal(kx, (B, C, H, W), jnp.float32)

    # Block 1: stride=1, in_channels == out_channels -> identity shortcut.
    p1 = make_params(kp1, C, C, stride=1)
    fwd1 = jax.jit(functools.partial(resnet_block_forward, stride=1))
    y1 = jax.block_until_ready(fwd1(p1, x))
    assert y1.shape == (B, C, H, W), y1.shape
    _check(y1, _ref_block(p1, x, stride=1), "block1")

    # Block 2: stride=2, channel expansion -> 1x1-conv + BN downsample shortcut.
    Cout = 64
    p2 = make_params(kp2, C, Cout, stride=2)
    fwd2 = jax.jit(functools.partial(resnet_block_forward, stride=2))
    y2 = jax.block_until_ready(fwd2(p2, x))
    assert y2.shape == (B, Cout, H // 2, W // 2), y2.shape
    _check(y2, _ref_block(p2, x, stride=2), "block2")

    print("KERNEL_OK")
</pallas_src>

<mosaic_0001>
module attributes {stable_mosaic.version = 11 : i64} {
  func.func @_conv3x3_kernel(%arg0: i32, %arg1: i32, %arg2: i32, %arg3: memref<1x1x18x16x384xbf16, #tpu.memory_space<vmem>>, %arg4: memref<3x384x128xbf16, #tpu.memory_space<vmem>>, %arg5: memref<1x128xf32, #tpu.memory_space<vmem>>, %arg6: memref<1x128xf32, #tpu.memory_space<vmem>>, %arg7: memref<1x16x16x128xbf16, #tpu.memory_space<vmem>>, %arg8: memref<1x16x16x128xf32, #tpu.memory_space<vmem>>, %arg9: memref<256x128xf32, #tpu.memory_space<vmem>>) attributes {dimension_semantics = [#tpu.dimension_semantics<parallel>, #tpu.dimension_semantics<parallel>, #tpu.dimension_semantics<parallel>], iteration_bounds = array<i64: 1, 2, 1>, scalar_prefetch = 0 : i64, scratch_operands = 1 : i64, tpu.core_type = #tpu.core_type<tc>, window_params = [{transform_indices = @transform_0, window_bounds = array<i64: 1, 1, 18, 16, 384>}, {transform_indices = @transform_1, window_bounds = array<i64: 3, 384, 128>}, {transform_indices = @transform_2, window_bounds = array<i64: 1, 128>}, {transform_indices = @transform_3, window_bounds = array<i64: 1, 128>}, {transform_indices = @transform_4, window_bounds = array<i64: 1, 16, 16, 128>}, {transform_indices = @transform_5, window_bounds = array<i64: 1, 16, 16, 128>}]} {
    %c16_i32 = arith.constant 16 : i32
    %0 = arith.muli %arg2, %c16_i32 : i32
    %c0_i32 = arith.constant 0 : i32
    %1 = arith.addi %0, %c0_i32 : i32
    %c0 = arith.constant 0 : index
    %c0_0 = arith.constant 0 : index
    %2 = arith.index_cast %1 : i32 to index
    %c0_1 = arith.constant 0 : index
    %c0_2 = arith.constant 0 : index
    %3 = vector.load %arg3[%c0, %c0_0, %2, %c0_1, %c0_2] : memref<1x1x18x16x384xbf16, #tpu.memory_space<vmem>>, vector<1x1x16x16x384xbf16>
    %4 = vector.shape_cast %3 : vector<1x1x16x16x384xbf16> to vector<16x16x384xbf16>
    %5 = vector.shape_cast %4 : vector<16x16x384xbf16> to vector<256x384xbf16>
    %c0_3 = arith.constant 0 : index
    %c0_4 = arith.constant 0 : index
    %c0_5 = arith.constant 0 : index
    %6 = vector.load %arg4[%c0_3, %c0_4, %c0_5] : memref<3x384x128xbf16, #tpu.memory_space<vmem>>, vector<1x384x128xbf16>
    %7 = vector.shape_cast %6 : vector<1x384x128xbf16> to vector<384x128xbf16>
    %cst = arith.constant dense<0.000000e+00> : vector<256x128xf32>
    %8 = tpu.matmul %5, %7, %cst {dimension_numbers = #tpu.dot_dimension_numbers<[1], [0], [0], [1], [0, 0, 1, 1], [], []>} : vector<256x384xbf16>, vector<384x128xbf16>, vector<256x128xf32> -> vector<256x128xf32>
    %c0_6 = arith.constant 0 : index
    %c0_7 = arith.constant 0 : index
    %9 = vector.load %arg9[%c0_6, %c0_7] : memref<256x128xf32, #tpu.memory_space<vmem>>, vector<256x128xf32>
    tpu.vector_store %arg9[%c0_6, %c0_7], %8 {strides = array<i32>} : memref<256x128xf32, #tpu.memory_space<vmem>>, vector<256x128xf32>,
    %c1_i32 = arith.constant 1 : i32
    %10 = arith.addi %0, %c1_i32 : i32
    %c0_8 = arith.constant 0 : index
    %c0_9 = arith.constant 0 : index
    %11 = arith.index_cast %10 : i32 to index
    %c0_10 = arith.constant 0 : index
    %c0_11 = arith.constant 0 : index
    %12 = vector.load %arg3[%c0_8, %c0_9, %11, %c0_10, %c0_11] : memref<1x1x18x16x384xbf16, #tpu.memory_space<vmem>>, vector<1x1x16x16x384xbf16>
    %13 = vector.shape_cast %12 : vector<1x1x16x16x384xbf16> to vector<16x16x384xbf16>
    %14 = vector.shape_cast %13 : vector<16x16x384xbf16> to vector<256x384xbf16>
    %c1 = arith.constant 1 : index
    %c0_12 = arith.constant 0 : index
    %c0_13 = arith.constant 0 : index
    %15 = vector.load %arg4[%c1, %c0_12, %c0_13] : memref<3x384x128xbf16, #tpu.memory_space<vmem>>, vector<1x384x128xbf16>
    %16 = vector.shape_cast %15 : vector<1x384x128xbf16> to vector<384x128xbf16>
    %cst_14 = arith.constant dense<0.000000e+00> : vector<256x128xf32>
    %17 = tpu.matmul %14, %16, %cst_14 {dimension_numbers = #tpu.dot_dimension_numbers<[1], [0], [0], [1], [0, 0, 1, 1], [], []>} : vector<256x384xbf16>, vector<384x128xbf16>, vector<256x128xf32> -> vector<256x128xf32>
    %c0_15 = arith.constant 0 : index
    %c0_16 = arith.constant 0 : index
    %18 = vector.load %arg9[%c0_15, %c0_16] : memref<256x128xf32, #tpu.memory_space<vmem>>, vector<256x128xf32>
    %19 = arith.addf %18, %17 : vector<256x128xf32>
    %c0_17 = arith.constant 0 : index
    %c0_18 = arith.constant 0 : index
    %20 = vector.load %arg9[%c0_17, %c0_18] : memref<256x128xf32, #tpu.memory_space<vmem>>, vector<256x128xf32>
    tpu.vector_store %arg9[%c0_17, %c0_18], %19 {strides = array<i32>} : memref<256x128xf32, #tpu.memory_space<vmem>>, vector<256x128xf32>,
    %c2_i32 = arith.constant 2 : i32
    %21 = arith.addi %0, %c2_i32 : i32
    %c0_19 = arith.constant 0 : index
    %c0_20 = arith.constant 0 : index
    %22 = arith.index_cast %21 : i32 to index
    %c0_21 = arith.constant 0 : index
    %c0_22 = arith.constant 0 : index
    %23 = vector.load %arg3[%c0_19, %c0_20, %22, %c0_21, %c0_22] : memref<1x1x18x16x384xbf16, #tpu.memory_space<vmem>>, vector<1x1x16x16x384xbf16>
    %24 = vector.shape_cast %23 : vector<1x1x16x16x384xbf16> to vector<16x16x384xbf16>
    %25 = vector.shape_cast %24 : vector<16x16x384xbf16> to vector<256x384xbf16>
    %c2 = arith.constant 2 : index
    %c0_23 = arith.constant 0 : index
    %c0_24 = arith.constant 0 : index
    %26 = vector.load %arg4[%c2, %c0_23, %c0_24] : memref<3x384x128xbf16, #tpu.memory_space<vmem>>, vector<1x384x128xbf16>
    %27 = vector.shape_cast %26 : vector<1x384x128xbf16> to vector<384x128xbf16>
    %cst_25 = arith.constant dense<0.000000e+00> : vector<256x128xf32>
    %28 = tpu.matmul %25, %27, %cst_25 {dimension_numbers = #tpu.dot_dimension_numbers<[1], [0], [0], [1], [0, 0, 1, 1], [], []>} : vector<256x384xbf16>, vector<384x128xbf16>, vector<256x128xf32> -> vector<256x128xf32>
    %c0_26 = arith.constant 0 : index
    %c0_27 = arith.constant 0 : index
    %29 = vector.load %arg9[%c0_26, %c0_27] : memref<256x128xf32, #tpu.memory_space<vmem>>, vector<256x128xf32>
    %30 = arith.addf %29, %28 : vector<256x128xf32>
    %c0_28 = arith.constant 0 : index
    %c0_29 = arith.constant 0 : index
    %31 = vector.load %arg9[%c0_28, %c0_29] : memref<256x128xf32, #tpu.memory_space<vmem>>, vector<256x128xf32>
    tpu.vector_store %arg9[%c0_28, %c0_29], %30 {strides = array<i32>} : memref<256x128xf32, #tpu.memory_space<vmem>>, vector<256x128xf32>,
    %c0_30 = arith.constant 0 : index
    %c0_31 = arith.constant 0 : index
    %32 = vector.load %arg9[%c0_30, %c0_31] : memref<256x128xf32, #tpu.memory_space<vmem>>, vector<256x128xf32>
    %c0_32 = arith.constant 0 : index
    %c0_33 = arith.constant 0 : index
    %33 = vector.load %arg5[%c0_32, %c0_33] : memref<1x128xf32, #tpu.memory_space<vmem>>, vector<1x128xf32>
    %34 = vector.broadcast %33 : vector<1x128xf32> to vector<256x128xf32>
    %35 = arith.mulf %32, %34 : vector<256x128xf32>
    %c0_34 = arith.constant 0 : index
    %c0_35 = arith.constant 0 : index
    %36 = vector.load %arg6[%c0_34, %c0_35] : memref<1x128xf32, #tpu.memory_space<vmem>>, vector<1x128xf32>
    %37 = vector.broadcast %36 : vector<1x128xf32> to vector<256x128xf32>
    %38 = arith.addf %35, %37 : vector<256x128xf32>
    %c0_36 = arith.constant 0 : index
    %c0_37 = arith.constant 0 : index
    %c0_38 = arith.constant 0 : index
    %c0_39 = arith.constant 0 : index
    %39 = vector.load %arg7[%c0_36, %c0_37, %c0_38, %c0_39] : memref<1x16x16x128xbf16, #tpu.memory_space<vmem>>, vector<1x16x16x128xbf16>
    %40 = vector.shape_cast %39 : vector<1x16x16x128xbf16> to vector<256x128xbf16>
    %41 = arith.extf %40 : vector<256x128xbf16> to vector<256x128xf32>
    %42 = arith.addf %38, %41 : vector<256x128xf32>
    %cst_40 = arith.constant 0.000000e+00 : f32
    %43 = vector.broadcast %cst_40 : f32 to vector<256x128xf32>
    %44 = arith.maximumf %42, %43 : vector<256x128xf32>
    %45 = vector.shape_cast %44 : vector<256x128xf32> to vector<1x16x16x128xf32>
    %c0_41 = arith.constant 0 : index
    %c0_42 = arith.constant 0 : index
    %c0_43 = arith.constant 0 : index
    %c0_44 = arith.constant 0 : index
    %46 = vector.load %arg8[%c0_41, %c0_42, %c0_43, %c0_44] : memref<1x16x16x128xf32, #tpu.memory_space<vmem>>, vector<1x16x16x128xf32>
    tpu.vector_store %arg8[%c0_41, %c0_42, %c0_43, %c0_44], %45 {strides = array<i32>} : memref<1x16x16x128xf32, #tpu.memory_space<vmem>>, vector<1x16x16x128xf32>,
    return
  }
  func.func @transform_0(%arg0: i32, %arg1: i32, %arg2: i32) -> (i32, i32, i32, i32, i32) {
    %c0_i32 = arith.constant 0 : i32
    %c0_i32_0 = arith.constant 0 : i32
    %c0_i32_1 = arith.constant 0 : i32
    %c0_i32_2 = arith.constant 0 : i32
    %c0_i32_3 = arith.constant 0 : i32
    return %arg1, %c0_i32, %c0_i32_0, %c0_i32_1, %c0_i32_2 : i32, i32, i32, i32, i32
  }
  func.func @transform_1(%arg0: i32, %arg1: i32, %arg2: i32) -> (i32, i32, i32) {
    %c0_i32 = arith.constant 0 : i32
    %c0_i32_0 = arith.constant 0 : i32
    %c0_i32_1 = arith.constant 0 : i32
    return %c0_i32, %c0_i32_0, %arg0 : i32, i32, i32
  }
  func.func @transform_2(%arg0: i32, %arg1: i32, %arg2: i32) -> (i32, i32) {
    %c0_i32 = arith.constant 0 : i32
    %c0_i32_0 = arith.constant 0 : i32
    return %c0_i32, %arg0 : i32, i32
  }
  func.func @transform_3(%arg0: i32, %arg1: i32, %arg2: i32) -> (i32, i32) {
    %c0_i32 = arith.constant 0 : i32
    %c0_i32_0 = arith.constant 0 : i32
    return %c0_i32, %arg0 : i32, i32
  }
  func.func @transform_4(%arg0: i32, %arg1: i32, %arg2: i32) -> (i32, i32, i32, i32) {
    %c0_i32 = arith.constant 0 : i32
    %c0_i32_0 = arith.constant 0 : i32
    return %arg1, %arg2, %c0_i32, %arg0 : i32, i32, i32, i32
  }
  func.func @transform_5(%arg0: i32, %arg1: i32, %arg2: i32) -> (i32, i32, i32, i32) {
    %c0_i32 = arith.constant 0 : i32
    %c0_i32_0 = arith.constant 0 : i32
    return %arg1, %arg2, %c0_i32, %arg0 : i32, i32, i32, i32
  }
}

module attributes {stable_mosaic.version = 11 : i64} {
  func.func @_conv3x3_kernel(%arg0: i32, %arg1: i32, %arg2: i32, %arg3: memref<1x1x18x16x384xbf16, #tpu.memory_space<vmem>>, %arg4: memref<3x384x128xbf16, #tpu.memory_space<vmem>>, %arg5: memref<1x128xf32, #tpu.memory_space<vmem>>, %arg6: memref<1x128xf32, #tpu.memory_space<vmem>>, %arg7: memref<1x16x16x128xbf16, #tpu.memory_space<vmem>>, %arg8: memref<256x128xf32, #tpu.memory_space<vmem>>) attributes {dimension_semantics = [#tpu.dimension_semantics<parallel>, #tpu.dimension_semantics<parallel>, #tpu.dimension_semantics<parallel>], iteration_bounds = array<i64: 1, 2, 1>, scalar_prefetch = 0 : i64, scratch_operands = 1 : i64, tpu.core_type = #tpu.core_type<tc>, window_params = [{transform_indices = @transform_0, window_bounds = array<i64: 1, 1, 18, 16, 384>}, {transform_indices = @transform_1, window_bounds = array<i64: 3, 384, 128>}, {transform_indices = @transform_2, window_bounds = array<i64: 1, 128>}, {transform_indices = @transform_3, window_bounds = array<i64: 1, 128>}, {transform_indices = @transform_4, window_bounds = array<i64: 1, 16, 16, 128>}]} {
    %c16_i32 = arith.constant 16 : i32
    %0 = arith.muli %arg2, %c16_i32 : i32
    %c0_i32 = arith.constant 0 : i32
    %1 = arith.addi %0, %c0_i32 : i32
    %c0 = arith.constant 0 : index
    %c0_0 = arith.constant 0 : index
    %2 = arith.index_cast %1 : i32 to index
    %c0_1 = arith.constant 0 : index
    %c0_2 = arith.constant 0 : index
    %3 = vector.load %arg3[%c0, %c0_0, %2, %c0_1, %c0_2] : memref<1x1x18x16x384xbf16, #tpu.memory_space<vmem>>, vector<1x1x16x16x384xbf16>
    %4 = vector.shape_cast %3 : vector<1x1x16x16x384xbf16> to vector<16x16x384xbf16>
    %5 = vector.shape_cast %4 : vector<16x16x384xbf16> to vector<256x384xbf16>
    %c0_3 = arith.constant 0 : index
    %c0_4 = arith.constant 0 : index
    %c0_5 = arith.constant 0 : index
    %6 = vector.load %arg4[%c0_3, %c0_4, %c0_5] : memref<3x384x128xbf16, #tpu.memory_space<vmem>>, vector<1x384x128xbf16>
    %7 = vector.shape_cast %6 : vector<1x384x128xbf16> to vector<384x128xbf16>
    %cst = arith.constant dense<0.000000e+00> : vector<256x128xf32>
    %8 = tpu.matmul %5, %7, %cst {dimension_numbers = #tpu.dot_dimension_numbers<[1], [0], [0], [1], [0, 0, 1, 1], [], []>} : vector<256x384xbf16>, vector<384x128xbf16>, vector<256x128xf32> -> vector<256x128xf32>
    %c0_6 = arith.constant 0 : index
    %c0_7 = arith.constant 0 : index
    %9 = vector.load %arg8[%c0_6, %c0_7] : memref<256x128xf32, #tpu.memory_space<vmem>>, vector<256x128xf32>
    tpu.vector_store %arg8[%c0_6, %c0_7], %8 {strides = array<i32>} : memref<256x128xf32, #tpu.memory_space<vmem>>, vector<256x128xf32>,
    %c1_i32 = arith.constant 1 : i32
    %10 = arith.addi %0, %c1_i32 : i32
    %c0_8 = arith.constant 0 : index
    %c0_9 = arith.constant 0 : index
    %11 = arith.index_cast %10 : i32 to index
    %c0_10 = arith.constant 0 : index
    %c0_11 = arith.constant 0 : index
    %12 = vector.load %arg3[%c0_8, %c0_9, %11, %c0_10, %c0_11] : memref<1x1x18x16x384xbf16, #tpu.memory_space<vmem>>, vector<1x1x16x16x384xbf16>
    %13 = vector.shape_cast %12 : vector<1x1x16x16x384xbf16> to vector<16x16x384xbf16>
    %14 = vector.shape_cast %13 : vector<16x16x384xbf16> to vector<256x384xbf16>
    %c1 = arith.constant 1 : index
    %c0_12 = arith.constant 0 : index
    %c0_13 = arith.constant 0 : index
    %15 = vector.load %arg4[%c1, %c0_12, %c0_13] : memref<3x384x128xbf16, #tpu.memory_space<vmem>>, vector<1x384x128xbf16>
    %16 = vector.shape_cast %15 : vector<1x384x128xbf16> to vector<384x128xbf16>
    %cst_14 = arith.constant dense<0.000000e+00> : vector<256x128xf32>
    %17 = tpu.matmul %14, %16, %cst_14 {dimension_numbers = #tpu.dot_dimension_numbers<[1], [0], [0], [1], [0, 0, 1, 1], [], []>} : vector<256x384xbf16>, vector<384x128xbf16>, vector<256x128xf32> -> vector<256x128xf32>
    %c0_15 = arith.constant 0 : index
    %c0_16 = arith.constant 0 : index
    %18 = vector.load %arg8[%c0_15, %c0_16] : memref<256x128xf32, #tpu.memory_space<vmem>>, vector<256x128xf32>
    %19 = arith.addf %18, %17 : vector<256x128xf32>
    %c0_17 = arith.constant 0 : index
    %c0_18 = arith.constant 0 : index
    %20 = vector.load %arg8[%c0_17, %c0_18] : memref<256x128xf32, #tpu.memory_space<vmem>>, vector<256x128xf32>
    tpu.vector_store %arg8[%c0_17, %c0_18], %19 {strides = array<i32>} : memref<256x128xf32, #tpu.memory_space<vmem>>, vector<256x128xf32>,
    %c2_i32 = arith.constant 2 : i32
    %21 = arith.addi %0, %c2_i32 : i32
    %c0_19 = arith.constant 0 : index
    %c0_20 = arith.constant 0 : index
    %22 = arith.index_cast %21 : i32 to index
    %c0_21 = arith.constant 0 : index
    %c0_22 = arith.constant 0 : index
    %23 = vector.load %arg3[%c0_19, %c0_20, %22, %c0_21, %c0_22] : memref<1x1x18x16x384xbf16, #tpu.memory_space<vmem>>, vector<1x1x16x16x384xbf16>
    %24 = vector.shape_cast %23 : vector<1x1x16x16x384xbf16> to vector<16x16x384xbf16>
    %25 = vector.shape_cast %24 : vector<16x16x384xbf16> to vector<256x384xbf16>
    %c2 = arith.constant 2 : index
    %c0_23 = arith.constant 0 : index
    %c0_24 = arith.constant 0 : index
    %26 = vector.load %arg4[%c2, %c0_23, %c0_24] : memref<3x384x128xbf16, #tpu.memory_space<vmem>>, vector<1x384x128xbf16>
    %27 = vector.shape_cast %26 : vector<1x384x128xbf16> to vector<384x128xbf16>
    %cst_25 = arith.constant dense<0.000000e+00> : vector<256x128xf32>
    %28 = tpu.matmul %25, %27, %cst_25 {dimension_numbers = #tpu.dot_dimension_numbers<[1], [0], [0], [1], [0, 0, 1, 1], [], []>} : vector<256x384xbf16>, vector<384x128xbf16>, vector<256x128xf32> -> vector<256x128xf32>
    %c0_26 = arith.constant 0 : index
    %c0_27 = arith.constant 0 : index
    %29 = vector.load %arg8[%c0_26, %c0_27] : memref<256x128xf32, #tpu.memory_space<vmem>>, vector<256x128xf32>
    %30 = arith.addf %29, %28 : vector<256x128xf32>
    %c0_28 = arith.constant 0 : index
    %c0_29 = arith.constant 0 : index
    %31 = vector.load %arg8[%c0_28, %c0_29] : memref<256x128xf32, #tpu.memory_space<vmem>>, vector<256x128xf32>
    tpu.vector_store %arg8[%c0_28, %c0_29], %30 {strides = array<i32>} : memref<256x128xf32, #tpu.memory_space<vmem>>, vector<256x128xf32>,
    %c0_30 = arith.constant 0 : index
    %c0_31 = arith.constant 0 : index
    %32 = vector.load %arg8[%c0_30, %c0_31] : memref<256x128xf32, #tpu.memory_space<vmem>>, vector<256x128xf32>
    %c0_32 = arith.constant 0 : index
    %c0_33 = arith.constant 0 : index
    %33 = vector.load %arg5[%c0_32, %c0_33] : memref<1x128xf32, #tpu.memory_space<vmem>>, vector<1x128xf32>
    %34 = vector.broadcast %33 : vector<1x128xf32> to vector<256x128xf32>
    %35 = arith.mulf %32, %34 : vector<256x128xf32>
    %c0_34 = arith.constant 0 : index
    %c0_35 = arith.constant 0 : index
    %36 = vector.load %arg6[%c0_34, %c0_35] : memref<1x128xf32, #tpu.memory_space<vmem>>, vector<1x128xf32>
    %37 = vector.broadcast %36 : vector<1x128xf32> to vector<256x128xf32>
    %38 = arith.addf %35, %37 : vector<256x128xf32>
    %cst_36 = arith.constant 0.000000e+00 : f32
    %39 = vector.broadcast %cst_36 : f32 to vector<256x128xf32>
    %40 = arith.maximumf %38, %39 : vector<256x128xf32>
    %41 = vector.shape_cast %40 : vector<256x128xf32> to vector<1x16x16x128xf32>
    %42 = arith.truncf %41 : vector<1x16x16x128xf32> to vector<1x16x16x128xbf16>
    %c0_37 = arith.constant 0 : index
    %c0_38 = arith.constant 0 : index
    %c0_39 = arith.constant 0 : index
    %c0_40 = arith.constant 0 : index
    %43 = vector.load %arg7[%c0_37, %c0_38, %c0_39, %c0_40] : memref<1x16x16x128xbf16, #tpu.memory_space<vmem>>, vector<1x16x16x128xbf16>
    tpu.vector_store %arg7[%c0_37, %c0_38, %c0_39, %c0_40], %42 {strides = array<i32>} : memref<1x16x16x128xbf16, #tpu.memory_space<vmem>>, vector<1x16x16x128xbf16>,
    return
  }
  func.func @transform_0(%arg0: i32, %arg1: i32, %arg2: i32) -> (i32, i32, i32, i32, i32) {
    %c0_i32 = arith.constant 0 : i32
    %c0_i32_0 = arith.constant 0 : i32
    %c0_i32_1 = arith.constant 0 : i32
    %c0_i32_2 = arith.constant 0 : i32
    %c0_i32_3 = arith.constant 0 : i32
    return %arg1, %c0_i32, %c0_i32_0, %c0_i32_1, %c0_i32_2 : i32, i32, i32, i32, i32
  }
  func.func @transform_1(%arg0: i32, %arg1: i32, %arg2: i32) -> (i32, i32, i32) {
    %c0_i32 = arith.constant 0 : i32
    %c0_i32_0 = arith.constant 0 : i32
    %c0_i32_1 = arith.constant 0 : i32
    return %c0_i32, %c0_i32_0, %arg0 : i32, i32, i32
  }
  func.func @transform_2(%arg0: i32, %arg1: i32, %arg2: i32) -> (i32, i32) {
    %c0_i32 = arith.constant 0 : i32
    %c0_i32_0 = arith.constant 0 : i32
    return %c0_i32, %arg0 : i32, i32
  }
  func.func @transform_3(%arg0: i32, %arg1: i32, %arg2: i32) -> (i32, i32) {
    %c0_i32 = arith.constant 0 : i32
    %c0_i32_0 = arith.constant 0 : i32
    return %c0_i32, %arg0 : i32, i32
  }
  func.func @transform_4(%arg0: i32, %arg1: i32, %arg2: i32) -> (i32, i32, i32, i32) {
    %c0_i32 = arith.constant 0 : i32
    %c0_i32_0 = arith.constant 0 : i32
    return %arg1, %arg2, %c0_i32, %arg0 : i32, i32, i32, i32
  }
}

</mosaic_0001>

<bundles_post_ra>
// kernel: resnet_block_forward.3
= control target key start
LH: loop header
LB: loop body
LE: loop exit
PB: predicated region body
PF: predicated region fallthrough
CT: control target
= control target key end

     0   :  { %s6303_s0 = inlined_call_operand.hbm [shape: bf16[2,1,18,16,384], index: 0, kind: input, shape index: {}]   ;;  %s6304_s1 = inlined_call_operand.hbm [shape: bf16[3,384,128], index: 1, kind: input, shape index: {}]   ;;  %s6305_s2 = inlined_call_operand.hbm [shape: f32[1,128], index: 2, kind: input, shape index: {}]   ;;  %s6306_s3 = inlined_call_operand.hbm [shape: f32[1,128], index: 3, kind: input, shape index: {}]   ;;  %s6307_s4 = inlined_call_operand.hbm [shape: bf16[2,16,16,128], index: 4, kind: input, shape index: {}]   ;;  %s6308_s5 = inlined_call_operand.hbm [shape: f32[2,16,16,128], index: 5, kind: output, shape index: {}]  }
   0x1   :  { %6326 = sst [smem:[#allocation25_spill]] %s6303_s0 }
   0x2   :  { %6327 = sst [smem:[#allocation26_spill]] %s6304_s1 }
   0x3   :  { %10 = vsyncpa [#allocation4], 0 }
   0x4   :  { %12 = vsyncpa [#allocation4 + $0x1], 0 }
   0x5   :  { %13 = vsyncpa [#allocation7], 0 }
   0x6   :  { %14 = vsyncpa [#allocation10], 0 }
   0x7   :  { %15 = vsyncpa [#allocation5], 0 }
   0x8   :  { %17 = vsyncpa [#allocation5 + $0x1], 0  ;;  %s5300_s18 = smov 0   ;;  %s5302_s19 = smov 0  }
   0x9   :  { %s5304_s20 = smov 0   ;;  %s5306_s21 = smov 0  }
   0xa   :  { %s5308_s22 = smov 0   ;;  %s5310_s23 = smov 0  }
   0xb LB: > { %6328 = sst [smem:[#allocation18_spill]] %s5236_s18  ;;  %s5331_s24 = sadd.s32 4294967295, %s5256_s23   ;;  %s5256_s23 = sphi %s5310_s23, %s23_s23   ;;  %s5252_s22 = sphi %s5308_s22, %s6372_s22   ;;  %s5248_s21 = sphi %s5306_s21, %s6371_s21   ;;  %s5244_s20 = sphi %s5304_s20, %s6370_s20   ;;  %s5240_s19 = sphi %s5302_s19, %s6369_s19   ;;  %s5236_s18 = sphi %s5300_s18, %s6368_s18  }
   0xc   : > { %6329 = sst [smem:[#allocation19_spill]] %s5256_s23  ;;  %s3561_s25 = sadd.s32 4294967294, %s5256_s23  }
   0xd   : > { %p62_p0 = scmp.ne.s32.totalorder %s5240_s19, %s5236_s18  ;;  %p6309_p1 = scmp.eq.s32.totalorder %s5331_s24, 0 }
   0xe   : > { %p204_p3 = scmp.eq.s32.totalorder %s3561_s25, 1  ;;  %p3562_p5 = scmp.ge.s32.totalorder %s5256_s23, 1 }
   0xf   : > { %p5340_p4 = por %p6309_p1, %p62_p0  ;;  %p211_p7 = scmp.lt.s32.totalorder %s5256_s23, 3 }
  0x10   : > { %p5345_p6 = por %p204_p3, %p62_p0  ;;  %s5258_s29 = smov [#allocation6]  }
  0x11   : > { %s6330_s26 = scalar_select %p5340_p4, 1, 0 }
  0x12   : > { %s6331_s27 = scalar_select %p5345_p6, 1, 0 }
  0x13   : > { %p5350_p8 = pnand %p3562_p5, %p211_p7  ;;  %s225_s30 = sshll.u32 %s5258_s29, 4  ;;  %s226_s30 = int_to_ptr.vmem [resolvable:$true] %s225_s30 }
  0x14   : > { %6332 = sst [smem:[#allocation20_spill]] %s6331_s27  ;;  %s38_s7 = sadd.s32 1, %s5252_s22 }
  0x15   : > { %s6333_s28 = scalar_select %p5350_p8, 1, 0 }
  0x16   : > { %p4758_p9 = pneg %p5350_p8  ;;  %s6335_s1 = sld [smem:[#allocation26_spill]] }
  0x18   : > { %p5359_p11 = pnand %p4758_p9, %p6309_p1 }
  0x1a   : > { %s6334_s6 = scalar_select %p5359_p11, 1, 0 }
  0x1b   : > { %p5372_p13 = pneg %p5359_p11 }
  0x1c   : > { %s5018_s10 = scalar_lea.hbm %s6335_s1, 9216 }
  0x1d   : > { %p5019_p12 = scmp.ne.s32.totalorder %s6335_s1, %s5018_s10  ;;  %p5025_p5 = scmp.lt.u32.totalorder %s5018_s10, %s6335_s1 }
  0x1f   : > { %p5021_p0 = pnand %p5372_p13, %p5019_p12 }
  0x21   : > { %p5022_p3 = pneg %p5021_p0 }
  0x23   : > { %p5027_p7 = pnand %p5025_p5, %p5022_p3 }
  0x25   : > { %5030 = shalt.err (!%p5027_p7)
}
  0x26   : > { %s5031_s16 = scalar_lea.vmem %s226_s30, 9216  ;;  %p5039_p2 = scmp.lt.s32.totalorder %s226_s30, %s226_s30 }
  0x27   : > { %p5032_p9 = scmp.ne.s32.totalorder %s226_s30, %s5031_s16  ;;  %p5040_p6 = scmp.lt.s32.totalorder %s5031_s16, %s5031_s16 }
  0x29   : > { %p5034_p10 = pnand %p5032_p9, %p5372_p13  ;;  %p5041_p4 = por %p5040_p6, %p5039_p2 }
  0x2b   : > { %p5035_p1 = pneg %p5034_p10 }
  0x2d   : > { %p5042_p8 = pnand %p5041_p4, %p5035_p1 }
  0x2f   : > { %5045 = shalt.err (!%p5042_p8)
}
  0x30   : > { %s6312_s17 = smov 64   ;;  %s6313_s25 = smov 4  }
  0x31   : > { %4761 = dma.hbm_to_vmem [thread:$0]  (!%p5359_p11), %s6335_s1, 9216, %s226_s30, [#allocation7], %s6312_s17, %s6312_s17, %s6313_s25  }
  0x32   : > { %p40_p1 = scmp.ge.s32.totalorder %s38_s7, 2  ;;  %s49_s9 = sadd.s32 1, %s5244_s20 }
  0x33   : > { %p56_p2 = scmp.ne.s32.totalorder %s5244_s20, %s5240_s19  ;;  %p57_p4 = scmp.eq.s32.totalorder %s5256_s23, 0 }
  0x34   : > { %s6374_s7 = smov (%p40_p1, %s38_s7), 0  ;;  %p6338_p8 = scmp.eq.s32.totalorder %s5331_s24, 1 }
  0x35   : > { %6337 = sst [smem:[#allocation21_spill]] %s6374_s7  ;;  %p58_p6 = por %p57_p4, %p56_p2 }
  0x36   : > { %p5399_p10 = por %p6338_p8, %p56_p2  ;;  %s46_s11 = ssub.s32 %s5252_s22, %s6374_s7 }
  0x37   : > { %p4782_p12 = scmp.lt.s32.totalorder %s5256_s23, 2  ;;  %p47_p0 = scmp.eq.s32.totalorder %s46_s11, 0 }
  0x38   : > { %s6339_s10 = scalar_select %p5399_p10, 1, 0 }
  0x39   : > { %s265_s12 = sand.u32 1, %s5256_s23   ;;  %s6314_s14 = sand.u32 1, %s5244_s20  }
  0x3a   : > { %s5409_s30 = scalar_select %p47_p0, %s5244_s20, %s49_s9  }
  0x3b   : > { %s4737_s15 = smul.u32 432, %s6314_s14  ;;  %p5413_p3 = pnand %p4782_p12, %p58_p6 }
  0x3c   : > { %6340 = sst [smem:[#allocation22_spill]] %s5409_s30  ;;  %s4738_s29 = smul.u32 6912, %s5252_s22 }
  0x3d   : > { %s6341_s16 = scalar_select %p5413_p3, 1, 0 }
  0x3e   : > { %s6342_s0 = sld [smem:[#allocation25_spill]]  ;;  %s269_s9 = scalar_lea.vmem [#allocation3], %s4737_s15 }
  0x3f   : > { %s276_s11 = sshll.u32 %s269_s9, 4  ;;  %s5425_s14 = scalar_lea.sflag [#allocation4], %s265_s12  ;;  %s5423_s11 = int_to_ptr.vmem [resolvable:$true] %s276_s11 }
  0x40   : > { %p6323_p7 = pneg %p5413_p3 }
  0x44   : > { %s5421_s25 = scalar_lea.hbm %s6342_s0, %s4738_s29  ;;  %s5051_s8 = scalar_lea.hbm %s6342_s0, 13824 }
  0x45   : > { %s5046_s1 = scalar_lea.hbm %s5421_s25, 6912  ;;  %p5052_p2 = scmp.lt.u32.totalorder %s5421_s25, %s6342_s0 }
  0x46   : > { %p5047_p5 = scmp.ne.s32.totalorder %s5421_s25, %s5046_s1  ;;  %p5053_p4 = scmp.lt.u32.totalorder %s5051_s8, %s5046_s1 }
  0x47   : > { %p5055_p8 = scmp.lt.u32.totalorder %s5046_s1, %s5421_s25 }
  0x48   : > { %p5049_p9 = pnand %p6323_p7, %p5047_p5  ;;  %p5054_p6 = por %p5053_p4, %p5052_p2 }
  0x4a   : > { %p5050_p1 = pneg %p5049_p9  ;;  %p5056_p12 = por %p5055_p8, %p5054_p6 }
  0x4c   : > { %p5057_p0 = pnand %p5056_p12, %p5050_p1 }
  0x4e   : > { %5060 = shalt.err (!%p5057_p0)
}
  0x4f   : > { %s5061_s12 = scalar_lea.vmem %s5423_s11, 6912  ;;  %s5261_s15 = smov [#allocation3]  }
  0x50   : > { %p5062_p5 = scmp.ne.s32.totalorder %s5423_s11, %s5061_s12  ;;  %s5066_s9 = sshll.u32 %s5261_s15, 4  ;;  %s5067_s9 = int_to_ptr.vmem [resolvable:$false] %s5066_s9 }
  0x51   : > { %s5068_s7 = scalar_lea.vmem %s5067_s9, 13824  ;;  %p5069_p11 = scmp.lt.s32.totalorder %s5423_s11, %s5067_s9 }
  0x52   : > { %p5064_p9 = pnand %p5062_p5, %p6323_p7  ;;  %p5070_p2 = scmp.lt.s32.totalorder %s5068_s7, %s5061_s12 }
  0x54   : > { %p5065_p10 = pneg %p5064_p9  ;;  %p5071_p4 = por %p5070_p2, %p5069_p11 }
  0x56   : > { %p5072_p6 = pnand %p5071_p4, %p5065_p10 }
  0x58   : > { %5075 = shalt.err (!%p5072_p6)
}
  0x59   : > { %s5262_s1 = smov 192   ;;  %s5263_s30 = smov 12  }
  0x5a   : > { %4771 = dma.hbm_to_vmem [thread:$0]  (!%p5413_p3), %s5421_s25, 6912, %s5423_s11, %s5425_s14, %s5262_s1, %s5262_s1, %s5263_s30  }
  0x5b   : > { %s6343_s17 = sand.u32 1, %s5244_s20   ;;  %s5264_s8 = smov [#allocation8]  }
  0x5c   : > { %s5455_s29 = sshll.u32 %s6343_s17, 7  ;;  %s241_s15 = sshll.u32 %s5264_s8, 4  ;;  %s242_s15 = int_to_ptr.vmem [resolvable:$true] %s241_s15 }
  0x5d   : > { %s5076_s7 = scalar_lea.hbm %s6305_s2, 16 }
  0x5e   : > { %p5077_p11 = scmp.ne.s32.totalorder %s6305_s2, %s5076_s7  ;;  %p5083_p8 = scmp.lt.u32.totalorder %s5076_s7, %s6305_s2 }
  0x60   : > { %p5079_p10 = pnand %p5077_p11, %p5372_p13 }
  0x62   : > { %p5080_p1 = pneg %p5079_p10 }
  0x64   : > { %p5085_p12 = pnand %p5083_p8, %p5080_p1 }
  0x66   : > { %5088 = shalt.err (!%p5085_p12)
}
  0x67   : > { %s5089_s25 = scalar_lea.vmem %s242_s15, 16  ;;  %s5096_s11 = scalar_lea.vmem %s242_s15, 32 }
  0x68   : > { %p5090_p0 = scmp.ne.s32.totalorder %s242_s15, %s5089_s25  ;;  %p5097_p2 = scmp.lt.s32.totalorder %s242_s15, %s242_s15 }
  0x69   : > { %p5098_p4 = scmp.lt.s32.totalorder %s5096_s11, %s5089_s25 }
  0x6a   : > { %p5092_p5 = pnand %p5090_p0, %p5372_p13 }
  0x6b   : > { %p5099_p6 = por %p5098_p4, %p5097_p2 }
  0x6c   : > { %p5093_p9 = pneg %p5092_p5 }
  0x6e   : > { %p5100_p7 = pnand %p5099_p6, %p5093_p9 }
  0x70   : > { %5103 = shalt.err (!%p5100_p7)
}
  0x71   : > { %p6344_p11 = scmp.ne.s32.totalorder %s6334_s6, 0  ;;  %s5265_s18 = smov [#allocation9]  }
  0x72   : > { %s254_s27 = sshll.u32 %s5265_s18, 4  ;;  %s3928_s1 = sshll.u32 %s5252_s22, 11  ;;  %s255_s27 = int_to_ptr.vmem [resolvable:$true] %s254_s27 }
  0x73   : > { %4764 = dma.hbm_to_vmem [thread:$0]  (!%p6344_p11), %s6305_s2, 16, %s242_s15, [#allocation7]  }
  0x74   : > { %s5479_s8 = scalar_lea.hbm %s6307_s4, %s3928_s1  ;;  %s5104_s7 = scalar_lea.hbm %s6306_s3, 16 }
  0x75   : > { %p5105_p7 = scmp.ne.s32.totalorder %s6306_s3, %s5104_s7  ;;  %p5111_p8 = scmp.lt.u32.totalorder %s5104_s7, %s6306_s3 }
  0x77   : > { %p5107_p10 = pnand %p5105_p7, %p5372_p13 }
  0x79   : > { %p5108_p1 = pneg %p5107_p10 }
  0x7b   : > { %p5113_p12 = pnand %p5111_p8, %p5108_p1 }
  0x7d   : > { %5116 = shalt.err (!%p5113_p12)
}
  0x7e   : > { %s5117_s23 = scalar_lea.vmem %s255_s27, 16  ;;  %s5124_s18 = scalar_lea.vmem %s255_s27, 32 }
  0x7f   : > { %p5118_p0 = scmp.ne.s32.totalorder %s255_s27, %s5117_s23  ;;  %p5125_p2 = scmp.lt.s32.totalorder %s255_s27, %s255_s27 }
  0x80   : > { %p5126_p4 = scmp.lt.s32.totalorder %s5124_s18, %s5117_s23 }
  0x81   : > { %p5120_p5 = pnand %p5118_p0, %p5372_p13 }
  0x82   : > { %p5127_p6 = por %p5126_p4, %p5125_p2 }
  0x83   : > { %p5121_p9 = pneg %p5120_p5 }
  0x85   : > { %p5128_p3 = pnand %p5127_p6, %p5121_p9 }
  0x87   : > { %5131 = shalt.err (!%p5128_p3)
}
  0x88   : > { %4767 = dma.hbm_to_vmem [thread:$0]  (!%p6344_p11), %s6306_s3, 16, %s255_s27, [#allocation10]  }
  0x89   : > { %s290_s13 = scalar_lea.vmem [#allocation11], %s5455_s29  ;;  %s5132_s12 = scalar_lea.hbm %s5479_s8, 2048 }
  0x8a   : > { %s301_s17 = sshll.u32 %s290_s13, 4  ;;  %p5133_p13 = scmp.ne.s32.totalorder %s5479_s8, %s5132_s12  ;;  %s5500_s17 = int_to_ptr.vmem [resolvable:$true] %s301_s17 }
  0x8b   : > { %p6345_p7 = scmp.ne.s32.totalorder %s6341_s16, 0  ;;  %s5137_s7 = scalar_lea.hbm %s6307_s4, 4096 }
  0x8c   : > { %p5138_p8 = scmp.lt.u32.totalorder %s5479_s8, %s6307_s4  ;;  %p5139_p12 = scmp.lt.u32.totalorder %s5137_s7, %s5132_s12 }
  0x8d   : > { %p6346_p3 = pneg %p6345_p7  ;;  %p5141_p0 = scmp.lt.u32.totalorder %s5132_s12, %s5479_s8 }
  0x8e   : > { %p5140_p11 = por %p5139_p12, %p5138_p8 }
  0x8f   : > { %p5135_p10 = pnand %p5133_p13, %p6346_p3 }
  0x90   : > { %p5142_p5 = por %p5141_p0, %p5140_p11 }
  0x91   : > { %p5136_p1 = pneg %p5135_p10 }
  0x93   : > { %p5143_p9 = pnand %p5142_p5, %p5136_p1 }
  0x95   : > { %5146 = shalt.err (!%p5143_p9)
}
  0x96   : > { %s5147_s29 = scalar_lea.vmem %s5500_s17, 2048  ;;  %p6347_p4 = pmov %p6346_p3 }
  0x97   : > { %p5148_p2 = scmp.ne.s32.totalorder %s5500_s17, %s5147_s29  ;;  %s5266_s27 = smov [#allocation11]  }
  0x98   : > { %s5152_s15 = sshll.u32 %s5266_s27, 4  ;;  %s5153_s15 = int_to_ptr.vmem [resolvable:$false] %s5152_s15 }
  0x99   : > { %p5150_p6 = pnand %p5148_p2, %p6347_p4  ;;  %s5154_s0 = scalar_lea.vmem %s5153_s15, 4096 }
  0x9a   : > { %p5155_p3 = scmp.lt.s32.totalorder %s5500_s17, %s5153_s15  ;;  %p5156_p10 = scmp.lt.s32.totalorder %s5154_s0, %s5147_s29 }
  0x9b   : > { %p5151_p13 = pneg %p5150_p6 }
  0x9c   : > { %p5157_p8 = por %p5156_p10, %p5155_p3 }
  0x9e   : > { %p5158_p12 = pnand %p5157_p8, %p5151_p13 }
  0xa0   : > { %5161 = shalt.err (!%p5158_p12)
}
  0xa1   : > { %s6348_s23 = smov 4   ;;  %s6349_s18 = smov 64  }
  0xa2   : > { %4774 = dma.hbm_to_vmem [thread:$0]  (!%p6345_p7), %s5479_s8, 2048, %s5500_s17, %s5425_s14, %s6349_s18, %s6349_s18, %s6348_s23  }
  0xa3   : > { %p6350_p1 = scmp.ne.s32.totalorder %s6333_s28, 0 }
  0xa5   : > { %313 = sbr.rel (%p6350_p1) target bundleno = 745 (0x2e9), region = 40 }
  0xac   : > { %s315_s1 = sand.u32 1, %s5331_s24   ;;  %s5533_s30 = sand.u32 1, %s5240_s19  }
  0xad   : > { %s4739_s13 = smul.u32 432, %s5533_s30  ;;  %s316_s12 = scalar_lea.sflag [#allocation4], %s315_s1 }
  0xae   : > { %p6351_p11 = scmp.ne.s32.totalorder %s6330_s26, 0 }
  0xaf   : > { %s5536_s16 = scalar_lea.vmem [#allocation3], %s4739_s13 }
  0xb0   : > { %5215 = dma.done.wait (%p6351_p11), %s316_s12, 6912  }
  0xb1   : > { %5217 = vsyncadd (%p6351_p11), %s316_s12, 4294960384  ;;  %p6352_p7 = scmp.eq.s32.totalorder %s5331_s24, 0 }
  0xb3   : > { %5219 = dma.done.wait (%p6352_p7), [#allocation7], 9232   ;;  %p6353_p0 = pmov %p6352_p7 }
  0xb5   : > { %5221 = vsyncadd (%p6353_p0), [#allocation7], 4294958064  ;;  %p6354_p5 = pmov %p6353_p0 }
  0xb6   : > { %p6355_p9 = pmov %p6353_p0 }
  0xb7   : > { %5223 = dma.done.wait (%p6354_p5), [#allocation10], 16  }
  0xb8   : > { %5225 = vsyncadd (%p6355_p9), [#allocation10], 4294967280  ;;  %s3575_s28 = sshll.u32 %s5533_s30, 7 }
  0xb9   : > { %s5551_s14 = scalar_lea.vmem [#allocation11], %s3575_s28 }
  0xba   : > { %5227 = dma.done.wait (%p6351_p11), %s316_s12, 2048  }
  0xbb   : > { %5229 = vsyncadd (%p6351_p11), %s316_s12, 4294965248  ;;  %v4844_v0 = vld [vmem:[#allocation6 + $0x40] sm:$0xff]   ;;  %v4847_v3 = vld [vmem:[#allocation6 + $0x48] sm:$0xff]   ;;  %s3576_s24 = sshll.u32 %s5533_s30, 8  ;;  %s3929_s8 = sshll.u32 %s5248_s21, 12 }
  0xbc   : > { %v5557_v1 = vld [vmem:[#allocation6 + $0x80] sm:$0xff]   ;;  %4009 = vmatprep.subr.bf16.mxu0 %v4844_v0  ;;  %v5561_v4 = vld [vmem:[#allocation6 + $0x88] sm:$0xff]   ;;  %v4850_v6 = vld [vmem:[#allocation6 + $0x50] sm:$0xff]   ;;  %s6098_s26 = scalar_lea.vmem [#allocation12], %s3576_s24  ;;  %s6250_s7 = scalar_lea.hbm %s6308_s5, %s3929_s8 }
  0xbd   : > { %v4846_v2 = vld [vmem:[#allocation6] sm:$0xff]   ;;  %4561 = vmatprep.subr.bf16.mxu1 %v5557_v1  ;;  %v4849_v5 = vld [vmem:[#allocation6 + $0x8] sm:$0xff]   ;;  %v5564_v7 = vld [vmem:[#allocation6 + $0x90] sm:$0xff]   ;;  %s3403_s17 = sshll.u32 %s6098_s26, 4  ;;  %s3386_s25 = scalar_lea.sflag [#allocation5], %s5533_s30  ;;  %s6252_s17 = int_to_ptr.vmem [resolvable:$true] %s3403_s17 }
  0xbe   : > { %4010 = vmatpush3.bf16.msra.mxu0 %v4846_v2  ;;  %4569 = vmatpush3.bf16.msra.mxu1 %v5557_v1  ;;  %v4852_v8 = vld [vmem:[#allocation6 + $0x10] sm:$0xff]   ;;  %v4853_v9 = vld [vmem:[#allocation6 + $0x58] sm:$0xff]   ;;  %v4856_v12 = vld [vmem:[#allocation6 + $0x60] sm:$0xff]   ;;  %s5162_s21 = scalar_lea.vmem %s6252_s17, 4096  ;;  %p6360_p4 = scmp.ne.s32.totalorder %s6339_s10, 0 }
  0xbf   : > { %4011 = vmatprep.subr.bf16.mxu0 %v4847_v3  ;;  %4562 = vmatprep.subr.bf16.mxu1 %v5561_v4  ;;  %v5568_v10 = vld [vmem:[#allocation6 + $0x98] sm:$0xff]   ;;  %v5572_v13 = vld [vmem:[#allocation6 + $0xa0] sm:$0xff]   ;;  %v4859_v15 = vld [vmem:[#allocation6 + $0x68] sm:$0xff]   ;;  %p5163_p2 = scmp.ne.s32.totalorder %s6252_s17, %s5162_s21  ;;  %s5267_s11 = smov [#allocation12]  }
  0xc0   : > { %v4855_v11 = vld [vmem:[#allocation6 + $0x18] sm:$0xff]   ;;  %v4858_v14 = vld [vmem:[#allocation6 + $0x20] sm:$0xff]   ;;  %v5576_v16 = vld [vmem:[#allocation6 + $0xa8] sm:$0xff]   ;;  %s5166_s29 = sshll.u32 %s5267_s11, 4  ;;  %s5167_s29 = int_to_ptr.vmem [resolvable:$false] %s5166_s29 }
  0xc1   : > { %v4861_v17 = vld [vmem:[#allocation6 + $0x28] sm:$0xff]   ;;  %v4862_v18 = vld [vmem:[#allocation6 + $0x70] sm:$0xff]   ;;  %v4865_v21 = vld [vmem:[#allocation6 + $0x78] sm:$0xff]   ;;  %p5164_p6 = pnand %p5163_p2, %p6360_p4  ;;  %s5168_s27 = scalar_lea.vmem %s5167_s29, 8192 }
  0xc2   : > { %4012 = vmatpush3.bf16.msra.mxu0 %v4849_v5  ;;  %4570 = vmatpush3.bf16.msra.mxu1 %v5561_v4  ;;  %v5580_v19 = vld [vmem:[#allocation6 + $0xb0] sm:$0xff]   ;;  %v5583_v22 = vld [vmem:[#allocation6 + $0xb8] sm:$0xff]   ;;  %v4873_v26 = vld [vmem:[#allocation6 + $0x100] sm:$0xff]   ;;  %p5169_p3 = scmp.lt.s32.totalorder %s6252_s17, %s5167_s29  ;;  %p5170_p10 = scmp.lt.s32.totalorder %s5168_s27, %s5162_s21 }
  0xc3   : > { %4013 = vmatprep.subr.bf16.mxu0 %v4850_v6  ;;  %4563 = vmatprep.subr.bf16.mxu1 %v5564_v7  ;;  %v4864_v20 = vld [vmem:[#allocation6 + $0x30] sm:$0xff]   ;;  %v4867_v25 = vld [vmem:[#allocation6 + $0x38] sm:$0xff]   ;;  %v4874_v29 = vld [vmem:[#allocation6 + $0xc0] sm:$0xff]   ;;  %p5165_p13 = pneg %p5164_p6 }
  0xc4   : > { %v4870_v23 = vld [vmem:[%s5536_s16 + $0x4] ss:$12 sps:$4 sm:$0xff]   ;;  %v4871_v24 = vld [vmem:[%s5536_s16 + $0xc8] ss:$12 sps:$4 sm:$0xff]   ;;  %v4868_v27 = vld [vmem:[%s5536_s16] ss:$12 sps:$4 sm:$0xff]   ;;  %p5171_p8 = por %p5170_p10, %p5169_p3 }
  0xc5   : > { %923 = vmatprep.mubr.bf16.mxu0 %v4870_v23  ;;  %4449 = vmatprep.mubr.bf16.mxu1 %v4871_v24  ;;  %v4872_v28 = vld [vmem:[%s5536_s16 + $0xe0] ss:$12 sps:$4 sm:$0xff]   ;;  %v5595_v31 = vld [vmem:[%s5536_s16 + $0x1c] ss:$12 sps:$4 sm:$0xff]   ;;  %v4879_v32 = vld [vmem:[%s5536_s16 + $0xf8] ss:$12 sps:$4 sm:$0xff]  }
  0xc6   : > { %4014 = vmatpush3.bf16.msra.mxu0 %v4852_v8  ;;  %4571 = vmatpush3.bf16.msra.mxu1 %v5564_v7  ;;  %v4875_v30 = vld [vmem:[#allocation6 + $0x108] sm:$0xff]   ;;  %v4882_v35 = vld [vmem:[#allocation6 + $0x110] sm:$0xff]   ;;  %v4884_v38 = vld [vmem:[#allocation6 + $0x118] sm:$0xff]   ;;  %p5172_p12 = pnand %p5171_p8, %p5165_p13 }
  0xc7   : > { %4015 = vmatprep.subr.bf16.mxu0 %v4853_v9  ;;  %4564 = vmatprep.subr.bf16.mxu1 %v5568_v10  ;;  %v4876_v33 = vld [vmem:[#allocation6 + $0xc8] sm:$0xff]   ;;  %v4883_v37 = vld [vmem:[#allocation6 + $0xd0] sm:$0xff]   ;;  %v4885_v41 = vld [vmem:[#allocation6 + $0xd8] sm:$0xff]  }
  0xc8   : > { %v5601_v34 = vld [vmem:[%s5536_s16 + $0x18] ss:$12 sps:$4 sm:$0xff]   ;;  %v4881_v36 = vld [vmem:[%s5536_s16 + $0x110] ss:$12 sps:$4 sm:$0xff]   ;;  %v5606_v39 = vld [vmem:[%s5536_s16 + $0x34] ss:$12 sps:$4 sm:$0xff]  }
  0xc9   : > { %v4888_v40 = vld [vmem:[%s5536_s16 + $0x128] ss:$12 sps:$4 sm:$0xff]   ;;  %v5614_v42 = vld [vmem:[%s5536_s16 + $0x30] ss:$12 sps:$4 sm:$0xff]   ;;  %v4890_v43 = vld [vmem:[%s5536_s16 + $0x140] ss:$12 sps:$4 sm:$0xff]  }
  0xca   : > { %4016 = vmatpush3.bf16.msra.mxu0 %v4855_v11  ;;  %4572 = vmatpush3.bf16.msra.mxu1 %v5568_v10  ;;  %v4891_v44 = vld [vmem:[#allocation6 + $0x120] sm:$0xff]   ;;  %v4893_v46 = vld [vmem:[#allocation6 + $0x128] sm:$0xff]   ;;  %v4900_v50 = vld [vmem:[#allocation6 + $0x130] sm:$0xff]  }
  0xcb   : > { %4017 = vmatprep.subr.bf16.mxu0 %v4856_v12  ;;  %4565 = vmatprep.subr.bf16.mxu1 %v5572_v13  ;;  %v4892_v45 = vld [vmem:[#allocation6 + $0xe0] sm:$0xff]   ;;  %v5620_v47 = vld [vmem:[%s5536_s16 + $0x4c] ss:$12 sps:$4 sm:$0xff]   ;;  %v4901_v53 = vld [vmem:[#allocation6 + $0xf0] sm:$0xff]  }
  0xcc   : > { %v4897_v48 = vld [vmem:[%s5536_s16 + $0x158] ss:$12 sps:$4 sm:$0xff]   ;;  %v5627_v51 = vld [vmem:[%s5536_s16 + $0x48] ss:$12 sps:$4 sm:$0xff]   ;;  %v4899_v52 = vld [vmem:[%s5536_s16 + $0x170] ss:$12 sps:$4 sm:$0xff]  }
  0xcd   : > { %v4894_v49 = vld [vmem:[#allocation6 + $0xe8] sm:$0xff]   ;;  %v5633_v54 = vld [vmem:[%s5536_s16 + $0x64] ss:$12 sps:$4 sm:$0xff]   ;;  %v4902_v55 = vld [vmem:[#allocation6 + $0x138] sm:$0xff]  }
  0xce   : > { %4018 = vmatpush3.bf16.msra.mxu0 %v4858_v14  ;;  %4573 = vmatpush3.bf16.msra.mxu1 %v5572_v13  ;;  %v4903_v56 = vld [vmem:[#allocation6 + $0xf8] sm:$0xff]   ;;  %v4907_v57 = vld [vmem:[#allocation6 + $0x140] sm:$0xff]   ;;  %v4914_v60 = vld [vmem:[#allocation6 + $0x148] sm:$0xff]  }
  0xcf   : > { %4019 = vmatprep.subr.bf16.mxu0 %v4859_v15  ;;  %4566 = vmatprep.subr.bf16.mxu1 %v5576_v16  ;;  %v5641_v58 = vld [vmem:[%s5536_s16 + $0x60] ss:$12 sps:$4 sm:$0xff]   ;;  %v5645_v59 = vld [vmem:[%s5536_s16 + $0x7c] ss:$12 sps:$4 sm:$0xff]   ;;  %v5654_v62 = vld [vmem:[%s5536_s16 + $0x78] ss:$12 sps:$4 sm:$0xff]  }
  0xd0   : > { %v4921_v61 = vld [vmem:[#allocation6 + $0x150] sm:$0xff]   ;;  %v4928_v0 = vld [vmem:[#allocation6 + $0x158] sm:$0xff]   ;;  %v4948_v2 = vld [vmem:[#allocation6 + $0x1c0] sm:$0xff]  }
  0xd1   : > { %v5658_v63 = vld [vmem:[%s5536_s16 + $0x94] ss:$12 sps:$4 sm:$0xff]   ;;  %v5665_v3 = vld [vmem:[%s5536_s16 + $0x90] ss:$12 sps:$4 sm:$0xff]   ;;  %v5695_v12 = vld [vmem:[%s5536_s16 + $0xd8] ss:$12 sps:$4 sm:$0xff]  }
  0xd2   : > { %4020 = vmatpush3.bf16.msra.mxu0 %v4861_v17  ;;  %4574 = vmatpush3.bf16.msra.mxu1 %v5576_v16  ;;  %v4942_v5 = vld [vmem:[#allocation6 + $0x168] sm:$0xff]   ;;  %v4950_v6 = vld [vmem:[#allocation6 + $0x170] sm:$0xff]   ;;  %v4963_v9 = vld [vmem:[#allocation6 + $0x178] sm:$0xff]  }
  0xd3   : > { %4021 = vmatprep.subr.bf16.mxu0 %v4862_v18  ;;  %4567 = vmatprep.subr.bf16.mxu1 %v5580_v19  ;;  %v5678_v8 = vld [vmem:[%s5536_s16 + $0xc4] ss:$12 sps:$4 sm:$0xff]   ;;  %v5688_v11 = vld [vmem:[%s5536_s16 + $0xdc] ss:$12 sps:$4 sm:$0xff]   ;;  %v5751_v24 = vld [vmem:[%s5536_s16 + $0x16c] ss:$12 sps:$4 sm:$0xff]  }
  0xd4   : > { %v5700_v14 = vld [vmem:[#allocation6 + $0x200] sm:$0xff]  }
  0xd5   : > { %v5708_v15 = vld [vmem:[%s5536_s16 + $0xf0] ss:$12 sps:$4 sm:$0xff]   ;;  %v5718_v17 = vld [vmem:[%s5536_s16 + $0x108] ss:$12 sps:$4 sm:$0xff]  }
  0xd6   : > { %4022 = vmatpush3.bf16.msra.mxu0 %v4864_v20  ;;  %4575 = vmatpush3.bf16.msra.mxu1 %v5580_v19  ;;  %v5721_v18 = vld [vmem:[%s5536_s16 + $0x124] ss:$12 sps:$4 sm:$0xff]   ;;  %v5731_v20 = vld [vmem:[%s5536_s16 + $0x13c] ss:$12 sps:$4 sm:$0xff]  }
  0xd7   : > { %4023 = vmatprep.subr.bf16.mxu0 %v4865_v21  ;;  %4568 = vmatprep.subr.bf16.mxu1 %v5583_v22  ;;  %v5738_v21 = vld [vmem:[%s5536_s16 + $0x138] ss:$12 sps:$4 sm:$0xff]   ;;  %v5748_v23 = vld [vmem:[%s5536_s16 + $0x150] ss:$12 sps:$4 sm:$0xff]  }
  0xda   : > { %4024 = vmatpush3.bf16.msra.mxu0 %v4867_v25  ;;  %4576 = vmatpush3.bf16.msra.mxu1 %v5583_v22  ;;  %v5758_v25 = vld [vmem:[%s5536_s16 + $0x168] ss:$12 sps:$4 sm:$0xff]  }
  0xdb   : > { %4417 = vmatprep.subr.bf16.mxu0 %v5557_v1  ;;  %4145 = vmatprep.subr.bf16.mxu1 %v4873_v26  ;;  %v4946_v26 = vld [vmem:[%s5536_s16 + $0x8] ss:$12 sps:$4 sm:$0xff]  }
  0xdd   : > { %924 = vmatmul.mubr.bf16.vlgmr.msra.gmra.mrb[0].mxu0 %v4868_v27  ;;  %4450 = vmatmul.mubr.bf16.vlgmr.msra.gmra.mrb[0].mxu1 %v4872_v28  ;;  %v4947_v27 = vld [vmem:[%s5536_s16 + $0x20] ss:$12 sps:$4 sm:$0xff]  }
  0xde   : > { %4418 = vmatpush3.bf16.msra.mxu0 %v5557_v1  ;;  %4146 = vmatpush3.bf16.msra.mxu1 %v4874_v29  ;;  %v4935_v1 = vld [vmem:[#allocation6 + $0x160] sm:$0xff]  }
  0xdf   : > { %4147 = vmatprep.subr.bf16.mxu1 %v4875_v30  ;;  %931 = vmatprep.mubr.bf16.mxu0 %v5595_v31  ;;  %v4949_v28 = vld [vmem:[#allocation6 + $0x180] sm:$0xff]   ;;  %v4951_v30 = vld [vmem:[#allocation6 + $0x1c8] sm:$0xff]  }
  0xe0   : > { %4453 = vmatprep.mubr.bf16.mxu1 %v4879_v32  ;;  %4419 = vmatprep.subr.bf16.mxu0 %v5561_v4  ;;  %v4953_v29 = vld [vmem:[%s5536_s16 + $0x38] ss:$12 sps:$4 sm:$0xff]  }
  0xe1   : > { %v4955_v32 = vld [vmem:[#allocation6 + $0x1d0] sm:$0xff]  }
  0xe2   : > { %4148 = vmatpush3.bf16.msra.mxu1 %v4876_v33  ;;  %4420 = vmatpush3.bf16.msra.mxu0 %v5561_v4  ;;  %v5668_v4 = vld [vmem:[%s5536_s16 + $0xac] ss:$12 sps:$4 sm:$0xff]   ;;  %v4954_v33 = vld [vmem:[%s5536_s16 + $0x50] ss:$12 sps:$4 sm:$0xff]  }
  0xe3   : > { %4149 = vmatprep.subr.bf16.mxu1 %v4882_v35  ;;  %4421 = vmatprep.subr.bf16.mxu0 %v5564_v7  ;;  %v4959_v35 = vld [vmem:[%s5536_s16 + $0x68] ss:$12 sps:$4 sm:$0xff]  }
  0xe5   : > { %932 = vmatmul.mubr.bf16.gmra.mrb[4].mxu0 %v5601_v34  ;;  %4454 = vmatmul.mubr.bf16.gmra.mrb[4].mxu1 %v4881_v36  ;;  %v4957_v36 = vld [vmem:[#allocation6 + $0x1d8] sm:$0xff]  }
  0xe6   : > { %4150 = vmatpush3.bf16.msra.mxu1 %v4883_v37  ;;  %939 = vmatprep.mubr.bf16.mxu0 %v5606_v39  ;;  %v4958_v37 = vld [vmem:[#allocation6 + $0x198] sm:$0xff]  }
  0xe7   : > { %4151 = vmatprep.subr.bf16.mxu1 %v4884_v38  ;;  %4457 = vmatprep.mubr.bf16.mxu1 %v4888_v40  ;;  %v4961_v38 = vld [vmem:[#allocation6 + $0x1e0] sm:$0xff]  }
  0xe8   : > { %4422 = vmatpush3.bf16.msra.mxu0 %v5564_v7  ;;  %v5675_v7 = vld [vmem:[%s5536_s16 + $0xa8] ss:$12 sps:$4 sm:$0xff]   ;;  %v4960_v40 = vld [vmem:[%s5536_s16 + $0x80] ss:$12 sps:$4 sm:$0xff]  }
  0xe9   : > { %4423 = vmatprep.subr.bf16.mxu0 %v5568_v10 }
  0xea   : > { %4152 = vmatpush3.bf16.msra.mxu1 %v4885_v41  ;;  %v4962_v41 = vld [vmem:[#allocation6 + $0x1a0] sm:$0xff]  }
  0xeb   : > { %4153 = vmatprep.subr.bf16.mxu1 %v4891_v44  ;;  %v4964_v44 = vld [vmem:[#allocation6 + $0x1e8] sm:$0xff]  }
  0xec   : > { %4424 = vmatpush3.bf16.msra.mxu0 %v5568_v10  ;;  %v5685_v10 = vld [vmem:[%s5536_s16 + $0xc0] ss:$12 sps:$4 sm:$0xff]  }
  0xed   : > { %940 = vmatmul.mubr.bf16.gmra.mrb[8].mxu0 %v5614_v42  ;;  %4458 = vmatmul.mubr.bf16.gmra.mrb[8].mxu1 %v4890_v43  ;;  %v4966_v43 = vld [vmem:[%s5536_s16 + $0x98] ss:$12 sps:$4 sm:$0xff]  }
  0xee   : > { %4154 = vmatpush3.bf16.msra.mxu1 %v4892_v45  ;;  %947 = vmatprep.mubr.bf16.mxu0 %v5620_v47  ;;  %v5775_v45 = vld [vmem:[%s5536_s16 + $0x184] ss:$12 sps:$4 sm:$0xff]  }
  0xef   : > { %4155 = vmatprep.subr.bf16.mxu1 %v4893_v46  ;;  %4461 = vmatprep.mubr.bf16.mxu1 %v4897_v48  ;;  %v4965_v46 = vld [vmem:[#allocation6 + $0x1a8] sm:$0xff]   ;;  %v4971_v48 = vld [vmem:[#allocation6 + $0x1f0] sm:$0xff]  }
  0xf0   : > { %4425 = vmatprep.subr.bf16.mxu0 %v5572_v13 }
  0xf1   : > { %4426 = vmatpush3.bf16.msra.mxu0 %v5572_v13  ;;  %v5698_v13 = vld [vmem:[%s5536_s16 + $0xf4] ss:$12 sps:$4 sm:$0xff]  }
  0xf2   : > { %4156 = vmatpush3.bf16.msra.mxu1 %v4894_v49  ;;  %4427 = vmatprep.subr.bf16.mxu0 %v5576_v16  ;;  %v4969_v49 = vld [vmem:[%s5536_s16 + $0xb0] ss:$12 sps:$4 sm:$0xff]  }
  0xf3   : > { %4157 = vmatprep.subr.bf16.mxu1 %v4900_v50  ;;  %v5781_v50 = vld [vmem:[%s5536_s16 + $0x180] ss:$12 sps:$4 sm:$0xff]  }
  0xf5   : > { %948 = vmatmul.mubr.bf16.gmra.mrb[12].mxu0 %v5627_v51  ;;  %4462 = vmatmul.mubr.bf16.gmra.mrb[12].mxu1 %v4899_v52  ;;  %v4972_v52 = vld [vmem:[#allocation6 + $0x1b0] sm:$0xff]  }
  0xf6   : > { %4158 = vmatpush3.bf16.msra.mxu1 %v4901_v53  ;;  %955 = vmatprep.mubr.bf16.mxu0 %v5633_v54  ;;  %v4975_v53 = vld [vmem:[%s5536_s16 + $0x20] ss:$12 sps:$4 sm:$0xff]  }
  0xf7   : > { %4159 = vmatprep.subr.bf16.mxu1 %v4902_v55  ;;  %1794 = vmatprep.mubr.bf16.mxu1 %v5595_v31  ;;  %v4952_v31 = vld [vmem:[#allocation6 + $0x188] sm:$0xff]   ;;  %v4973_v55 = vld [vmem:[#allocation6 + $0x1f8] sm:$0xff]  }
  0xf8   : > { %4428 = vmatpush3.bf16.msra.mxu0 %v5576_v16  ;;  %v5711_v16 = vld [vmem:[%s5536_s16 + $0x10c] ss:$12 sps:$4 sm:$0xff]  }
  0xf9   : > { %4429 = vmatprep.subr.bf16.mxu0 %v5580_v19 }
  0xfa   : > { %4160 = vmatpush3.bf16.msra.mxu1 %v4903_v56  ;;  %v4974_v56 = vld [vmem:[#allocation6 + $0x1b8] sm:$0xff]  }
  0xfb   : > { %4465 = vmatprep.subr.bf16.mxu1 %v4907_v57 }
  0xfc   : > { %4430 = vmatpush3.bf16.msra.mxu0 %v5580_v19  ;;  %v5728_v19 = vld [vmem:[%s5536_s16 + $0x120] ss:$12 sps:$4 sm:$0xff]  }
  0xfd   : > { %956 = vmatmul.mubr.bf16.gmra.mrb[16].mxu0 %v5641_v58  ;;  %1795 = vmatmul.mubr.bf16.vlgmr.msra.gmra.mrb[16].mxu1 %v5601_v34  ;;  %v4956_v34 = vld [vmem:[#allocation6 + $0x190] sm:$0xff]  }
  0xfe   : > { %4466 = vmatpush3.bf16.msra.mxu1 %v4907_v57  ;;  %963 = vmatprep.mubr.bf16.mxu0 %v5645_v59  ;;  %v4976_v57 = vld [vmem:[%s5536_s16 + $0x38] ss:$12 sps:$4 sm:$0xff]  }
  0xff   : > { %1802 = vmatprep.mubr.bf16.mxu1 %v5606_v39  ;;  %4467 = vmatprep.subr.bf16.mxu1 %v4914_v60 }
 0x100   : > { %4431 = vmatprep.subr.bf16.mxu0 %v5583_v22 }
 0x101   : > { %4432 = vmatpush3.bf16.msra.mxu0 %v5583_v22  ;;  %v5741_v22 = vld [vmem:[%s5536_s16 + $0x154] ss:$12 sps:$4 sm:$0xff]  }
 0x102   : > { %4468 = vmatpush3.bf16.msra.mxu1 %v4914_v60  ;;  %4281 = vmatprep.subr.bf16.mxu0 %v4948_v2  ;;  %v4978_v60 = vld [vmem:[%s5536_s16 + $0x50] ss:$12 sps:$4 sm:$0xff]   ;;  %v4981_v2 = vld [vmem:[%s5536_s16 + $0x80] ss:$12 sps:$4 sm:$0xff]  }
 0x103   : > { %4469 = vmatprep.subr.bf16.mxu1 %v4921_v61 }
 0x105   : > { %964 = vmatmul.mubr.bf16.gmra.mrb[20].mxu0 %v5654_v62  ;;  %1803 = vmatmul.mubr.bf16.gmra.mrb[20].mxu1 %v5614_v42 }
 0x106   : > { %971 = vmatprep.mubr.bf16.mxu0 %v5658_v63  ;;  %1810 = vmatprep.mubr.bf16.mxu1 %v5620_v47 }
 0x107   : > { %4470 = vmatpush3.bf16.msra.mxu1 %v4921_v61  ;;  %v4980_v61 = vld [vmem:[#allocation6 + $0x208] sm:$0xff]  }
 0x108   : > { %4471 = vmatprep.subr.bf16.mxu1 %v4928_v0 }
 0x10b   : > { %4472 = vmatpush3.bf16.msra.mxu1 %v4928_v0  ;;  %v4983_v0 = vld [vmem:[#allocation6 + $0x210] sm:$0xff]  }
 0x10c   : > { %4473 = vmatprep.subr.bf16.mxu1 %v4935_v1 }
 0x10d   : > { %972 = vmatmul.mubr.bf16.gmra.mrb[24].mxu0 %v5665_v3  ;;  %1811 = vmatmul.mubr.bf16.gmra.mrb[24].mxu1 %v5627_v51 }
 0x10e   : > { %979 = vmatprep.mubr.bf16.mxu0 %v5668_v4  ;;  %1818 = vmatprep.mubr.bf16.mxu1 %v5633_v54 }
 0x10f   : > { %4474 = vmatpush3.bf16.msra.mxu1 %v4935_v1  ;;  %v4979_v1 = vld [vmem:[%s5536_s16 + $0x68] ss:$12 sps:$4 sm:$0xff]  }
 0x110   : > { %4475 = vmatprep.subr.bf16.mxu1 %v4942_v5 }
 0x113   : > { %4476 = vmatpush3.bf16.msra.mxu1 %v4942_v5  ;;  %v4984_v5 = vld [vmem:[%s5536_s16 + $0xb0] ss:$12 sps:$4 sm:$0xff]  }
 0x114   : > { %4477 = vmatprep.subr.bf16.mxu1 %v4950_v6 }
 0x115   : > { %980 = vmatmul.mubr.bf16.gmra.mrb[28].mxu0 %v5675_v7  ;;  %1819 = vmatmul.mubr.bf16.gmra.mrb[28].mxu1 %v5641_v58 }
 0x116   : > { %987 = vmatprep.mubr.bf16.mxu0 %v5678_v8  ;;  %1826 = vmatprep.mubr.bf16.mxu1 %v5645_v59 }
 0x117   : > { %4478 = vmatpush3.bf16.msra.mxu1 %v4950_v6  ;;  %v4992_v6 = vld [vmem:[#allocation6 + $0x228] sm:$0xff]  }
 0x118   : > { %4479 = vmatprep.subr.bf16.mxu1 %v4963_v9 }
 0x11b   : > { %4480 = vmatpush3.bf16.msra.mxu1 %v4963_v9  ;;  %v4987_v9 = vld [vmem:[%s5536_s16 + $0xe0] ss:$12 sps:$4 sm:$0xff]  }
 0x11c   : > { %4513 = vmatprep.subr.bf16.mxu1 %v5700_v14 }
 0x11d   : > { %988 = vmatmul.mubr.bf16.gmra.mrb[32].mxu0 %v5685_v10  ;;  %1827 = vmatmul.mubr.bf16.gmra.mrb[32].mxu1 %v5654_v62 }
 0x11e   : > { %995 = vmatprep.mubr.bf16.mxu0 %v5688_v11  ;;  %1834 = vmatprep.mubr.bf16.mxu1 %v5658_v63 }
 0x125   : > { %996 = vmatmul.mubr.bf16.gmra.mrb[36].mxu0 %v5695_v12  ;;  %1835 = vmatmul.mubr.bf16.gmra.mrb[36].mxu1 %v5665_v3 }
 0x126   : > { %1003 = vmatprep.mubr.bf16.mxu0 %v5698_v13  ;;  %1842 = vmatprep.mubr.bf16.mxu1 %v5668_v4 }
 0x12d   : > { %1004 = vmatmul.mubr.bf16.gmra.mrb[40].mxu0 %v5708_v15  ;;  %1843 = vmatmul.mubr.bf16.gmra.mrb[40].mxu1 %v5675_v7 }
 0x12e   : > { %1011 = vmatprep.mubr.bf16.mxu0 %v5711_v16  ;;  %1850 = vmatprep.mubr.bf16.mxu1 %v5678_v8 }
 0x135   : > { %1012 = vmatmul.mubr.bf16.gmra.mrb[44].mxu0 %v5718_v17  ;;  %1851 = vmatmul.mubr.bf16.gmra.mrb[44].mxu1 %v5685_v10 }
 0x136   : > { %1019 = vmatprep.mubr.bf16.mxu0 %v5721_v18  ;;  %1858 = vmatprep.mubr.bf16.mxu1 %v5688_v11 }
 0x13d   : > { %1020 = vmatmul.mubr.bf16.gmra.mrb[48].mxu0 %v5728_v19  ;;  %1859 = vmatmul.mubr.bf16.gmra.mrb[48].mxu1 %v5695_v12 }
 0x13e   : > { %1027 = vmatprep.mubr.bf16.mxu0 %v5731_v20  ;;  %1866 = vmatprep.mubr.bf16.mxu1 %v5698_v13 }
 0x145   : > { %1028 = vmatmul.mubr.bf16.gmra.mrb[52].mxu0 %v5738_v21  ;;  %1867 = vmatmul.mubr.bf16.gmra.mrb[52].mxu1 %v5708_v15 }
 0x146   : > { %1035 = vmatprep.mubr.bf16.mxu0 %v5741_v22  ;;  %1874 = vmatprep.mubr.bf16.mxu1 %v5711_v16 }
 0x14d   : > { %1036 = vmatmul.mubr.bf16.gmra.mrb[56].mxu0 %v5748_v23  ;;  %1875 = vmatmul.mubr.bf16.gmra.mrb[56].mxu1 %v5718_v17 }
 0x14e   : > { %1043 = vmatprep.mubr.bf16.mxu0 %v5751_v24  ;;  %1882 = vmatprep.mubr.bf16.mxu1 %v5721_v18 }
 0x155   : > { %1044 = vmatmul.mubr.bf16.gmra.mrb[60].mxu0 %v5758_v25  ;;  %1883 = vmatmul.mubr.bf16.gmra.mrb[60].mxu1 %v5728_v19 }
 0x156   : > { %4433 = vmatprep.mubr.bf16.mxu0 %v4946_v26  ;;  %1890 = vmatprep.mubr.bf16.mxu1 %v5731_v20  ;;  %v4991_v26 = vld [vmem:[%s5536_s16 + $0x128] ss:$12 sps:$4 sm:$0xff]  }
 0x15d   : > { %4434 = vmatmul.mubr.bf16.vlgmr.msra.gmra.mrb[64].mxu0 %v4947_v27  ;;  %1891 = vmatmul.mubr.bf16.gmra.mrb[64].mxu1 %v5738_v21  ;;  %v4993_v27 = vld [vmem:[%s5536_s16 + $0x140] ss:$12 sps:$4 sm:$0xff]  }
 0x15e   : > { %4282 = vmatpush3.bf16.msra.mxu0 %v4949_v28  ;;  %4437 = vmatprep.mubr.bf16.mxu0 %v4953_v29  ;;  %v4997_v28 = vld [vmem:[%s5536_s16 + $0x188] ss:$12 sps:$4 sm:$0xff]  }
 0x15f   : > { %4283 = vmatprep.subr.bf16.mxu0 %v4951_v30  ;;  %1898 = vmatprep.mubr.bf16.mxu1 %v5741_v22 }
 0x162   : > { %4284 = vmatpush3.bf16.msra.mxu0 %v4952_v31 }
 0x163   : > { %4285 = vmatprep.subr.bf16.mxu0 %v4955_v32 }
 0x165   : > { %4438 = vmatmul.mubr.bf16.gmra.mrb[68].mxu0 %v4954_v33  ;;  %1899 = vmatmul.mubr.bf16.gmra.mrb[68].mxu1 %v5748_v23 }
 0x166   : > { %4286 = vmatpush3.bf16.msra.mxu0 %v4956_v34  ;;  %4441 = vmatprep.mubr.bf16.mxu0 %v4959_v35  ;;  %v5001_v35 = vld [vmem:[%s5536_s16 + $0x68] ss:$12 sps:$4 sm:$0xff]  }
 0x167   : > { %4287 = vmatprep.subr.bf16.mxu0 %v4957_v36  ;;  %1906 = vmatprep.mubr.bf16.mxu1 %v5751_v24 }
 0x16a   : > { %4288 = vmatpush3.bf16.msra.mxu0 %v4958_v37 }
 0x16b   : > { %4289 = vmatprep.subr.bf16.mxu0 %v4961_v38  ;;  %v5002_v38 = vld [vmem:[%s5536_s16 + $0x80] ss:$12 sps:$4 sm:$0xff]  }
 0x16d   : > { %4442 = vmatmul.mubr.bf16.gmra.mrb[72].mxu0 %v4960_v40  ;;  %1907 = vmatmul.mubr.bf16.gmra.mrb[72].mxu1 %v5758_v25 }
 0x16e   : > { %4290 = vmatpush3.bf16.msra.mxu0 %v4962_v41  ;;  %4445 = vmatprep.mubr.bf16.mxu0 %v4966_v43  ;;  %v5003_v43 = vld [vmem:[%s5536_s16 + $0x98] ss:$12 sps:$4 sm:$0xff]  }
 0x16f   : > { %4291 = vmatprep.subr.bf16.mxu0 %v4964_v44  ;;  %1914 = vmatprep.mubr.bf16.mxu1 %v5775_v45 }
 0x172   : > { %4292 = vmatpush3.bf16.msra.mxu0 %v4965_v46 }
 0x173   : > { %4293 = vmatprep.subr.bf16.mxu0 %v4971_v48  ;;  %v5004_v48 = vld [vmem:[%s5536_s16 + $0xb0] ss:$12 sps:$4 sm:$0xff]  }
 0x175   : > { %4446 = vmatmul.mubr.bf16.gmra.mrb[76].mxu0 %v4969_v49  ;;  %1915 = vmatmul.mubr.bf16.gmra.mrb[76].mxu1 %v5781_v50 }
 0x176   : > { %4294 = vmatpush3.bf16.msra.mxu0 %v4972_v52  ;;  %4481 = vmatprep.mubr.bf16.mxu1 %v4975_v53  ;;  %v5005_v53 = vld [vmem:[%s5536_s16 + $0xc8] ss:$12 sps:$4 sm:$0xff]  }
 0x177   : > { %4295 = vmatprep.subr.bf16.mxu0 %v4973_v55  ;;  %2729 = vmatprep.mubr.bf16.mxu0 %v5606_v39  ;;  %v4986_v39 = vld [vmem:[#allocation6 + $0x218] sm:$0xff]  }
 0x17a   : > { %4296 = vmatpush3.bf16.msra.mxu0 %v4974_v56 }
 0x17d   : > { %4482 = vmatmul.mubr.bf16.vlgmr.msra.gmra.mrb[80].mxu1 %v4976_v57  ;;  %2730 = vmatmul.mubr.bf16.vlgmr.msra.gmra.mrb[80].mxu0 %v5614_v42  ;;  %v4989_v42 = vld [vmem:[#allocation6 + $0x220] sm:$0xff]  }
 0x17e   : > { %4514 = vmatpush3.bf16.msra.mxu1 %v5700_v14  ;;  %4485 = vmatprep.mubr.bf16.mxu1 %v4978_v60  ;;  %v4998_v14 = vld [vmem:[#allocation6 + $0x238] sm:$0xff]  }
 0x17f   : > { %2737 = vmatprep.mubr.bf16.mxu0 %v5620_v47  ;;  %4515 = vmatprep.subr.bf16.mxu1 %v4980_v61  ;;  %v4982_v47 = vld [vmem:[%s5536_s16 + $0x98] ss:$12 sps:$4 sm:$0xff]  }
 0x182   : > { %4516 = vmatpush3.bf16.msra.mxu1 %v4980_v61  ;;  %v5006_v61 = vld [vmem:[%s5536_s16 + $0xe0] ss:$12 sps:$4 sm:$0xff]  }
 0x183   : > { %4517 = vmatprep.subr.bf16.mxu1 %v4983_v0 }
 0x185   : > { %4486 = vmatmul.mubr.bf16.gmra.mrb[84].mxu1 %v4979_v1  ;;  %2738 = vmatmul.mubr.bf16.gmra.mrb[84].mxu0 %v5627_v51  ;;  %v4995_v51 = vld [vmem:[#allocation6 + $0x230] sm:$0xff]  }
 0x186   : > { %4489 = vmatprep.mubr.bf16.mxu1 %v4981_v2  ;;  %2745 = vmatprep.mubr.bf16.mxu0 %v5633_v54  ;;  %v4985_v54 = vld [vmem:[%s5536_s16 + $0xc8] ss:$12 sps:$4 sm:$0xff]  }
 0x187   : > { %4518 = vmatpush3.bf16.msra.mxu1 %v4983_v0 }
 0x188   : > { %4519 = vmatprep.subr.bf16.mxu1 %v4986_v39 }
 0x18b   : > { %4520 = vmatpush3.bf16.msra.mxu1 %v4986_v39 }
 0x18c   : > { %4521 = vmatprep.subr.bf16.mxu1 %v4989_v42 }
 0x18d   : > { %4490 = vmatmul.mubr.bf16.gmra.mrb[88].mxu1 %v4982_v47  ;;  %2746 = vmatmul.mubr.bf16.gmra.mrb[88].mxu0 %v5641_v58  ;;  %v4988_v58 = vld [vmem:[%s5536_s16 + $0xf8] ss:$12 sps:$4 sm:$0xff]  }
 0x18e   : > { %4493 = vmatprep.mubr.bf16.mxu1 %v4984_v5  ;;  %2753 = vmatprep.mubr.bf16.mxu0 %v5645_v59  ;;  %v4990_v59 = vld [vmem:[%s5536_s16 + $0x110] ss:$12 sps:$4 sm:$0xff]  }
 0x18f   : > { %4522 = vmatpush3.bf16.msra.mxu1 %v4989_v42  ;;  %v5007_v42 = vld [vmem:[%s5536_s16 + $0xf8] ss:$12 sps:$4 sm:$0xff]  }
 0x190   : > { %4523 = vmatprep.subr.bf16.mxu1 %v4992_v6 }
 0x193   : > { %4524 = vmatpush3.bf16.msra.mxu1 %v4992_v6 }
 0x194   : > { %4525 = vmatprep.subr.bf16.mxu1 %v4995_v51 }
 0x195   : > { %4494 = vmatmul.mubr.bf16.gmra.mrb[92].mxu1 %v4985_v54  ;;  %2754 = vmatmul.mubr.bf16.gmra.mrb[92].mxu0 %v5654_v62  ;;  %v4994_v62 = vld [vmem:[%s5536_s16 + $0x158] ss:$12 sps:$4 sm:$0xff]  }
 0x196   : > { %4497 = vmatprep.mubr.bf16.mxu1 %v4987_v9  ;;  %2761 = vmatprep.mubr.bf16.mxu0 %v5658_v63  ;;  %v4996_v63 = vld [vmem:[%s5536_s16 + $0x170] ss:$12 sps:$4 sm:$0xff]  }
 0x197   : > { %4526 = vmatpush3.bf16.msra.mxu1 %v4995_v51 }
 0x198   : > { %4527 = vmatprep.subr.bf16.mxu1 %v4998_v14 }
 0x19b   : > { %4528 = vmatpush3.bf16.msra.mxu1 %v4998_v14  ;;  %v5008_v14 = vld [vmem:[%s5536_s16 + $0x110] ss:$12 sps:$4 sm:$0xff]  }
 0x19d   : > { %4498 = vmatmul.mubr.bf16.gmra.mrb[0].mxu1 %v4988_v58  ;;  %2762 = vmatmul.mubr.bf16.gmra.mrb[96].mxu0 %v5665_v3 }
 0x19e   : > { %4501 = vmatprep.mubr.bf16.mxu1 %v4990_v59  ;;  %2769 = vmatprep.mubr.bf16.mxu0 %v5668_v4 }
 0x1a5   : > { %4502 = vmatmul.mubr.bf16.gmra.mrb[4].mxu1 %v4991_v26  ;;  %2770 = vmatmul.mubr.bf16.gmra.mrb[100].mxu0 %v5675_v7  ;;  %v4999_v7 = vld [vmem:[%s5536_s16 + $0x38] ss:$12 sps:$4 sm:$0xff]  }
 0x1a6   : > { %4505 = vmatprep.mubr.bf16.mxu1 %v4993_v27  ;;  %2777 = vmatprep.mubr.bf16.mxu0 %v5678_v8 }
 0x1ad   : > { %4506 = vmatmul.mubr.bf16.gmra.mrb[8].mxu1 %v4994_v62  ;;  %2778 = vmatmul.mubr.bf16.gmra.mrb[104].mxu0 %v5685_v10  ;;  %v5009_v62 = vld [vmem:[%s5536_s16 + $0x128] ss:$12 sps:$4 sm:$0xff]  }
 0x1ae   : > { %4509 = vmatprep.mubr.bf16.mxu1 %v4996_v63  ;;  %2785 = vmatprep.mubr.bf16.mxu0 %v5688_v11  ;;  %v5000_v11 = vld [vmem:[%s5536_s16 + $0x50] ss:$12 sps:$4 sm:$0xff]  }
 0x1b0   : > { %v4025_v3 = vpop.f32.mrb[0].mxu0 }
 0x1b1   : > { %v4026_v4 = vpop.f32.mrb[1].mxu0 }
 0x1b2   : > { %v5816_v29 = vadd.f32 %v4026_v4, %v4025_v3  ;;  %v4028_v30 = vpop.f32.mrb[2].mxu0 }
 0x1b3   : > { %v4029_v31 = vpop.f32.mrb[3].mxu0 }
 0x1b4   : > { %v5819_v32 = vadd.f32 %v4029_v31, %v4028_v30  ;;  %v5010_v31 = vld [vmem:[%s5536_s16 + $0x140] ss:$12 sps:$4 sm:$0xff]  }
 0x1b5   : > { %4510 = vmatmul.mubr.bf16.gmra.mrb[12].mxu1 %v4997_v28  ;;  %2786 = vmatmul.mubr.bf16.gmra.mrb[108].mxu0 %v5695_v12 }
 0x1b6   : > { %2793 = vmatprep.mubr.bf16.mxu0 %v5698_v13  ;;  %4529 = vmatprep.mubr.bf16.mxu1 %v4999_v7 }
 0x1b8   : > { %v4031_v8 = vpop.f32.mrb[4].mxu0 }
 0x1b9   : > { %v4032_v10 = vpop.f32.mrb[5].mxu0 }
 0x1ba   : > { %v5824_v33 = vadd.f32 %v4032_v10, %v4031_v8  ;;  %v4034_v34 = vpop.f32.mrb[6].mxu0 }
 0x1bb   : > { %v4035_v36 = vpop.f32.mrb[7].mxu0 }
 0x1bc   : > { %v5827_v37 = vadd.f32 %v4035_v36, %v4034_v34 }
 0x1bd   : > { %2794 = vmatmul.mubr.bf16.gmra.mrb[112].mxu0 %v5708_v15  ;;  %4530 = vmatmul.mubr.bf16.vlgmr.msra.gmra.mrb[80].mxu1 %v5000_v11 }
 0x1be   : > { %2801 = vmatprep.mubr.bf16.mxu0 %v5711_v16  ;;  %4533 = vmatprep.mubr.bf16.mxu1 %v5001_v35  ;;  %v5011_v35 = vld [vmem:[%s5536_s16 + $0x158] ss:$12 sps:$4 sm:$0xff]  }
 0x1c0   : > { %v4037_v12 = vpop.f32.mrb[8].mxu0 }
 0x1c1   : > { %v4038_v13 = vpop.f32.mrb[9].mxu0 }
 0x1c2   : > { %v5832_v40 = vadd.f32 %v4038_v13, %v4037_v12  ;;  %v4040_v41 = vpop.f32.mrb[10].mxu0 }
 0x1c3   : > { %v4041_v44 = vpop.f32.mrb[11].mxu0 }
 0x1c4   : > { %v5835_v46 = vadd.f32 %v4041_v44, %v4040_v41  ;;  %v5012_v44 = vld [vmem:[%s5536_s16 + $0x170] ss:$12 sps:$4 sm:$0xff]  }
 0x1c5   : > { %2802 = vmatmul.mubr.bf16.gmra.mrb[116].mxu0 %v5718_v17  ;;  %4534 = vmatmul.mubr.bf16.gmra.mrb[84].mxu1 %v5002_v38 }
 0x1c6   : > { %2809 = vmatprep.mubr.bf16.mxu0 %v5721_v18  ;;  %4537 = vmatprep.mubr.bf16.mxu1 %v5003_v43 }
 0x1c8   : > { %v4043_v15 = vpop.f32.mrb[12].mxu0 }
 0x1c9   : > { %v4044_v16 = vpop.f32.mrb[13].mxu0 }
 0x1ca   : > { %v5840_v49 = vadd.f32 %v4044_v16, %v4043_v15  ;;  %v4046_v52 = vpop.f32.mrb[14].mxu0 }
 0x1cb   : > { %v4047_v55 = vpop.f32.mrb[15].mxu0 }
 0x1cc   : > { %v5843_v56 = vadd.f32 %v4047_v55, %v4046_v52  ;;  %v5015_v55 = vld [vmem:[%s5536_s16 + $0x188] ss:$12 sps:$4 sm:$0xff]  }
 0x1cd   : > { %2810 = vmatmul.mubr.bf16.gmra.mrb[120].mxu0 %v5728_v19  ;;  %4538 = vmatmul.mubr.bf16.gmra.mrb[88].mxu1 %v5004_v48 }
 0x1ce   : > { %2817 = vmatprep.mubr.bf16.mxu0 %v5731_v20  ;;  %4541 = vmatprep.mubr.bf16.mxu1 %v5005_v53  ;;  %v5013_v53 = vld [vmem:[%s5536_s16 + $0x19c] ss:$12 sps:$4 sm:$0xff]  }
 0x1d0   : > { %v4049_v17 = vpop.f32.mrb[16].mxu0  ;;  %v4161_v18 = vpop.f32.mrb[16].mxu1 }
 0x1d1   : > { %v4050_v57 = vpop.f32.mrb[17].mxu0  ;;  %v4162_v60 = vpop.f32.mrb[17].mxu1 }
 0x1d2   : > { %v5848_v0 = vadd.f32 %v4050_v57, %v4049_v17  ;;  %v4052_v1 = vpop.f32.mrb[18].mxu0  ;;  %v5850_v2 = vadd.f32 %v4162_v60, %v4161_v18  ;;  %v4164_v39 = vpop.f32.mrb[18].mxu1 }
 0x1d3   : > { %v4053_v47 = vpop.f32.mrb[19].mxu0  ;;  %v4165_v5 = vpop.f32.mrb[19].mxu1 }
 0x1d4   : > { %v5853_v19 = vadd.f32 %v4053_v47, %v4052_v1  ;;  %v5855_v20 = vadd.f32 %v4165_v5, %v4164_v39  ;;  %v5016_v39 = vld [vmem:[%s5536_s16 + $0x198] ss:$12 sps:$4 sm:$0xff]  }
 0x1d5   : > { %2818 = vmatmul.mubr.bf16.gmra.mrb[124].mxu0 %v5738_v21  ;;  %4542 = vmatmul.mubr.bf16.gmra.mrb[92].mxu1 %v5006_v61 }
 0x1d6   : > { %2825 = vmatprep.mubr.bf16.mxu0 %v5741_v22  ;;  %4545 = vmatprep.mubr.bf16.mxu1 %v5007_v42  ;;  %v5017_v42 = vld [vmem:[%s5536_s16 + $0x1a0] ss:$12 sps:$4 sm:$0xff]  }
 0x1d8   : > { %v4055_v6 = vpop.f32.mrb[20].mxu0  ;;  %v4167_v51 = vpop.f32.mrb[20].mxu1 }
 0x1d9   : > { %v4056_v54 = vpop.f32.mrb[21].mxu0  ;;  %v4168_v9 = vpop.f32.mrb[21].mxu1 }
 0x1da   : > { %v5860_v58 = vadd.f32 %v4056_v54, %v4055_v6  ;;  %v4058_v59 = vpop.f32.mrb[22].mxu0  ;;  %v5862_v26 = vadd.f32 %v4168_v9, %v4167_v51  ;;  %v4170_v27 = vpop.f32.mrb[22].mxu1 }
 0x1db   : > { %v4059_v63 = vpop.f32.mrb[23].mxu0  ;;  %v4171_v3 = vpop.f32.mrb[23].mxu1 }
 0x1dc   : > { %v5865_v21 = vadd.f32 %v4059_v63, %v4058_v59  ;;  %v5867_v22 = vadd.f32 %v4171_v3, %v4170_v27 }
 0x1dd   : > { %2826 = vmatmul.mubr.bf16.gmra.mrb[128].mxu0 %v5748_v23  ;;  %4546 = vmatmul.mubr.bf16.gmra.mrb[0].mxu1 %v5008_v14 }
 0x1de   : > { %2833 = vmatprep.mubr.bf16.mxu0 %v5751_v24  ;;  %4549 = vmatprep.mubr.bf16.mxu1 %v5009_v62 }
 0x1e0   : > { %v4061_v4 = vpop.f32.mrb[24].mxu0  ;;  %v4173_v28 = vpop.f32.mrb[24].mxu1 }
 0x1e1   : > { %v4062_v30 = vpop.f32.mrb[25].mxu0  ;;  %v4174_v7 = vpop.f32.mrb[25].mxu1 }
 0x1e2   : > { %v5872_v8 = vadd.f32 %v4062_v30, %v4061_v4  ;;  %v4064_v10 = vpop.f32.mrb[26].mxu0  ;;  %v5874_v11 = vadd.f32 %v4174_v7, %v4173_v28  ;;  %v4176_v34 = vpop.f32.mrb[26].mxu1 }
 0x1e3   : > { %v4065_v36 = vpop.f32.mrb[27].mxu0  ;;  %v4177_v12 = vpop.f32.mrb[27].mxu1 }
 0x1e4   : > { %v5877_v23 = vadd.f32 %v4065_v36, %v4064_v10  ;;  %v5879_v24 = vadd.f32 %v4177_v12, %v4176_v34 }
 0x1e5   : > { %2834 = vmatmul.mubr.bf16.gmra.mrb[132].mxu0 %v5758_v25  ;;  %4550 = vmatmul.mubr.bf16.gmra.mrb[4].mxu1 %v5010_v31 }
 0x1e6   : > { %2841 = vmatprep.mubr.bf16.mxu0 %v5775_v45  ;;  %4553 = vmatprep.mubr.bf16.mxu1 %v5011_v35 }
 0x1e8   : > { %v4067_v13 = vpop.f32.mrb[28].mxu0  ;;  %v4179_v38 = vpop.f32.mrb[28].mxu1 }
 0x1e9   : > { %v4068_v41 = vpop.f32.mrb[29].mxu0  ;;  %v4180_v43 = vpop.f32.mrb[29].mxu1 }
 0x1ea   : > { %v5884_v15 = vadd.f32 %v4068_v41, %v4067_v13  ;;  %v4070_v16 = vpop.f32.mrb[30].mxu0  ;;  %v5886_v48 = vadd.f32 %v4180_v43, %v4179_v38  ;;  %v4182_v52 = vpop.f32.mrb[30].mxu1 }
 0x1eb   : > { %v4071_v25 = vpop.f32.mrb[31].mxu0  ;;  %v4183_v17 = vpop.f32.mrb[31].mxu1 }
 0x1ec   : > { %v5890_v18 = vadd.f32 %v4071_v25, %v4070_v16  ;;  %v5892_v45 = vadd.f32 %v4183_v17, %v4182_v52 }
 0x1ed   : > { %2842 = vmatmul.mubr.bf16.gmra.mrb[136].mxu0 %v5781_v50  ;;  %4554 = vmatmul.mubr.bf16.gmra.mrb[8].mxu1 %v5012_v44 }
 0x1ee   : > { %2849 = vmatprep.mubr.bf16.mxu0 %v5013_v53  ;;  %4557 = vmatprep.mubr.bf16.mxu1 %v5015_v55 }
 0x1f0   : > { %v4073_v57 = vpop.f32.mrb[32].mxu0  ;;  %v4185_v60 = vpop.f32.mrb[32].mxu1 }
 0x1f1   : > { %v4074_v61 = vpop.f32.mrb[33].mxu0  ;;  %v4186_v1 = vpop.f32.mrb[33].mxu1 }
 0x1f2   : > { %v4075_v47 = vadd.f32 %v4074_v61, %v4073_v57  ;;  %v4076_v5 = vpop.f32.mrb[34].mxu0  ;;  %v5897_v6 = vadd.f32 %v4186_v1, %v4185_v60  ;;  %v4188_v51 = vpop.f32.mrb[34].mxu1 }
 0x1f3   : > { %v4077_v54 = vpop.f32.mrb[35].mxu0  ;;  %v4189_v9 = vpop.f32.mrb[35].mxu1 }
 0x1f4   : > { %v4078_v14 = vadd.f32 %v4077_v54, %v4076_v5  ;;  %v5899_v59 = vadd.f32 %v4189_v9, %v4188_v51 }
 0x1f5   : > { %2850 = vmatmul.mubr.bf16.gmra.mrb[140].mxu0 %v5016_v39  ;;  %4558 = vmatmul.mubr.bf16.gmra.mrb[12].mxu1 %v5017_v42 }
 0x1f8   : > { %v4079_v50 = vpop.f32.mrb[36].mxu0  ;;  %v4191_v27 = vpop.f32.mrb[36].mxu1 }
 0x1f9   : > { %v4080_v62 = vpop.f32.mrb[37].mxu0  ;;  %v4192_v63 = vpop.f32.mrb[37].mxu1 }
 0x1fa   : > { %v4081_v3 = vadd.f32 %v4080_v62, %v4079_v50  ;;  %v4082_v4 = vpop.f32.mrb[38].mxu0  ;;  %v5901_v28 = vadd.f32 %v4192_v63, %v4191_v27  ;;  %v4194_v30 = vpop.f32.mrb[38].mxu1 }
 0x1fb   : > { %v4083_v7 = vpop.f32.mrb[39].mxu0  ;;  %v4195_v31 = vpop.f32.mrb[39].mxu1 }
 0x1fc   : > { %v4084_v10 = vadd.f32 %v4083_v7, %v4082_v4  ;;  %v5903_v34 = vadd.f32 %v4195_v31, %v4194_v30 }
 0x200   : > { %v4085_v35 = vpop.f32.mrb[40].mxu0  ;;  %v4197_v36 = vpop.f32.mrb[40].mxu1 }
 0x201   : > { %v4086_v12 = vpop.f32.mrb[41].mxu0  ;;  %v4198_v13 = vpop.f32.mrb[41].mxu1 }
 0x202   : > { %v4087_v38 = vadd.f32 %v4086_v12, %v4085_v35  ;;  %v4088_v41 = vpop.f32.mrb[42].mxu0  ;;  %v5905_v43 = vadd.f32 %v4198_v13, %v4197_v36  ;;  %v4200_v44 = vpop.f32.mrb[42].mxu1 }
 0x203   : > { %v4089_v16 = vpop.f32.mrb[43].mxu0  ;;  %v4201_v52 = vpop.f32.mrb[43].mxu1 }
 0x204   : > { %v4090_v53 = vadd.f32 %v4089_v16, %v4088_v41  ;;  %v5907_v55 = vadd.f32 %v4201_v52, %v4200_v44 }
 0x208   : > { %v4091_v25 = vpop.f32.mrb[44].mxu0  ;;  %v4203_v17 = vpop.f32.mrb[44].mxu1 }
 0x209   : > { %v4092_v57 = vpop.f32.mrb[45].mxu0  ;;  %v4204_v60 = vpop.f32.mrb[45].mxu1 }
 0x20a   : > { %v4093_v61 = vadd.f32 %v4092_v57, %v4091_v25  ;;  %v4094_v1 = vpop.f32.mrb[46].mxu0  ;;  %v5909_v39 = vadd.f32 %v4204_v60, %v4203_v17  ;;  %v4206_v42 = vpop.f32.mrb[46].mxu1 }
 0x20b   : > { %v4095_v5 = vpop.f32.mrb[47].mxu0  ;;  %v4207_v51 = vpop.f32.mrb[47].mxu1 }
 0x20c   : > { %v4096_v54 = vadd.f32 %v4095_v5, %v4094_v1  ;;  %v5911_v9 = vadd.f32 %v4207_v51, %v4206_v42 }
 0x210   : > { %v4097_v50 = vpop.f32.mrb[48].mxu0  ;;  %v4209_v27 = vpop.f32.mrb[48].mxu1 }
 0x211   : > { %v4098_v62 = vpop.f32.mrb[49].mxu0  ;;  %v4210_v63 = vpop.f32.mrb[49].mxu1 }
 0x212   : > { %v5913_v4 = vadd.f32 %v4098_v62, %v4097_v50  ;;  %v4211_v30 = vadd.f32 %v4210_v63, %v4209_v27  ;;  %v4100_v7 = vpop.f32.mrb[50].mxu0  ;;  %v4212_v31 = vpop.f32.mrb[50].mxu1 }
 0x213   : > { %v4101_v35 = vpop.f32.mrb[51].mxu0  ;;  %v4213_v36 = vpop.f32.mrb[51].mxu1 }
 0x214   : > { %v5915_v12 = vadd.f32 %v4211_v30, %v4075_v47  ;;  %v5917_v13 = vadd.f32 %v4101_v35, %v4100_v7  ;;  %v4214_v41 = vadd.f32 %v4213_v36, %v4212_v31 }
 0x216   : > { %v5919_v44 = vadd.f32 %v4214_v41, %v4078_v14 }
 0x218   : > { %v4103_v16 = vpop.f32.mrb[52].mxu0  ;;  %v4215_v52 = vpop.f32.mrb[52].mxu1 }
 0x219   : > { %v4104_v25 = vpop.f32.mrb[53].mxu0  ;;  %v4216_v17 = vpop.f32.mrb[53].mxu1 }
 0x21a   : > { %v5921_v57 = vadd.f32 %v4104_v25, %v4103_v16  ;;  %v4217_v60 = vadd.f32 %v4216_v17, %v4215_v52  ;;  %v4106_v1 = vpop.f32.mrb[54].mxu0  ;;  %v4218_v42 = vpop.f32.mrb[54].mxu1 }
 0x21b   : > { %v4107_v5 = vpop.f32.mrb[55].mxu0  ;;  %v4219_v51 = vpop.f32.mrb[55].mxu1 }
 0x21c   : > { %v5923_v50 = vadd.f32 %v4217_v60, %v4081_v3  ;;  %v5925_v47 = vadd.f32 %v4107_v5, %v4106_v1  ;;  %v4220_v27 = vadd.f32 %v4219_v51, %v4218_v42 }
 0x21e   : > { %v5927_v62 = vadd.f32 %v4220_v27, %v4084_v10 }
 0x220   : > { %6356 = vst [vmem:[#allocation23_spill] sm:$0xff] %v5927_v62  ;;  %v4109_v14 = vpop.f32.mrb[56].mxu0  ;;  %v4221_v63 = vpop.f32.mrb[56].mxu1 }
 0x221   : > { %v4110_v30 = vpop.f32.mrb[57].mxu0  ;;  %v4222_v7 = vpop.f32.mrb[57].mxu1 }
 0x222   : > { %v5929_v31 = vadd.f32 %v4110_v30, %v4109_v14  ;;  %v4223_v35 = vadd.f32 %v4222_v7, %v4221_v63  ;;  %v4112_v36 = vpop.f32.mrb[58].mxu0  ;;  %v4224_v41 = vpop.f32.mrb[58].mxu1 }
 0x223   : > { %v4113_v16 = vpop.f32.mrb[59].mxu0  ;;  %v4225_v52 = vpop.f32.mrb[59].mxu1 }
 0x224   : > { %v5931_v25 = vadd.f32 %v4223_v35, %v4087_v38  ;;  %v5933_v3 = vadd.f32 %v4113_v16, %v4112_v36  ;;  %v4226_v17 = vadd.f32 %v4225_v52, %v4224_v41 }
 0x226   : > { %v5935_v60 = vadd.f32 %v4226_v17, %v4090_v53 }
 0x228   : > { %6357 = vst [vmem:[#allocation24_spill] sm:$0xff] %v5935_v60  ;;  %v4115_v10 = vpop.f32.mrb[60].mxu0  ;;  %v4227_v1 = vpop.f32.mrb[60].mxu1 }
 0x229   : > { %v4116_v42 = vpop.f32.mrb[61].mxu0  ;;  %v4228_v5 = vpop.f32.mrb[61].mxu1 }
 0x22a   : > { %v5937_v51 = vadd.f32 %v4116_v42, %v4115_v10  ;;  %v4229_v27 = vadd.f32 %v4228_v5, %v4227_v1  ;;  %v4118_v14 = vpop.f32.mrb[62].mxu0  ;;  %v4230_v63 = vpop.f32.mrb[62].mxu1 }
 0x22b   : > { %v4119_v30 = vpop.f32.mrb[63].mxu0  ;;  %v4231_v7 = vpop.f32.mrb[63].mxu1 }
 0x22c   : > { %v5939_v62 = vadd.f32 %v4229_v27, %v4093_v61  ;;  %v5941_v38 = vadd.f32 %v4119_v30, %v4118_v14  ;;  %v4232_v35 = vadd.f32 %v4231_v7, %v4230_v63 }
 0x22e   : > { %v5943_v36 = vadd.f32 %v4232_v35, %v4096_v54 }
 0x230   : > { %v4435_v53 = vpop.f32.mrb[64].mxu0  ;;  %v4233_v41 = vpop.f32.mrb[64].mxu1 }
 0x231   : > { %v1095_v16 = vadd.f32 %v4435_v53, %v5824_v33  ;;  %v1086_v52 = vpop.f32.mrb[65].mxu0  ;;  %v4234_v17 = vpop.f32.mrb[65].mxu1 }
 0x232   : > { %v1087_v10 = vadd.f32 %v5816_v29, %v1086_v52  ;;  %v4235_v1 = vadd.f32 %v4234_v17, %v4233_v41  ;;  %v4436_v42 = vpop.f32.mrb[66].mxu0  ;;  %v4236_v5 = vpop.f32.mrb[66].mxu1 }
 0x233   : > { %v5948_v60 = vadd.f32 %v5862_v26, %v1095_v16  ;;  %v1098_v61 = vadd.f32 %v4436_v42, %v5827_v37  ;;  %v1089_v27 = vpop.f32.mrb[67].mxu0  ;;  %v4237_v14 = vpop.f32.mrb[67].mxu1 }
 0x234   : > { %v5952_v54 = vadd.f32 %v5850_v2, %v1087_v10  ;;  %v5955_v63 = vadd.f32 %v4235_v1, %v5913_v4  ;;  %v1090_v33 = vadd.f32 %v5819_v32, %v1089_v27  ;;  %v4238_v30 = vadd.f32 %v4237_v14, %v4236_v5 }
 0x235   : > { %v5959_v29 = vadd.f32 %v5867_v22, %v1098_v61 }
 0x236   : > { %v5962_v7 = vadd.f32 %v5855_v20, %v1090_v33  ;;  %v5965_v26 = vadd.f32 %v4238_v30, %v5917_v13 }
 0x238   : > { %v4439_v37 = vpop.f32.mrb[68].mxu0  ;;  %v4239_v35 = vpop.f32.mrb[68].mxu1 }
 0x239   : > { %v1111_v2 = vadd.f32 %v4439_v37, %v5840_v49  ;;  %v1102_v53 = vpop.f32.mrb[69].mxu0  ;;  %v4240_v41 = vpop.f32.mrb[69].mxu1 }
 0x23a   : > { %v1103_v4 = vadd.f32 %v5832_v40, %v1102_v53  ;;  %v4241_v16 = vadd.f32 %v4240_v41, %v4239_v35  ;;  %v4440_v32 = vpop.f32.mrb[70].mxu0  ;;  %v4242_v52 = vpop.f32.mrb[70].mxu1 }
 0x23b   : > { %v5970_v22 = vadd.f32 %v5886_v48, %v1111_v2  ;;  %v1114_v20 = vadd.f32 %v4440_v32, %v5843_v56  ;;  %v1105_v17 = vpop.f32.mrb[71].mxu0  ;;  %v4243_v10 = vpop.f32.mrb[71].mxu1 }
 0x23c   : > { %v5974_v13 = vadd.f32 %v5874_v11, %v1103_v4  ;;  %v5977_v1 = vadd.f32 %v4241_v16, %v5921_v57  ;;  %v1106_v49 = vadd.f32 %v5835_v46, %v1105_v17  ;;  %v4244_v42 = vadd.f32 %v4243_v10, %v4242_v52 }
 0x23d   : > { %v5981_v40 = vadd.f32 %v5892_v45, %v1114_v20 }
 0x23e   : > { %v5984_v5 = vadd.f32 %v5879_v24, %v1106_v49  ;;  %v5987_v48 = vadd.f32 %v4244_v42, %v5925_v47 }
 0x240   : > { %v4443_v56 = vpop.f32.mrb[72].mxu0  ;;  %v4245_v61 = vpop.f32.mrb[72].mxu1 }
 0x241   : > { %v1127_v11 = vadd.f32 %v4443_v56, %v5860_v58  ;;  %v1118_v27 = vpop.f32.mrb[73].mxu0  ;;  %v4246_v14 = vpop.f32.mrb[73].mxu1 }
 0x242   : > { %v1119_v57 = vadd.f32 %v5848_v0, %v1118_v27  ;;  %v4247_v33 = vadd.f32 %v4246_v14, %v4245_v61  ;;  %v4444_v46 = vpop.f32.mrb[74].mxu0  ;;  %v4248_v30 = vpop.f32.mrb[74].mxu1 }
 0x243   : > { %v5992_v45 = vadd.f32 %v5901_v28, %v1127_v11  ;;  %v1130_v24 = vadd.f32 %v4444_v46, %v5865_v21  ;;  %v1121_v37 = vpop.f32.mrb[75].mxu0  ;;  %v4249_v35 = vpop.f32.mrb[75].mxu1 }
 0x244   : > { %v5996_v47 = vadd.f32 %v5897_v6, %v1119_v57  ;;  %v5999_v2 = vadd.f32 %v4247_v33, %v5929_v31  ;;  %v1122_v58 = vadd.f32 %v5853_v19, %v1121_v37  ;;  %v4250_v53 = vadd.f32 %v4249_v35, %v4248_v30 }
 0x245   : > { %v6003_v0 = vadd.f32 %v5903_v34, %v1130_v24 }
 0x246   : > { %v4622_v41 = vadd.f32 %v5899_v59, %v1122_v58  ;;  %v6007_v28 = vadd.f32 %v4250_v53, %v5933_v3 }
 0x248   : > { %v4447_v21 = vpop.f32.mrb[76].mxu0  ;;  %v4251_v4 = vpop.f32.mrb[76].mxu1 }
 0x249   : > { %v1143_v16 = vadd.f32 %v4447_v21, %v5884_v15  ;;  %v1134_v6 = vpop.f32.mrb[77].mxu0  ;;  %v4252_v32 = vpop.f32.mrb[77].mxu1 }
 0x24a   : > { %v1135_v31 = vadd.f32 %v5872_v8, %v1134_v6  ;;  %v4253_v52 = vadd.f32 %v4252_v32, %v4251_v4  ;;  %v4448_v20 = vpop.f32.mrb[78].mxu0  ;;  %v4254_v19 = vpop.f32.mrb[78].mxu1 }
 0x24b   : > { %v6012_v17 = vadd.f32 %v5909_v39, %v1143_v16  ;;  %v1146_v34 = vadd.f32 %v4448_v20, %v5890_v18  ;;  %v1137_v59 = vpop.f32.mrb[79].mxu0  ;;  %v4255_v10 = vpop.f32.mrb[79].mxu1 }
 0x24c   : > { %v4630_v3 = vadd.f32 %v5905_v43, %v1135_v31  ;;  %v6017_v49 = vadd.f32 %v4253_v52, %v5937_v51  ;;  %v1138_v15 = vadd.f32 %v5877_v23, %v1137_v59  ;;  %v4256_v42 = vadd.f32 %v4255_v10, %v4254_v19 }
 0x24d   : > { %v6021_v8 = vadd.f32 %v5911_v9, %v1146_v34 }
 0x24e   : > { %v4638_v56 = vadd.f32 %v5907_v55, %v1138_v15  ;;  %v6025_v39 = vadd.f32 %v4256_v42, %v5941_v38 }
 0x250   : > { %v4297_v61 = vpop.f32.mrb[80].mxu0 }
 0x251   : > { %v4298_v18 = vpop.f32.mrb[81].mxu0 }
 0x252   : > { %v4299_v11 = vadd.f32 %v4298_v18, %v4297_v61  ;;  %v4300_v27 = vpop.f32.mrb[82].mxu0 }
 0x253   : > { %v4301_v14 = vpop.f32.mrb[83].mxu0 }
 0x254   : > { %v4302_v43 = vadd.f32 %v4301_v14, %v4300_v27  ;;  %v6028_v51 = vadd.f32 %v5952_v54, %v4299_v11 }
 0x256   : > { %v6031_v23 = vadd.f32 %v5962_v7, %v4302_v43 }
 0x258   : > { %v4303_v57 = vpop.f32.mrb[84].mxu0 }
 0x259   : > { %v4304_v9 = vpop.f32.mrb[85].mxu0 }
 0x25a   : > { %v4305_v33 = vadd.f32 %v4304_v9, %v4303_v57  ;;  %v4306_v46 = vpop.f32.mrb[86].mxu0 }
 0x25b   : > { %v4307_v55 = vpop.f32.mrb[87].mxu0 }
 0x25c   : > { %v4308_v30 = vadd.f32 %v4307_v55, %v4306_v46  ;;  %v4579_v38 = vadd.f32 %v5948_v60, %v4305_v33 }
 0x25e   : > { %v6035_v24 = vadd.f32 %v5959_v29, %v4308_v30 }
 0x260   : > { %v4309_v37 = vpop.f32.mrb[88].mxu0 }
 0x261   : > { %v4310_v35 = vpop.f32.mrb[89].mxu0 }
 0x262   : > { %v4311_v58 = vadd.f32 %v4310_v35, %v4309_v37  ;;  %v4312_v53 = vpop.f32.mrb[90].mxu0 }
 0x263   : > { %v4313_v54 = vpop.f32.mrb[91].mxu0 }
 0x264   : > { %v4314_v21 = vadd.f32 %v4313_v54, %v4312_v53  ;;  %v6038_v7 = vadd.f32 %v5974_v13, %v4311_v58 }
 0x266   : > { %v6041_v4 = vadd.f32 %v5984_v5, %v4314_v21 }
 0x268   : > { %v4315_v16 = vpop.f32.mrb[92].mxu0 }
 0x269   : > { %v4316_v6 = vpop.f32.mrb[93].mxu0 }
 0x26a   : > { %v4317_v32 = vadd.f32 %v4316_v6, %v4315_v16  ;;  %v4318_v31 = vpop.f32.mrb[94].mxu0 }
 0x26b   : > { %v4319_v60 = vpop.f32.mrb[95].mxu0 }
 0x26c   : > { %v4320_v52 = vadd.f32 %v4319_v60, %v4318_v31  ;;  %v6044_v29 = vadd.f32 %v5970_v22, %v4317_v32  ;;  %v6070_v32 = vld [vmem:[#allocation8] ss:$0 sm:$0xff]  ;;  %v3931_v31 = vld [vmem:[%s5551_s14] sm:$0xff]  }
 0x26e   : > { %v6047_v20 = vadd.f32 %v5981_v40, %v4320_v52 }
 0x270   : > { %v4321_v19 = vpop.f32.mrb[96].mxu0 }
 0x271   : > { %v4322_v34 = vpop.f32.mrb[97].mxu0 }
 0x272   : > { %v4323_v59 = vadd.f32 %v4322_v34, %v4321_v19  ;;  %v4324_v13 = vpop.f32.mrb[98].mxu0  ;;  %v6074_v19 = vld [vmem:[#allocation9] ss:$0 sm:$0xff] }
 0x273   : > { %v4325_v10 = vpop.f32.mrb[99].mxu0 }
 0x274   : > { %v4326_v15 = vadd.f32 %v4325_v10, %v4324_v13  ;;  %v6050_v5 = vadd.f32 %v5996_v47, %v4323_v59 }
 0x276   : > { %v6052_v42 = vadd.f32 %v4622_v41, %v4326_v15  ;;  %v3932_v15 = vunpack.c.l.bf16 %v3931_v31 }
 0x278   : > { %v4327_v61 = vpop.f32.mrb[100].mxu0 }
 0x279   : > { %v4328_v18 = vpop.f32.mrb[101].mxu0 }
 0x27a   : > { %v4329_v11 = vadd.f32 %v4328_v18, %v4327_v61  ;;  %v4330_v27 = vpop.f32.mrb[102].mxu0 }
 0x27b   : > { %v4331_v22 = vpop.f32.mrb[103].mxu0 }
 0x27c   : > { %v4332_v14 = vadd.f32 %v4331_v22, %v4330_v27  ;;  %v6055_v40 = vadd.f32 %v5992_v45, %v4329_v11 }
 0x27e   : > { %v6058_v43 = vadd.f32 %v6003_v0, %v4332_v14 }
 0x280   : > { %v4333_v57 = vpop.f32.mrb[104].mxu0 }
 0x281   : > { %v4334_v9 = vpop.f32.mrb[105].mxu0 }
 0x282   : > { %v4335_v33 = vadd.f32 %v4334_v9, %v4333_v57  ;;  %v4336_v46 = vpop.f32.mrb[106].mxu0 }
 0x283   : > { %v4337_v47 = vpop.f32.mrb[107].mxu0 }
 0x284   : > { %v4338_v41 = vadd.f32 %v4337_v47, %v4336_v46  ;;  %v6060_v55 = vadd.f32 %v4630_v3, %v4335_v33  ;;  %v3994_v3 = vld [vmem:[%s5551_s14 + $0x8] sm:$0xff]   ;;  %v3933_v46 = vunpack.c.h.bf16 %v3931_v31  ;;  %v3996_v47 = vld [vmem:[%s5551_s14 + $0x18] sm:$0xff]  }
 0x285   : > { %v3936_v10 = vunpack.c.l.bf16 %v3994_v3  ;;  %v3937_v9 = vunpack.c.h.bf16 %v3994_v3  ;;  %v3944_v3 = vunpack.c.l.bf16 %v3996_v47 }
 0x286   : > { %v6062_v30 = vadd.f32 %v4638_v56, %v4338_v41 }
 0x288   : > { %v4339_v37 = vpop.f32.mrb[108].mxu0 }
 0x289   : > { %v4340_v35 = vpop.f32.mrb[109].mxu0 }
 0x28a   : > { %v4341_v58 = vadd.f32 %v4340_v35, %v4339_v37  ;;  %v4342_v45 = vpop.f32.mrb[110].mxu0 }
 0x28b   : > { %v4343_v53 = vpop.f32.mrb[111].mxu0 }
 0x28c   : > { %v4344_v54 = vadd.f32 %v4343_v53, %v4342_v45  ;;  %v6065_v0 = vadd.f32 %v6012_v17, %v4341_v58  ;;  %v3995_v53 = vld [vmem:[%s5551_s14 + $0x10] sm:$0xff]  }
 0x28e   : > { %v6068_v21 = vadd.f32 %v6021_v8, %v4344_v54 }
 0x290   : > { %v4345_v16 = vpop.f32.mrb[112].mxu0  ;;  %v4531_v6 = vpop.f32.mrb[80].mxu1 }
 0x291   : > { %v4580_v56 = vadd.f32 %v4579_v38, %v4531_v6  ;;  %v4346_v60 = vpop.f32.mrb[113].mxu0  ;;  %v2892_v52 = vpop.f32.mrb[81].mxu1 }
 0x292   : > { %v4347_v34 = vadd.f32 %v4346_v60, %v4345_v16  ;;  %v4584_v59 = vadd.f32 %v6028_v51, %v2892_v52  ;;  %v4348_v17 = vpop.f32.mrb[114].mxu0  ;;  %v4532_v13 = vpop.f32.mrb[82].mxu1 }
 0x293   : > { %v3156_v8 = vmul.f32 %v4580_v56, %v6070_v32  ;;  %v4588_v61 = vadd.f32 %v6035_v24, %v4532_v13  ;;  %v4349_v18 = vpop.f32.mrb[115].mxu0  ;;  %v2895_v11 = vpop.f32.mrb[83].mxu1 }
 0x294   : > { %v3154_v38 = vmul.f32 %v4584_v59, %v6070_v32  ;;  %v4350_v27 = vadd.f32 %v4349_v18, %v4348_v17  ;;  %v4592_v22 = vadd.f32 %v6031_v23, %v2895_v11  ;;  %v6082_v14 = vadd.f32 %v5915_v12, %v4347_v34 }
 0x295   : > { %v3195_v51 = vadd.f32 %v6074_v19, %v3156_v8  ;;  %v3157_v57 = vmul.f32 %v4588_v61, %v6070_v32  ;;  %v3940_v8 = vunpack.c.l.bf16 %v3995_v53 }
 0x296   : > { %v3193_v33 = vadd.f32 %v6074_v19, %v3154_v38  ;;  %v3155_v24 = vmul.f32 %v4592_v22, %v6070_v32  ;;  %v6091_v41 = vadd.f32 %v5919_v44, %v4350_v27 }
 0x297   : > { %v3291_v23 = vadd.f32 %v3936_v10, %v3195_v51  ;;  %v3196_v12 = vadd.f32 %v6074_v19, %v3157_v57  ;;  %v3945_v51 = vunpack.c.h.bf16 %v3996_v47 }
 0x298   : > { %v3289_v37 = vadd.f32 %v3932_v15, %v3193_v33  ;;  %v3194_v35 = vadd.f32 %v6074_v19, %v3155_v24  ;;  %v4351_v58 = vpop.f32.mrb[116].mxu0  ;;  %v4535_v45 = vpop.f32.mrb[84].mxu1  ;;  %v3941_v33 = vunpack.c.h.bf16 %v3995_v53  ;;  %v3998_v24 = vld [vmem:[%s5551_s14 + $0x28] sm:$0xff]  }
 0x299   : > { %v3323_v54 = vmax.f32 %v3291_v23, 0.0  ;;  %v3292_v16 = vadd.f32 %v3937_v9, %v3196_v12  ;;  %v4596_v6 = vadd.f32 %v6044_v29, %v4535_v45  ;;  %v4352_v56 = vpop.f32.mrb[117].mxu0  ;;  %v2908_v31 = vpop.f32.mrb[85].mxu1 }
 0x29a   : > { %v3321_v60 = vmax.f32 %v3289_v37, 0.0  ;;  %v3290_v52 = vadd.f32 %v3933_v46, %v3194_v35  ;;  %v4353_v44 = vadd.f32 %v4352_v56, %v4351_v58  ;;  %v4600_v34 = vadd.f32 %v6038_v7, %v2908_v31  ;;  %v4354_v59 = vpop.f32.mrb[118].mxu0  ;;  %v4536_v17 = vpop.f32.mrb[86].mxu1  ;;  %v6358_v46 = vld [vmem:[#allocation23_spill] sm:$0xff] }
 0x29b   : > { %3355 = vst [vmem:[%s6098_s26 + $0x10] sm:$0xff] %v3323_v54  ;;  %v3324_v13 = vmax.f32 %v3292_v16, 0.0  ;;  %v3160_v29 = vmul.f32 %v4596_v6, %v6070_v32  ;;  %v4604_v10 = vadd.f32 %v6047_v20, %v4536_v17  ;;  %v4355_v15 = vpop.f32.mrb[119].mxu0  ;;  %v2911_v61 = vpop.f32.mrb[87].mxu1  ;;  %v3997_v58 = vld [vmem:[%s5551_s14 + $0x20] sm:$0xff]   ;;  %v3952_v6 = vunpack.c.l.bf16 %v3998_v24 }
 0x29c   : > { %3353 = vst [vmem:[%s6098_s26] sm:$0xff] %v3321_v60  ;;  %v3322_v7 = vmax.f32 %v3290_v52, 0.0  ;;  %v3158_v18 = vmul.f32 %v4600_v34, %v6070_v32  ;;  %v4356_v11 = vadd.f32 %v4355_v15, %v4354_v59  ;;  %v4608_v38 = vadd.f32 %v6041_v4, %v2911_v61 }
 0x29d   : > { %3356 = vst [vmem:[%s6098_s26 + $0x18] sm:$0xff] %v3324_v13  ;;  %v3199_v27 = vadd.f32 %v6074_v19, %v3160_v29  ;;  %v3161_v22 = vmul.f32 %v4604_v10, %v6070_v32  ;;  %v6110_v57 = vadd.f32 %v5923_v50, %v4353_v44  ;;  %v3948_v13 = vunpack.c.l.bf16 %v3997_v58 }
 0x29e   : > { %3354 = vst [vmem:[%s6098_s26 + $0x8] sm:$0xff] %v3322_v7  ;;  %v3197_v20 = vadd.f32 %v6074_v19, %v3158_v18  ;;  %v3159_v9 = vmul.f32 %v4608_v38, %v6070_v32  ;;  %v6117_v23 = vadd.f32 %v6358_v46, %v4356_v11  ;;  %v3953_v11 = vunpack.c.h.bf16 %v3998_v24 }
 0x29f   : > { %v3295_v4 = vadd.f32 %v3944_v3, %v3199_v27  ;;  %v3200_v12 = vadd.f32 %v6074_v19, %v3161_v22  ;;  %v3949_v22 = vunpack.c.h.bf16 %v3997_v58 }
 0x2a0   : > { %v3293_v37 = vadd.f32 %v3940_v8, %v3197_v20  ;;  %v3198_v35 = vadd.f32 %v6074_v19, %v3159_v9  ;;  %v4357_v47 = vpop.f32.mrb[120].mxu0  ;;  %v4539_v50 = vpop.f32.mrb[88].mxu1  ;;  %v6359_v20 = vld [vmem:[#allocation24_spill] sm:$0xff] }
 0x2a1   : > { %v3327_v45 = vmax.f32 %v3295_v4, 0.0  ;;  %v3296_v54 = vadd.f32 %v3945_v51, %v3200_v12  ;;  %v4612_v16 = vadd.f32 %v6055_v40, %v4539_v50  ;;  %v4358_v53 = vpop.f32.mrb[121].mxu0  ;;  %v2924_v56 = vpop.f32.mrb[89].mxu1  ;;  %v4000_v51 = vld [vmem:[%s5551_s14 + $0x38] sm:$0xff]   ;;  %v3999_v12 = vld [vmem:[%s5551_s14 + $0x30] sm:$0xff]  }
 0x2a2   : > { %v3325_v31 = vmax.f32 %v3293_v37, 0.0  ;;  %v3294_v60 = vadd.f32 %v3941_v33, %v3198_v35  ;;  %v4359_v3 = vadd.f32 %v4358_v53, %v4357_v47  ;;  %v4616_v52 = vadd.f32 %v6050_v5, %v2924_v56  ;;  %v4360_v44 = vpop.f32.mrb[122].mxu0  ;;  %v4540_v34 = vpop.f32.mrb[90].mxu1 }
 0x2a3   : > { %3359 = vst [vmem:[%s6098_s26 + $0x30] sm:$0xff] %v3327_v45  ;;  %v3328_v59 = vmax.f32 %v3296_v54, 0.0  ;;  %v3164_v17 = vmul.f32 %v4612_v16, %v6070_v32  ;;  %v4620_v40 = vadd.f32 %v6058_v43, %v4540_v34  ;;  %v4361_v29 = vpop.f32.mrb[123].mxu0  ;;  %v2927_v8 = vpop.f32.mrb[91].mxu1  ;;  %v3960_v50 = vunpack.c.l.bf16 %v4000_v51 }
 0x2a4   : > { %3357 = vst [vmem:[%s6098_s26 + $0x20] sm:$0xff] %v3325_v31  ;;  %v3326_v10 = vmax.f32 %v3294_v60, 0.0  ;;  %v3162_v15 = vmul.f32 %v4616_v52, %v6070_v32  ;;  %v4362_v61 = vadd.f32 %v4361_v29, %v4360_v44  ;;  %v4624_v5 = vadd.f32 %v6052_v42, %v2927_v8 }
 0x2a5   : > { %3360 = vst [vmem:[%s6098_s26 + $0x38] sm:$0xff] %v3328_v59  ;;  %v3203_v7 = vadd.f32 %v6074_v19, %v3164_v17  ;;  %v3165_v18 = vmul.f32 %v4620_v40, %v6070_v32  ;;  %v6134_v38 = vadd.f32 %v5931_v25, %v4359_v3  ;;  %v3956_v52 = vunpack.c.l.bf16 %v3999_v12 }
 0x2a6   : > { %3358 = vst [vmem:[%s6098_s26 + $0x28] sm:$0xff] %v3326_v10  ;;  %v3201_v43 = vadd.f32 %v6074_v19, %v3162_v15  ;;  %v3163_v27 = vmul.f32 %v4624_v5, %v6070_v32  ;;  %v6141_v9 = vadd.f32 %v6359_v20, %v4362_v61  ;;  %v3961_v8 = vunpack.c.h.bf16 %v4000_v51  ;;  %v4002_v5 = vld [vmem:[%s5551_s14 + $0x48] sm:$0xff]  }
 0x2a7   : > { %v3299_v42 = vadd.f32 %v3952_v6, %v3203_v7  ;;  %v3204_v33 = vadd.f32 %v6074_v19, %v3165_v18  ;;  %v3957_v61 = vunpack.c.h.bf16 %v3999_v12 }
 0x2a8   : > { %v3297_v46 = vadd.f32 %v3948_v13, %v3201_v43  ;;  %v3202_v4 = vadd.f32 %v6074_v19, %v3163_v27  ;;  %v4363_v24 = vpop.f32.mrb[124].mxu0  ;;  %v4543_v25 = vpop.f32.mrb[92].mxu1 }
 0x2a9   : > { %v3331_v37 = vmax.f32 %v3299_v42, 0.0  ;;  %v3300_v35 = vadd.f32 %v3953_v11, %v3204_v33  ;;  %v4628_v47 = vadd.f32 %v6065_v0, %v4543_v25  ;;  %v4364_v58 = vpop.f32.mrb[125].mxu0  ;;  %v2940_v45 = vpop.f32.mrb[93].mxu1  ;;  %v3968_v33 = vunpack.c.l.bf16 %v4002_v5 }
 0x2aa   : > { %v3329_v54 = vmax.f32 %v3297_v46, 0.0  ;;  %v3298_v16 = vadd.f32 %v3949_v22, %v3202_v4  ;;  %v4365_v6 = vadd.f32 %v4364_v58, %v4363_v24  ;;  %v4632_v53 = vadd.f32 %v6060_v55, %v2940_v45  ;;  %v4366_v56 = vpop.f32.mrb[126].mxu0  ;;  %v4544_v31 = vpop.f32.mrb[94].mxu1 }
 0x2ab   : > { %3363 = vst [vmem:[%s6098_s26 + $0x50] sm:$0xff] %v3331_v37  ;;  %v3332_v60 = vmax.f32 %v3300_v35, 0.0  ;;  %v3168_v3 = vmul.f32 %v4628_v47, %v6070_v32  ;;  %v4636_v0 = vadd.f32 %v6068_v21, %v4544_v31  ;;  %v4367_v44 = vpop.f32.mrb[127].mxu0  ;;  %v2943_v34 = vpop.f32.mrb[95].mxu1 }
 0x2ac   : > { %3361 = vst [vmem:[%s6098_s26 + $0x40] sm:$0xff] %v3329_v54  ;;  %v3330_v59 = vmax.f32 %v3298_v16, 0.0  ;;  %v3166_v17 = vmul.f32 %v4632_v53, %v6070_v32  ;;  %v4368_v13 = vadd.f32 %v4367_v44, %v4366_v56  ;;  %v4640_v55 = vadd.f32 %v6062_v30, %v2943_v34  ;;  %v4004_v44 = vld [vmem:[%s5551_s14 + $0x58] sm:$0xff]  }
 0x2ad   : > { %3364 = vst [vmem:[%s6098_s26 + $0x58] sm:$0xff] %v3332_v60  ;;  %v3207_v40 = vadd.f32 %v6074_v19, %v3168_v3  ;;  %v3169_v29 = vmul.f32 %v4636_v0, %v6070_v32  ;;  %v4654_v10 = vadd.f32 %v5939_v62, %v4365_v6  ;;  %v4001_v62 = vld [vmem:[%s5551_s14 + $0x40] sm:$0xff]   ;;  %v3969_v60 = vunpack.c.h.bf16 %v4002_v5 }
 0x2ae   : > { %3362 = vst [vmem:[%s6098_s26 + $0x48] sm:$0xff] %v3330_v59  ;;  %v3205_v21 = vadd.f32 %v6074_v19, %v3166_v17  ;;  %v3167_v15 = vmul.f32 %v4640_v55, %v6070_v32  ;;  %v6163_v7 = vadd.f32 %v5943_v36, %v4368_v13  ;;  %v3964_v58 = vunpack.c.l.bf16 %v4001_v62 }
 0x2af   : > { %v3303_v30 = vadd.f32 %v3960_v50, %v3207_v40  ;;  %v3208_v18 = vadd.f32 %v6074_v19, %v3169_v29  ;;  %v3965_v0 = vunpack.c.h.bf16 %v4001_v62  ;;  %v4003_v40 = vld [vmem:[%s5551_s14 + $0x50] sm:$0xff]  }
 0x2b0   : > { %v3301_v11 = vadd.f32 %v3956_v52, %v3205_v21  ;;  %v3206_v43 = vadd.f32 %v6074_v19, %v3167_v15  ;;  %v4369_v27 = vpop.f32.mrb[128].mxu0  ;;  %v4547_v22 = vpop.f32.mrb[0].mxu1  ;;  %v3976_v15 = vunpack.c.l.bf16 %v4004_v44 }
 0x2b1   : > { %v3335_v51 = vmax.f32 %v3303_v30, 0.0  ;;  %v3304_v20 = vadd.f32 %v3961_v8, %v3208_v18  ;;  %v4643_v42 = vadd.f32 %v6110_v57, %v4547_v22  ;;  %v4370_v46 = vpop.f32.mrb[129].mxu0  ;;  %v2956_v4 = vpop.f32.mrb[1].mxu1 }
 0x2b2   : > { %v3333_v36 = vmax.f32 %v3301_v11, 0.0  ;;  %v3302_v24 = vadd.f32 %v3957_v61, %v3206_v43  ;;  %v4371_v25 = vadd.f32 %v4370_v46, %v4369_v27  ;;  %v4646_v12 = vadd.f32 %v6082_v14, %v2956_v4  ;;  %v4372_v37 = vpop.f32.mrb[130].mxu0  ;;  %v4548_v35 = vpop.f32.mrb[2].mxu1 }
 0x2b3   : > { %3367 = vst [vmem:[%s6098_s26 + $0x70] sm:$0xff] %v3335_v51  ;;  %v3336_v47 = vmax.f32 %v3304_v20, 0.0  ;;  %v3172_v50 = vmul.f32 %v4643_v42, %v6070_v32  ;;  %v4649_v57 = vadd.f32 %v6117_v23, %v4548_v35  ;;  %v4373_v45 = vpop.f32.mrb[131].mxu0  ;;  %v2959_v54 = vpop.f32.mrb[3].mxu1  ;;  %v3972_v51 = vunpack.c.l.bf16 %v4003_v40 }
 0x2b4   : > { %3365 = vst [vmem:[%s6098_s26 + $0x60] sm:$0xff] %v3333_v36  ;;  %v3334_v16 = vmax.f32 %v3302_v24, 0.0  ;;  %v3170_v6 = vmul.f32 %v4646_v12, %v6070_v32  ;;  %v4374_v53 = vadd.f32 %v4373_v45, %v4372_v37  ;;  %v4652_v14 = vadd.f32 %v6091_v41, %v2959_v54 }
 0x2b5   : > { %3368 = vst [vmem:[%s6098_s26 + $0x78] sm:$0xff] %v3336_v47  ;;  %v3211_v56 = vadd.f32 %v6074_v19, %v3172_v50  ;;  %v3173_v31 = vmul.f32 %v4649_v57, %v6070_v32  ;;  %v6180_v3 = vadd.f32 %v5955_v63, %v4371_v25  ;;  %v3977_v25 = vunpack.c.h.bf16 %v4004_v44  ;;  %v4006_v47 = vld [vmem:[%s5551_s14 + $0x68] sm:$0xff]  }
 0x2b6   : > { %3366 = vst [vmem:[%s6098_s26 + $0x68] sm:$0xff] %v3334_v16  ;;  %v3209_v23 = vadd.f32 %v6074_v19, %v3170_v6  ;;  %v3171_v52 = vmul.f32 %v4652_v14, %v6070_v32  ;;  %v6187_v34 = vadd.f32 %v5965_v26, %v4374_v53  ;;  %v3973_v35 = vunpack.c.h.bf16 %v4003_v40  ;;  %v4005_v6 = vld [vmem:[%s5551_s14 + $0x60] sm:$0xff]  }
 0x2b7   : > { %v3307_v41 = vadd.f32 %v3968_v33, %v3211_v56  ;;  %v3212_v59 = vadd.f32 %v6074_v19, %v3173_v31  ;;  %v3984_v56 = vunpack.c.l.bf16 %v4006_v47 }
 0x2b8   : > { %v3305_v17 = vadd.f32 %v3964_v58, %v3209_v23  ;;  %v3210_v13 = vadd.f32 %v6074_v19, %v3171_v52  ;;  %v4375_v55 = vpop.f32.mrb[132].mxu0  ;;  %v4551_v63 = vpop.f32.mrb[4].mxu1 }
 0x2b9   : > { %v3339_v29 = vmax.f32 %v3307_v41, 0.0  ;;  %v3308_v8 = vadd.f32 %v3969_v60, %v3212_v59  ;;  %v4655_v21 = vadd.f32 %v4654_v10, %v4551_v63  ;;  %v4376_v61 = vpop.f32.mrb[133].mxu0  ;;  %v2972_v5 = vpop.f32.mrb[5].mxu1 }
 0x2ba   : > { %v3337_v30 = vmax.f32 %v3305_v17, 0.0  ;;  %v3306_v26 = vadd.f32 %v3965_v0, %v3210_v13  ;;  %v4377_v18 = vadd.f32 %v4376_v61, %v4375_v55  ;;  %v4658_v11 = vadd.f32 %v6134_v38, %v2972_v5  ;;  %v4378_v43 = vpop.f32.mrb[134].mxu0  ;;  %v4552_v27 = vpop.f32.mrb[6].mxu1 }
 0x2bb   : > { %3371 = vst [vmem:[%s6098_s26 + $0x90] sm:$0xff] %v3339_v29  ;;  %v3340_v22 = vmax.f32 %v3308_v8, 0.0  ;;  %v3176_v62 = vmul.f32 %v4655_v21, %v6070_v32  ;;  %v4661_v10 = vadd.f32 %v6163_v7, %v4552_v27  ;;  %v4379_v20 = vpop.f32.mrb[135].mxu0  ;;  %v2975_v42 = vpop.f32.mrb[7].mxu1  ;;  %v3980_v13 = vunpack.c.l.bf16 %v4005_v6 }
 0x2bc   : > { %3369 = vst [vmem:[%s6098_s26 + $0x80] sm:$0xff] %v3337_v30  ;;  %v3338_v33 = vmax.f32 %v3306_v26, 0.0  ;;  %v3174_v46 = vmul.f32 %v4658_v11, %v6070_v32  ;;  %v4380_v4 = vadd.f32 %v4379_v20, %v4378_v43  ;;  %v4664_v38 = vadd.f32 %v6141_v9, %v2975_v42  ;;  %v4007_v20 = vld [vmem:[%s5551_s14 + $0x70] sm:$0xff]  }
 0x2bd   : > { %3372 = vst [vmem:[%s6098_s26 + $0x98] sm:$0xff] %v3340_v22  ;;  %v3215_v36 = vadd.f32 %v6074_v19, %v3176_v62  ;;  %v3177_v24 = vmul.f32 %v4661_v10, %v6070_v32  ;;  %v4666_v12 = vadd.f32 %v5977_v1, %v4377_v18  ;;  %v3985_v5 = vunpack.c.h.bf16 %v4006_v47 }
 0x2be   : > { %3370 = vst [vmem:[%s6098_s26 + $0x88] sm:$0xff] %v3338_v33  ;;  %v3213_v7 = vadd.f32 %v6074_v19, %v3174_v46  ;;  %v3175_v37 = vmul.f32 %v4664_v38, %v6070_v32  ;;  %v4672_v50 = vadd.f32 %v5987_v48, %v4380_v4  ;;  %v3981_v11 = vunpack.c.h.bf16 %v4005_v6 }
 0x2bf   : > { %v3311_v58 = vadd.f32 %v3976_v15, %v3215_v36  ;;  %v3216_v9 = vadd.f32 %v6074_v19, %v3177_v24 }
 0x2c0   : > { %v3309_v57 = vadd.f32 %v3972_v51, %v3213_v7  ;;  %v3214_v45 = vadd.f32 %v6074_v19, %v3175_v37  ;;  %v4381_v54 = vpop.f32.mrb[136].mxu0  ;;  %v4555_v16 = vpop.f32.mrb[8].mxu1  ;;  %v3988_v7 = vunpack.c.l.bf16 %v4007_v20 }
 0x2c1   : > { %v3343_v1 = vmax.f32 %v3311_v58, 0.0  ;;  %v3312_v53 = vadd.f32 %v3977_v25, %v3216_v9  ;;  %v4667_v14 = vadd.f32 %v4666_v12, %v4555_v16  ;;  %v4382_v31 = vpop.f32.mrb[137].mxu0  ;;  %v2988_v60 = vpop.f32.mrb[9].mxu1 }
 0x2c2   : > { %v3341_v23 = vmax.f32 %v3309_v57, 0.0  ;;  %v3310_v52 = vadd.f32 %v3973_v35, %v3214_v45  ;;  %v4383_v48 = vadd.f32 %v4382_v31, %v4381_v54  ;;  %v4670_v0 = vadd.f32 %v6180_v3, %v2988_v60  ;;  %v4384_v44 = vpop.f32.mrb[138].mxu0  ;;  %v4556_v41 = vpop.f32.mrb[10].mxu1  ;;  %v4008_v57 = vld [vmem:[%s5551_s14 + $0x78] sm:$0xff]  }
 0x2c3   : > { %3375 = vst [vmem:[%s6098_s26 + $0xb0] sm:$0xff] %v3343_v1  ;;  %v3344_v59 = vmax.f32 %v3312_v53, 0.0  ;;  %v3180_v17 = vmul.f32 %v4667_v14, %v6070_v32  ;;  %v4673_v55 = vadd.f32 %v4672_v50, %v4556_v41  ;;  %v4385_v63 = vpop.f32.mrb[139].mxu0  ;;  %v2991_v40 = vpop.f32.mrb[11].mxu1  ;;  %v3989_v53 = vunpack.c.h.bf16 %v4007_v20 }
 0x2c4   : > { %3373 = vst [vmem:[%s6098_s26 + $0xa0] sm:$0xff] %v3341_v23  ;;  %v3342_v29 = vmax.f32 %v3310_v52, 0.0  ;;  %v3178_v8 = vmul.f32 %v4670_v0, %v6070_v32  ;;  %v4386_v21 = vadd.f32 %v4385_v63, %v4384_v44  ;;  %v4676_v15 = vadd.f32 %v6187_v34, %v2991_v40 }
 0x2c5   : > { %3376 = vst [vmem:[%s6098_s26 + $0xb8] sm:$0xff] %v3344_v59  ;;  %v3219_v3 = vadd.f32 %v6074_v19, %v3180_v17  ;;  %v3181_v61 = vmul.f32 %v4673_v55, %v6070_v32  ;;  %v4681_v30 = vadd.f32 %v5999_v2, %v4383_v48  ;;  %v3992_v14 = vunpack.c.l.bf16 %v4008_v57 }
 0x2c6   : > { %3374 = vst [vmem:[%s6098_s26 + $0xa8] sm:$0xff] %v3342_v29  ;;  %v3217_v26 = vadd.f32 %v6074_v19, %v3178_v8  ;;  %v3179_v18 = vmul.f32 %v4676_v15, %v6070_v32  ;;  %v4687_v43 = vadd.f32 %v6007_v28, %v4386_v21 }
 0x2c7   : > { %v3315_v27 = vadd.f32 %v3984_v56, %v3219_v3  ;;  %v3220_v34 = vadd.f32 %v6074_v19, %v3181_v61 }
 0x2c8   : > { %v3313_v22 = vadd.f32 %v3980_v13, %v3217_v26  ;;  %v3218_v62 = vadd.f32 %v6074_v19, %v3179_v18  ;;  %v4387_v51 = vpop.f32.mrb[140].mxu0  ;;  %v4559_v10 = vpop.f32.mrb[12].mxu1 }
 0x2c9   : > { %v3347_v2 = vmax.f32 %v3315_v27, 0.0  ;;  %v3316_v42 = vadd.f32 %v3985_v5, %v3220_v34  ;;  %v4388_v33 = vpop.f32.mrb[141].mxu0  ;;  %v3004_v46 = vpop.f32.mrb[13].mxu1 }
 0x2ca   : > { %v3345_v4 = vmax.f32 %v3313_v22, 0.0  ;;  %v3314_v38 = vadd.f32 %v3981_v11, %v3218_v62  ;;  %v4389_v28 = vadd.f32 %v4388_v33, %v4387_v51  ;;  %v4682_v36 = vadd.f32 %v4681_v30, %v3004_v46  ;;  %v4390_v24 = vpop.f32.mrb[142].mxu0  ;;  %v4560_v25 = vpop.f32.mrb[14].mxu1 }
 0x2cb   : > { %3379 = vst [vmem:[%s6098_s26 + $0xd0] sm:$0xff] %v3347_v2  ;;  %v3348_v12 = vmax.f32 %v3316_v42, 0.0  ;;  %v4391_v37 = vpop.f32.mrb[143].mxu0  ;;  %v3007_v35 = vpop.f32.mrb[15].mxu1 }
 0x2cc   : > { %3377 = vst [vmem:[%s6098_s26 + $0xc0] sm:$0xff] %v3345_v4  ;;  %v3346_v47 = vmax.f32 %v3314_v38, 0.0  ;;  %v4678_v50 = vadd.f32 %v6017_v49, %v4389_v28  ;;  %v3182_v58 = vmul.f32 %v4682_v36, %v6070_v32  ;;  %v4392_v9 = vadd.f32 %v4391_v37, %v4390_v24 }
 0x2cd   : > { %3380 = vst [vmem:[%s6098_s26 + $0xd8] sm:$0xff] %v3348_v12  ;;  %v4688_v45 = vadd.f32 %v4687_v43, %v3007_v35 }
 0x2ce   : > { %3378 = vst [vmem:[%s6098_s26 + $0xc8] sm:$0xff] %v3346_v47  ;;  %v4679_v54 = vadd.f32 %v4678_v50, %v4559_v10  ;;  %v3221_v16 = vadd.f32 %v6074_v19, %v3182_v58  ;;  %v4684_v6 = vadd.f32 %v6025_v39, %v4392_v9  ;;  %v3993_v39 = vunpack.c.h.bf16 %v4008_v57 }
 0x2cf   : > { %v3183_v1 = vmul.f32 %v4688_v45, %v6070_v32 }
 0x2d0   : > { %v3184_v49 = vmul.f32 %v4679_v54, %v6070_v32  ;;  %v3317_v56 = vadd.f32 %v3988_v7, %v3221_v16  ;;  %v4685_v31 = vadd.f32 %v4684_v6, %v4560_v25 }
 0x2d1   : > { %v3222_v60 = vadd.f32 %v6074_v19, %v3183_v1 }
 0x2d2   : > { %v3223_v23 = vadd.f32 %v6074_v19, %v3184_v49  ;;  %v3349_v52 = vmax.f32 %v3317_v56, 0.0  ;;  %v3185_v48 = vmul.f32 %v4685_v31, %v6070_v32 }
 0x2d3   : > { %v3318_v0 = vadd.f32 %v3989_v53, %v3222_v60 }
 0x2d4   : > { %v3319_v44 = vadd.f32 %v3992_v14, %v3223_v23  ;;  %3381 = vst [vmem:[%s6098_s26 + $0xe0] sm:$0xff] %v3349_v52  ;;  %v3224_v41 = vadd.f32 %v6074_v19, %v3185_v48 }
 0x2d5   : > { %v3350_v59 = vmax.f32 %v3318_v0, 0.0 }
 0x2d6   : > { %v3351_v17 = vmax.f32 %v3319_v44, 0.0  ;;  %v3320_v13 = vadd.f32 %v3993_v39, %v3224_v41 }
 0x2d7   : > { %3382 = vst [vmem:[%s6098_s26 + $0xe8] sm:$0xff] %v3350_v59 }
 0x2d8   : > { %3383 = vst [vmem:[%s6098_s26 + $0xf0] sm:$0xff] %v3351_v17  ;;  %v3352_v32 = vmax.f32 %v3320_v13, 0.0 }
 0x2da   : > { %3384 = vst [vmem:[%s6098_s26 + $0xf8] sm:$0xff] %v3352_v32 }
 0x2db   : > { %5175 = shalt.err (!%p5172_p12)
}
 0x2dc   : > { %s5176_s15 = scalar_lea.hbm %s6250_s7, 4096  ;;  %s5180_s18 = scalar_lea.hbm %s6308_s5, 8192 }
 0x2dd   : > { %p5177_p1 = scmp.ne.s32.totalorder %s6250_s7, %s5176_s15  ;;  %p5181_p0 = scmp.lt.u32.totalorder %s6250_s7, %s6308_s5 }
 0x2de   : > { %p5182_p5 = scmp.lt.u32.totalorder %s5180_s18, %s5176_s15  ;;  %p5184_p2 = scmp.lt.u32.totalorder %s5176_s15, %s6250_s7 }
 0x2df   : > { %p5178_p11 = pnand %p5177_p1, %p6360_p4 }
 0x2e0   : > { %p5183_p9 = por %p5182_p5, %p5181_p0 }
 0x2e1   : > { %p5179_p7 = pneg %p5178_p11 }
 0x2e2   : > { %p5185_p6 = por %p5184_p2, %p5183_p9 }
 0x2e4   : > { %p5186_p13 = pnand %p5185_p6, %p5179_p7 }
 0x2e6   : > { %5189 = shalt.err (!%p5186_p13)
}
 0x2e7   : > { %s5268_s12 = smov 128   ;;  %s5269_s16 = smov 8  }
 0x2e8   : > { %4756 = dma.vmem_to_hbm [thread:$0]  (%p6360_p4), %s6252_s17, 4096, %s6250_s7, %s3386_s25, %s5268_s12, %s5268_s12, %s5269_s16  }
 0x2e9 PF: > { %s6361_s28 = sld [smem:[#allocation18_spill]]  ;;  %s6362_s14 = sld [smem:[#allocation20_spill]] }
 0x2ea   : > { %s6363_s24 = sld [smem:[#allocation19_spill]] }
 0x2ef   : > { %s3418_s26 = sand.u32 1, %s6361_s28   ;;  %p6364_p3 = scmp.ne.s32.totalorder %s6362_s14, 0 }
 0x2f0   : > { %p6365_p10 = scmp.ge.s32.totalorder %s6363_s24, 2  ;;  %s3419_s8 = scalar_lea.sflag [#allocation5], %s3418_s26 }
 0x2f2   : > { %p4776_p8 = pnand %p6365_p10, %p6364_p3 }
 0x2f4   : > { %5231 = dma.done.wait (!%p4776_p8), %s3419_s8, 4096  }
 0x2f5   : > { %5233 = vsyncadd (!%p4776_p8), %s3419_s8, 4294963200  ;;  %s23_s23 = sadd.s32 1, %s6363_s24   ;;  %s6366_s6 = sld [smem:[#allocation22_spill]] }
 0x2f6   : > { %p20_p12 = scmp.ge.s32.totalorder %s23_s23, 4   ;;  %s6367_s10 = sld [smem:[#allocation21_spill]] }
 0x2f7   : > { %s6368_s18 = smov %s5240_s19  ;;  %s6369_s19 = smov %s5244_s20 }
 0x2f8   : > { %s6371_s21 = smov %s5252_s22  ;;  %22 = sbr.rel (!%p20_p12) target bundleno = 11 (0xb), region = 116 }
 0x2fb   : > { %s6370_s20 = smov %s6366_s6 }
 0x2fc   : > { %s6372_s22 = smov %s6367_s10 }
 0x2ff   :  { %3424 = vsyncpa [#allocation4], 1 }
 0x300   :  { %3426 = vsyncpa [#allocation4 + $0x1], 1 }
 0x301   :  { %3427 = vsyncpa [#allocation7], 1 }
 0x302   :  { %3428 = vsyncpa [#allocation10], 1 }
 0x303   :  { %3429 = vsyncpa [#allocation5], 1 }
 0x304   :  { %3431 = vsyncpa [#allocation5 + $0x1], 1 }

// kernel: resnet_block_forward.2
= control target key start
LH: loop header
LB: loop body
LE: loop exit
PB: predicated region body
PF: predicated region fallthrough
CT: control target
= control target key end

     0   :  { %9 = vsyncpa [#allocation4], 0  ;;  %s6193_s0 = inlined_call_operand.hbm [shape: bf16[2,1,18,16,384], index: 0, kind: input, shape index: {}]   ;;  %s6194_s1 = inlined_call_operand.hbm [shape: bf16[3,384,128], index: 1, kind: input, shape index: {}]   ;;  %s6195_s2 = inlined_call_operand.hbm [shape: f32[1,128], index: 2, kind: input, shape index: {}]   ;;  %s6196_s3 = inlined_call_operand.hbm [shape: f32[1,128], index: 3, kind: input, shape index: {}]   ;;  %s6197_s4 = inlined_call_operand.hbm [shape: bf16[2,16,16,128], index: 4, kind: output, shape index: {}]  }
   0x1   :  { %11 = vsyncpa [#allocation4 + $0x1], 0 }
   0x2   :  { %12 = vsyncpa [#allocation7], 0 }
   0x3   :  { %13 = vsyncpa [#allocation10], 0 }
   0x4   :  { %14 = vsyncpa [#allocation5], 0 }
   0x5   :  { %16 = vsyncpa [#allocation5 + $0x1], 0  ;;  %s5265_s15 = smov 0   ;;  %s5267_s16 = smov 0  }
   0x6   :  { %s5269_s17 = smov 0   ;;  %s5271_s18 = smov 0  }
   0x7   :  { %s5273_s19 = smov 0   ;;  %s5275_s20 = smov 0  }
   0x8 LB: > { %s3495_s21 = sadd.s32 4294967295, %s5227_s20   ;;  %s3496_s22 = sadd.s32 4294967294, %s5227_s20   ;;  %s5227_s20 = sphi %s5275_s20, %s22_s20   ;;  %s5223_s19 = sphi %s5273_s19, %s6228_s19   ;;  %s5219_s18 = sphi %s5271_s18, %s6227_s18   ;;  %s5215_s17 = sphi %s5269_s17, %s6226_s17   ;;  %s5211_s16 = sphi %s5267_s16, %s6225_s16   ;;  %s5207_s15 = sphi %s5265_s15, %s6224_s15  }
   0x9   : > { %p61_p0 = scmp.ne.s32.totalorder %s5211_s16, %s5207_s15  ;;  %p5299_p1 = scmp.eq.s32.totalorder %s3495_s21, 0 }
   0xa   : > { %p5303_p2 = scmp.eq.s32.totalorder %s3495_s21, 1  ;;  %p173_p3 = scmp.eq.s32.totalorder %s3496_s22, 1 }
   0xb   : > { %s6203_s23 = scalar_select %p5299_p1, 1, 0 }
   0xc   : > { %s6204_s24 = scalar_select %p5303_p2, 1, 0 }
   0xd   : > { %p5309_p4 = por %p5299_p1, %p61_p0  ;;  %p3497_p5 = scmp.ge.s32.totalorder %s5227_s20, 1 }
   0xe   : > { %p5314_p6 = por %p173_p3, %p61_p0  ;;  %p180_p7 = scmp.lt.s32.totalorder %s5227_s20, 3 }
   0xf   : > { %s6205_s25 = scalar_select %p5309_p4, 1, 0 }
  0x10   : > { %s6206_s26 = scalar_select %p5314_p6, 1, 0 }
  0x11   : > { %p5319_p8 = pnand %p3497_p5, %p180_p7  ;;  %s5229_s28 = smov [#allocation6]  }
  0x12   : > { %6207 = sst [smem:[#allocation16_spill]] %s6206_s26  ;;  %s194_s29 = sshll.u32 %s5229_s28, 4  ;;  %s5323_s29 = int_to_ptr.vmem [resolvable:$true] %s194_s29 }
  0x13   : > { %s6208_s27 = scalar_select %p5319_p8, 1, 0 }
  0x14   : > { %p4766_p9 = pneg %p5319_p8  ;;  %s5230_s5 = smov [#allocation8]  }
  0x15   : > { %s210_s6 = sshll.u32 %s5230_s5, 4  ;;  %s5231_s7 = smov [#allocation9]   ;;  %s5334_s6 = int_to_ptr.vmem [resolvable:$true] %s210_s6 }
  0x16   : > { %p5330_p11 = pnand %p4766_p9, %p5299_p1  ;;  %s5336_s8 = sshll.u32 %s5231_s7, 4  ;;  %s224_s8 = int_to_ptr.vmem [resolvable:$true] %s5336_s8 }
  0x17   : > { %s5023_s11 = scalar_lea.hbm %s6194_s1, 9216 }
  0x18   : > { %p5024_p12 = scmp.ne.s32.totalorder %s6194_s1, %s5023_s11  ;;  %p5346_p13 = pneg %p5330_p11 }
  0x19   : > { %p5030_p5 = scmp.lt.u32.totalorder %s5023_s11, %s6194_s1 }
  0x1a   : > { %p5026_p0 = pnand %p5346_p13, %p5024_p12 }
  0x1c   : > { %p5027_p3 = pneg %p5026_p0 }
  0x1e   : > { %p5032_p7 = pnand %p5030_p5, %p5027_p3 }
  0x20   : > { %5035 = shalt.err (!%p5032_p7)
}
  0x21   : > { %s5036_s28 = scalar_lea.vmem %s5323_s29, 9216  ;;  %p5044_p1 = scmp.lt.s32.totalorder %s5323_s29, %s5323_s29 }
  0x22   : > { %p5037_p9 = scmp.ne.s32.totalorder %s5323_s29, %s5036_s28  ;;  %p5045_p4 = scmp.lt.s32.totalorder %s5036_s28, %s5036_s28 }
  0x24   : > { %p5039_p10 = pnand %p5037_p9, %p5346_p13  ;;  %p5046_p12 = por %p5045_p4, %p5044_p1 }
  0x26   : > { %p5040_p6 = pneg %p5039_p10 }
  0x28   : > { %p5047_p0 = pnand %p5046_p12, %p5040_p6 }
  0x2a   : > { %5050 = shalt.err (!%p5047_p0)
}
  0x2b   : > { %s5232_s5 = smov 64   ;;  %s5233_s7 = smov 4  }
  0x2c   : > { %4769 = dma.hbm_to_vmem [thread:$0]  (!%p5330_p11), %s6194_s1, 9216, %s5323_s29, [#allocation7], %s5232_s5, %s5232_s5, %s5233_s7  }
  0x2d   : > { %s5051_s13 = scalar_lea.hbm %s6195_s2, 16 }
  0x2e   : > { %p5052_p1 = scmp.ne.s32.totalorder %s6195_s2, %s5051_s13  ;;  %p5058_p10 = scmp.lt.u32.totalorder %s5051_s13, %s6195_s2 }
  0x30   : > { %p5054_p4 = pnand %p5052_p1, %p5346_p13 }
  0x32   : > { %p5055_p6 = pneg %p5054_p4 }
  0x34   : > { %p5060_p3 = pnand %p5058_p10, %p5055_p6 }
  0x36   : > { %5063 = shalt.err (!%p5060_p3)
}
  0x37   : > { %s5064_s29 = scalar_lea.vmem %s5334_s6, 16  ;;  %s5071_s5 = scalar_lea.vmem %s5334_s6, 32 }
  0x38   : > { %p5065_p5 = scmp.ne.s32.totalorder %s5334_s6, %s5064_s29  ;;  %p5072_p12 = scmp.lt.s32.totalorder %s5334_s6, %s5334_s6 }
  0x39   : > { %p5073_p0 = scmp.lt.s32.totalorder %s5071_s5, %s5064_s29 }
  0x3a   : > { %p5067_p7 = pnand %p5065_p5, %p5346_p13 }
  0x3b   : > { %p5074_p1 = por %p5073_p0, %p5072_p12 }
  0x3c   : > { %p5068_p9 = pneg %p5067_p7 }
  0x3e   : > { %p5075_p4 = pnand %p5074_p1, %p5068_p9 }
  0x40   : > { %5078 = shalt.err (!%p5075_p4)
}
  0x41   : > { %4772 = dma.hbm_to_vmem [thread:$0]  (!%p5330_p11), %s6195_s2, 16, %s5334_s6, [#allocation7]  }
  0x42   : > { %s5079_s11 = scalar_lea.hbm %s6196_s3, 16 }
  0x43   : > { %p5080_p6 = scmp.ne.s32.totalorder %s6196_s3, %s5079_s11  ;;  %p5086_p5 = scmp.lt.u32.totalorder %s5079_s11, %s6196_s3 }
  0x45   : > { %p5082_p10 = pnand %p5080_p6, %p5346_p13 }
  0x47   : > { %p5083_p3 = pneg %p5082_p10 }
  0x49   : > { %p5088_p7 = pnand %p5086_p5, %p5083_p3 }
  0x4b   : > { %5091 = shalt.err (!%p5088_p7)
}
  0x4c   : > { %s5092_s28 = scalar_lea.vmem %s224_s8, 16  ;;  %s5099_s6 = scalar_lea.vmem %s224_s8, 32 }
  0x4d   : > { %p5093_p9 = scmp.ne.s32.totalorder %s224_s8, %s5092_s28  ;;  %p5100_p1 = scmp.lt.s32.totalorder %s224_s8, %s224_s8 }
  0x4e   : > { %p5101_p4 = scmp.lt.s32.totalorder %s5099_s6, %s5092_s28 }
  0x4f   : > { %p5095_p12 = pnand %p5093_p9, %p5346_p13 }
  0x50   : > { %p5102_p8 = por %p5101_p4, %p5100_p1 }
  0x51   : > { %p5096_p0 = pneg %p5095_p12 }
  0x53   : > { %p5103_p2 = pnand %p5102_p8, %p5096_p0 }
  0x55   : > { %5106 = shalt.err (!%p5103_p2)
}
  0x56   : > { %4775 = dma.hbm_to_vmem [thread:$0]  (!%p5330_p11), %s6196_s3, 16, %s224_s8, [#allocation10]  }
  0x57   : > { %s48_s14 = sadd.s32 1, %s5215_s17  ;;  %s37_s26 = sadd.s32 1, %s5223_s19 }
  0x58   : > { %p55_p2 = scmp.ne.s32.totalorder %s5215_s17, %s5211_s16  ;;  %p39_p8 = scmp.ge.s32.totalorder %s37_s26, 2 }
  0x59   : > { %p56_p13 = scmp.eq.s32.totalorder %s5227_s20, 0  ;;  %p6211_p6 = scmp.ne.s32.totalorder %s6204_s24, 0 }
  0x5a   : > { %p4787_p3 = scmp.lt.s32.totalorder %s5227_s20, 2  ;;  %s6230_s26 = smov (%p39_p8, %s37_s26), 0 }
  0x5b   : > { %p5417_p10 = por %p6211_p6, %p55_p2  ;;  %p57_p5 = por %p56_p13, %p55_p2 }
  0x5c   : > { %s234_s7 = sand.u32 1, %s5215_s17   ;;  %s45_s9 = ssub.s32 %s5223_s19, %s6230_s26 }
  0x5d   : > { %p46_p7 = scmp.eq.s32.totalorder %s45_s9, 0  ;;  %s4747_s8 = smul.u32 432, %s234_s7 }
  0x5e   : > { %s4748_s10 = smul.u32 6912, %s5223_s19  ;;  %p5428_p11 = pnand %p4787_p3, %p57_p5 }
  0x5f   : > { %s5433_s24 = scalar_select %p46_p7, %s5215_s17, %s48_s14  }
  0x60   : > { %s5438_s21 = scalar_lea.hbm %s6193_s0, %s4748_s10  ;;  %s238_s22 = scalar_lea.vmem [#allocation3], %s4747_s8 }
  0x61   : > { %s245_s28 = sshll.u32 %s238_s22, 4  ;;  %s5442_s6 = scalar_lea.sflag [#allocation4], %s234_s7  ;;  %s5440_s28 = int_to_ptr.vmem [resolvable:$true] %s245_s28 }
  0x62   : > { %s5107_s29 = scalar_lea.hbm %s5438_s21, 6912  ;;  %p5109_p12 = pneg %p5428_p11 }
  0x63   : > { %p5108_p9 = scmp.ne.s32.totalorder %s5438_s21, %s5107_s29  ;;  %s5112_s9 = scalar_lea.hbm %s6193_s0, 13824 }
  0x64   : > { %p5113_p4 = scmp.lt.u32.totalorder %s5438_s21, %s6193_s0  ;;  %p5114_p2 = scmp.lt.u32.totalorder %s5112_s9, %s5107_s29 }
  0x65   : > { %p5110_p0 = pnand %p5109_p12, %p5108_p9  ;;  %p5116_p13 = scmp.lt.u32.totalorder %s5107_s29, %s5438_s21 }
  0x66   : > { %p5115_p8 = por %p5114_p2, %p5113_p4 }
  0x67   : > { %p5111_p1 = pneg %p5110_p0 }
  0x68   : > { %p5117_p6 = por %p5116_p13, %p5115_p8 }
  0x6a   : > { %p5118_p3 = pnand %p5117_p6, %p5111_p1 }
  0x6c   : > { %5121 = shalt.err (!%p5118_p3)
}
  0x6d   : > { %s5122_s7 = scalar_lea.vmem %s5440_s28, 6912  ;;  %s5234_s8 = smov [#allocation3]  }
  0x6e   : > { %p5123_p5 = scmp.ne.s32.totalorder %s5440_s28, %s5122_s7  ;;  %s5127_s13 = sshll.u32 %s5234_s8, 4  ;;  %s5128_s13 = int_to_ptr.vmem [resolvable:$false] %s5127_s13 }
  0x6f   : > { %s5129_s22 = scalar_lea.vmem %s5128_s13, 13824  ;;  %p5130_p0 = scmp.lt.s32.totalorder %s5440_s28, %s5128_s13 }
  0x70   : > { %p5125_p7 = pnand %p5123_p5, %p5109_p12  ;;  %p5131_p4 = scmp.lt.s32.totalorder %s5129_s22, %s5122_s7 }
  0x72   : > { %p5126_p9 = pneg %p5125_p7  ;;  %p5132_p2 = por %p5131_p4, %p5130_p0 }
  0x74   : > { %p5133_p8 = pnand %p5132_p2, %p5126_p9 }
  0x76   : > { %5136 = shalt.err (!%p5133_p8)
}
  0x77   : > { %s5235_s29 = smov 192   ;;  %s5236_s5 = smov 12  }
  0x78   : > { %4779 = dma.hbm_to_vmem [thread:$0]  (!%p5428_p11), %s5438_s21, 6912, %s5440_s28, %s5442_s6, %s5235_s29, %s5235_s29, %s5236_s5  }
  0x79   : > { %p6214_p12 = scmp.ne.s32.totalorder %s6208_s27, 0 }
  0x7b   : > { %257 = sbr.rel (%p6214_p12) target bundleno = 698 (0x2ba), region = 36 }
  0x82   : > { %s5473_s14 = sand.u32 1, %s5211_s16   ;;  %p6215_p1 = scmp.ne.s32.totalorder %s6205_s25, 0 }
  0x83   : > { %s4749_s9 = smul.u32 432, %s5473_s14  ;;  %s260_s10 = scalar_lea.sflag [#allocation4], %s5473_s14 }
  0x85   : > { %s5477_s12 = scalar_lea.vmem [#allocation3], %s4749_s9 }
  0x86   : > { %5190 = dma.done.wait (%p6215_p1), %s260_s10, 6912  }
  0x87   : > { %5192 = vsyncadd (%p6215_p1), %s260_s10, 4294960384  ;;  %p6216_p11 = scmp.ne.s32.totalorder %s6203_s23, 0 }
  0x89   : > { %5194 = dma.done.wait (%p6216_p11), [#allocation7], 9232  }
  0x8a   : > { %5196 = vsyncadd (%p6216_p11), [#allocation7], 4294958064 }
  0x8b   : > { %5198 = dma.done.wait (%p6216_p11), [#allocation10], 16  }
  0x8c   : > { %5200 = vsyncadd (%p6216_p11), [#allocation10], 4294967280  ;;  %v4849_v0 = vld [vmem:[#allocation6 + $0x40] sm:$0xff]   ;;  %v4852_v3 = vld [vmem:[#allocation6 + $0x48] sm:$0xff]   ;;  %s3507_s23 = sshll.u32 %s5473_s14, 7  ;;  %s3923_s27 = sshll.u32 %s5219_s18, 11 }
  0x8d   : > { %v5491_v1 = vld [vmem:[#allocation6 + $0x80] sm:$0xff]   ;;  %4019 = vmatprep.subr.bf16.mxu0 %v4849_v0  ;;  %v5495_v4 = vld [vmem:[#allocation6 + $0x88] sm:$0xff]   ;;  %v4855_v6 = vld [vmem:[#allocation6 + $0x50] sm:$0xff]   ;;  %s6029_s25 = scalar_lea.vmem [#allocation11], %s3507_s23  ;;  %s6141_s6 = scalar_lea.hbm %s6197_s4, %s3923_s27 }
  0x8e   : > { %v4851_v2 = vld [vmem:[#allocation6] sm:$0xff]   ;;  %4571 = vmatprep.subr.bf16.mxu1 %v5491_v1  ;;  %v4854_v5 = vld [vmem:[#allocation6 + $0x8] sm:$0xff]   ;;  %v5498_v7 = vld [vmem:[#allocation6 + $0x90] sm:$0xff]   ;;  %s3362_s11 = sshll.u32 %s6029_s25, 4  ;;  %s3345_s7 = scalar_lea.sflag [#allocation5], %s5473_s14  ;;  %s6143_s11 = int_to_ptr.vmem [resolvable:$true] %s3362_s11 }
  0x8f   : > { %4020 = vmatpush3.bf16.msra.mxu0 %v4851_v2  ;;  %4579 = vmatpush3.bf16.msra.mxu1 %v5491_v1  ;;  %v4857_v8 = vld [vmem:[#allocation6 + $0x10] sm:$0xff]   ;;  %v4858_v9 = vld [vmem:[#allocation6 + $0x58] sm:$0xff]   ;;  %v4861_v12 = vld [vmem:[#allocation6 + $0x60] sm:$0xff]   ;;  %s5137_s8 = scalar_lea.vmem %s6143_s11, 2048  ;;  %s5237_s18 = smov [#allocation11]  }
  0x90   : > { %4021 = vmatprep.subr.bf16.mxu0 %v4852_v3  ;;  %4572 = vmatprep.subr.bf16.mxu1 %v5495_v4  ;;  %v5502_v10 = vld [vmem:[#allocation6 + $0x98] sm:$0xff]   ;;  %v5506_v13 = vld [vmem:[#allocation6 + $0xa0] sm:$0xff]   ;;  %v4864_v15 = vld [vmem:[#allocation6 + $0x68] sm:$0xff]   ;;  %p5138_p13 = scmp.ne.s32.totalorder %s6143_s11, %s5137_s8  ;;  %s5141_s13 = sshll.u32 %s5237_s18, 4  ;;  %s5142_s13 = int_to_ptr.vmem [resolvable:$false] %s5141_s13 }
  0x91   : > { %v4860_v11 = vld [vmem:[#allocation6 + $0x18] sm:$0xff]   ;;  %v4863_v14 = vld [vmem:[#allocation6 + $0x20] sm:$0xff]   ;;  %v5510_v16 = vld [vmem:[#allocation6 + $0xa8] sm:$0xff]   ;;  %s5143_s22 = scalar_lea.vmem %s5142_s13, 4096  ;;  %p5144_p5 = scmp.lt.s32.totalorder %s6143_s11, %s5142_s13 }
  0x92   : > { %v4866_v17 = vld [vmem:[#allocation6 + $0x28] sm:$0xff]   ;;  %v4867_v18 = vld [vmem:[#allocation6 + $0x70] sm:$0xff]   ;;  %v4870_v21 = vld [vmem:[#allocation6 + $0x78] sm:$0xff]   ;;  %p5139_p6 = pnand %p5138_p13, %p5417_p10  ;;  %p5145_p7 = scmp.lt.s32.totalorder %s5143_s22, %s5137_s8 }
  0x93   : > { %4022 = vmatpush3.bf16.msra.mxu0 %v4854_v5  ;;  %4580 = vmatpush3.bf16.msra.mxu1 %v5495_v4  ;;  %v5514_v19 = vld [vmem:[#allocation6 + $0xb0] sm:$0xff]   ;;  %v5517_v22 = vld [vmem:[#allocation6 + $0xb8] sm:$0xff]   ;;  %v4878_v26 = vld [vmem:[#allocation6 + $0x100] sm:$0xff]  }
  0x94   : > { %4023 = vmatprep.subr.bf16.mxu0 %v4855_v6  ;;  %4573 = vmatprep.subr.bf16.mxu1 %v5498_v7  ;;  %v4869_v20 = vld [vmem:[#allocation6 + $0x30] sm:$0xff]   ;;  %v4872_v25 = vld [vmem:[#allocation6 + $0x38] sm:$0xff]   ;;  %v4879_v29 = vld [vmem:[#allocation6 + $0xc0] sm:$0xff]   ;;  %p5140_p3 = pneg %p5139_p6  ;;  %p5146_p9 = por %p5145_p7, %p5144_p5 }
  0x95   : > { %v4875_v23 = vld [vmem:[%s5477_s12 + $0x4] ss:$12 sps:$4 sm:$0xff]   ;;  %v4876_v24 = vld [vmem:[%s5477_s12 + $0xc8] ss:$12 sps:$4 sm:$0xff]   ;;  %v4873_v27 = vld [vmem:[%s5477_s12] ss:$12 sps:$4 sm:$0xff]  }
  0x96   : > { %850 = vmatprep.mubr.bf16.mxu0 %v4875_v23  ;;  %4459 = vmatprep.mubr.bf16.mxu1 %v4876_v24  ;;  %v4877_v28 = vld [vmem:[%s5477_s12 + $0xe0] ss:$12 sps:$4 sm:$0xff]   ;;  %v5529_v31 = vld [vmem:[%s5477_s12 + $0x1c] ss:$12 sps:$4 sm:$0xff]   ;;  %v4884_v32 = vld [vmem:[%s5477_s12 + $0xf8] ss:$12 sps:$4 sm:$0xff]   ;;  %p5147_p0 = pnand %p5146_p9, %p5140_p3 }
  0x97   : > { %4024 = vmatpush3.bf16.msra.mxu0 %v4857_v8  ;;  %4581 = vmatpush3.bf16.msra.mxu1 %v5498_v7  ;;  %v4880_v30 = vld [vmem:[#allocation6 + $0x108] sm:$0xff]   ;;  %v4887_v35 = vld [vmem:[#allocation6 + $0x110] sm:$0xff]   ;;  %v4889_v38 = vld [vmem:[#allocation6 + $0x118] sm:$0xff]  }
  0x98   : > { %4025 = vmatprep.subr.bf16.mxu0 %v4858_v9  ;;  %4574 = vmatprep.subr.bf16.mxu1 %v5502_v10  ;;  %v4881_v33 = vld [vmem:[#allocation6 + $0xc8] sm:$0xff]   ;;  %v4888_v37 = vld [vmem:[#allocation6 + $0xd0] sm:$0xff]   ;;  %v4890_v41 = vld [vmem:[#allocation6 + $0xd8] sm:$0xff]  }
  0x99   : > { %v5535_v34 = vld [vmem:[%s5477_s12 + $0x18] ss:$12 sps:$4 sm:$0xff]   ;;  %v4886_v36 = vld [vmem:[%s5477_s12 + $0x110] ss:$12 sps:$4 sm:$0xff]   ;;  %v5540_v39 = vld [vmem:[%s5477_s12 + $0x34] ss:$12 sps:$4 sm:$0xff]  }
  0x9a   : > { %v4893_v40 = vld [vmem:[%s5477_s12 + $0x128] ss:$12 sps:$4 sm:$0xff]   ;;  %v5548_v42 = vld [vmem:[%s5477_s12 + $0x30] ss:$12 sps:$4 sm:$0xff]   ;;  %v4895_v43 = vld [vmem:[%s5477_s12 + $0x140] ss:$12 sps:$4 sm:$0xff]  }
  0x9b   : > { %4026 = vmatpush3.bf16.msra.mxu0 %v4860_v11  ;;  %4582 = vmatpush3.bf16.msra.mxu1 %v5502_v10  ;;  %v4896_v44 = vld [vmem:[#allocation6 + $0x120] sm:$0xff]   ;;  %v4898_v46 = vld [vmem:[#allocation6 + $0x128] sm:$0xff]   ;;  %v4905_v50 = vld [vmem:[#allocation6 + $0x130] sm:$0xff]  }
  0x9c   : > { %4027 = vmatprep.subr.bf16.mxu0 %v4861_v12  ;;  %4575 = vmatprep.subr.bf16.mxu1 %v5506_v13  ;;  %v4897_v45 = vld [vmem:[#allocation6 + $0xe0] sm:$0xff]   ;;  %v5554_v47 = vld [vmem:[%s5477_s12 + $0x4c] ss:$12 sps:$4 sm:$0xff]   ;;  %v4906_v53 = vld [vmem:[#allocation6 + $0xf0] sm:$0xff]  }
  0x9d   : > { %v4902_v48 = vld [vmem:[%s5477_s12 + $0x158] ss:$12 sps:$4 sm:$0xff]   ;;  %v5561_v51 = vld [vmem:[%s5477_s12 + $0x48] ss:$12 sps:$4 sm:$0xff]   ;;  %v4904_v52 = vld [vmem:[%s5477_s12 + $0x170] ss:$12 sps:$4 sm:$0xff]  }
  0x9e   : > { %v4899_v49 = vld [vmem:[#allocation6 + $0xe8] sm:$0xff]   ;;  %v5567_v54 = vld [vmem:[%s5477_s12 + $0x64] ss:$12 sps:$4 sm:$0xff]   ;;  %v4907_v55 = vld [vmem:[#allocation6 + $0x138] sm:$0xff]  }
  0x9f   : > { %4028 = vmatpush3.bf16.msra.mxu0 %v4863_v14  ;;  %4583 = vmatpush3.bf16.msra.mxu1 %v5506_v13  ;;  %v4908_v56 = vld [vmem:[#allocation6 + $0xf8] sm:$0xff]   ;;  %v4912_v57 = vld [vmem:[#allocation6 + $0x140] sm:$0xff]   ;;  %v4919_v60 = vld [vmem:[#allocation6 + $0x148] sm:$0xff]  }
  0xa0   : > { %4029 = vmatprep.subr.bf16.mxu0 %v4864_v15  ;;  %4576 = vmatprep.subr.bf16.mxu1 %v5510_v16  ;;  %v5575_v58 = vld [vmem:[%s5477_s12 + $0x60] ss:$12 sps:$4 sm:$0xff]   ;;  %v5579_v59 = vld [vmem:[%s5477_s12 + $0x7c] ss:$12 sps:$4 sm:$0xff]   ;;  %v5588_v62 = vld [vmem:[%s5477_s12 + $0x78] ss:$12 sps:$4 sm:$0xff]  }
  0xa1   : > { %v4926_v61 = vld [vmem:[#allocation6 + $0x150] sm:$0xff]   ;;  %v4933_v0 = vld [vmem:[#allocation6 + $0x158] sm:$0xff]   ;;  %v4953_v2 = vld [vmem:[#allocation6 + $0x1c0] sm:$0xff]  }
  0xa2   : > { %v5592_v63 = vld [vmem:[%s5477_s12 + $0x94] ss:$12 sps:$4 sm:$0xff]   ;;  %v5599_v3 = vld [vmem:[%s5477_s12 + $0x90] ss:$12 sps:$4 sm:$0xff]   ;;  %v5629_v12 = vld [vmem:[%s5477_s12 + $0xd8] ss:$12 sps:$4 sm:$0xff]  }
  0xa3   : > { %4030 = vmatpush3.bf16.msra.mxu0 %v4866_v17  ;;  %4584 = vmatpush3.bf16.msra.mxu1 %v5510_v16  ;;  %v4947_v5 = vld [vmem:[#allocation6 + $0x168] sm:$0xff]   ;;  %v4955_v6 = vld [vmem:[#allocation6 + $0x170] sm:$0xff]   ;;  %v4968_v9 = vld [vmem:[#allocation6 + $0x178] sm:$0xff]  }
  0xa4   : > { %4031 = vmatprep.subr.bf16.mxu0 %v4867_v18  ;;  %4577 = vmatprep.subr.bf16.mxu1 %v5514_v19  ;;  %v5612_v8 = vld [vmem:[%s5477_s12 + $0xc4] ss:$12 sps:$4 sm:$0xff]   ;;  %v5622_v11 = vld [vmem:[%s5477_s12 + $0xdc] ss:$12 sps:$4 sm:$0xff]   ;;  %v5685_v24 = vld [vmem:[%s5477_s12 + $0x16c] ss:$12 sps:$4 sm:$0xff]  }
  0xa5   : > { %v5634_v14 = vld [vmem:[#allocation6 + $0x200] sm:$0xff]  }
  0xa6   : > { %v5642_v15 = vld [vmem:[%s5477_s12 + $0xf0] ss:$12 sps:$4 sm:$0xff]   ;;  %v5652_v17 = vld [vmem:[%s5477_s12 + $0x108] ss:$12 sps:$4 sm:$0xff]  }
  0xa7   : > { %4032 = vmatpush3.bf16.msra.mxu0 %v4869_v20  ;;  %4585 = vmatpush3.bf16.msra.mxu1 %v5514_v19  ;;  %v5655_v18 = vld [vmem:[%s5477_s12 + $0x124] ss:$12 sps:$4 sm:$0xff]   ;;  %v5665_v20 = vld [vmem:[%s5477_s12 + $0x13c] ss:$12 sps:$4 sm:$0xff]  }
  0xa8   : > { %4033 = vmatprep.subr.bf16.mxu0 %v4870_v21  ;;  %4578 = vmatprep.subr.bf16.mxu1 %v5517_v22  ;;  %v5672_v21 = vld [vmem:[%s5477_s12 + $0x138] ss:$12 sps:$4 sm:$0xff]   ;;  %v5682_v23 = vld [vmem:[%s5477_s12 + $0x150] ss:$12 sps:$4 sm:$0xff]  }
  0xab   : > { %4034 = vmatpush3.bf16.msra.mxu0 %v4872_v25  ;;  %4586 = vmatpush3.bf16.msra.mxu1 %v5517_v22  ;;  %v5692_v25 = vld [vmem:[%s5477_s12 + $0x168] ss:$12 sps:$4 sm:$0xff]  }
  0xac   : > { %4427 = vmatprep.subr.bf16.mxu0 %v5491_v1  ;;  %4155 = vmatprep.subr.bf16.mxu1 %v4878_v26  ;;  %v4951_v26 = vld [vmem:[%s5477_s12 + $0x8] ss:$12 sps:$4 sm:$0xff]  }
  0xae   : > { %851 = vmatmul.mubr.bf16.vlgmr.msra.gmra.mrb[0].mxu0 %v4873_v27  ;;  %4460 = vmatmul.mubr.bf16.vlgmr.msra.gmra.mrb[0].mxu1 %v4877_v28  ;;  %v4952_v27 = vld [vmem:[%s5477_s12 + $0x20] ss:$12 sps:$4 sm:$0xff]  }
  0xaf   : > { %4428 = vmatpush3.bf16.msra.mxu0 %v5491_v1  ;;  %4156 = vmatpush3.bf16.msra.mxu1 %v4879_v29  ;;  %v4940_v1 = vld [vmem:[#allocation6 + $0x160] sm:$0xff]  }
  0xb0   : > { %4157 = vmatprep.subr.bf16.mxu1 %v4880_v30  ;;  %858 = vmatprep.mubr.bf16.mxu0 %v5529_v31  ;;  %v4954_v28 = vld [vmem:[#allocation6 + $0x180] sm:$0xff]   ;;  %v4956_v30 = vld [vmem:[#allocation6 + $0x1c8] sm:$0xff]  }
  0xb1   : > { %4463 = vmatprep.mubr.bf16.mxu1 %v4884_v32  ;;  %4429 = vmatprep.subr.bf16.mxu0 %v5495_v4  ;;  %v4958_v29 = vld [vmem:[%s5477_s12 + $0x38] ss:$12 sps:$4 sm:$0xff]  }
  0xb2   : > { %v4960_v32 = vld [vmem:[#allocation6 + $0x1d0] sm:$0xff]  }
  0xb3   : > { %4158 = vmatpush3.bf16.msra.mxu1 %v4881_v33  ;;  %4430 = vmatpush3.bf16.msra.mxu0 %v5495_v4  ;;  %v5602_v4 = vld [vmem:[%s5477_s12 + $0xac] ss:$12 sps:$4 sm:$0xff]   ;;  %v4959_v33 = vld [vmem:[%s5477_s12 + $0x50] ss:$12 sps:$4 sm:$0xff]  }
  0xb4   : > { %4159 = vmatprep.subr.bf16.mxu1 %v4887_v35  ;;  %4431 = vmatprep.subr.bf16.mxu0 %v5498_v7  ;;  %v4964_v35 = vld [vmem:[%s5477_s12 + $0x68] ss:$12 sps:$4 sm:$0xff]  }
  0xb6   : > { %859 = vmatmul.mubr.bf16.gmra.mrb[4].mxu0 %v5535_v34  ;;  %4464 = vmatmul.mubr.bf16.gmra.mrb[4].mxu1 %v4886_v36  ;;  %v4962_v36 = vld [vmem:[#allocation6 + $0x1d8] sm:$0xff]  }
  0xb7   : > { %4160 = vmatpush3.bf16.msra.mxu1 %v4888_v37  ;;  %866 = vmatprep.mubr.bf16.mxu0 %v5540_v39  ;;  %v4963_v37 = vld [vmem:[#allocation6 + $0x198] sm:$0xff]  }
  0xb8   : > { %4161 = vmatprep.subr.bf16.mxu1 %v4889_v38  ;;  %4467 = vmatprep.mubr.bf16.mxu1 %v4893_v40  ;;  %v4966_v38 = vld [vmem:[#allocation6 + $0x1e0] sm:$0xff]  }
  0xb9   : > { %4432 = vmatpush3.bf16.msra.mxu0 %v5498_v7  ;;  %v5609_v7 = vld [vmem:[%s5477_s12 + $0xa8] ss:$12 sps:$4 sm:$0xff]   ;;  %v4965_v40 = vld [vmem:[%s5477_s12 + $0x80] ss:$12 sps:$4 sm:$0xff]  }
  0xba   : > { %4433 = vmatprep.subr.bf16.mxu0 %v5502_v10 }
  0xbb   : > { %4162 = vmatpush3.bf16.msra.mxu1 %v4890_v41  ;;  %v4967_v41 = vld [vmem:[#allocation6 + $0x1a0] sm:$0xff]  }
  0xbc   : > { %4163 = vmatprep.subr.bf16.mxu1 %v4896_v44  ;;  %v4969_v44 = vld [vmem:[#allocation6 + $0x1e8] sm:$0xff]  }
  0xbd   : > { %4434 = vmatpush3.bf16.msra.mxu0 %v5502_v10  ;;  %v5619_v10 = vld [vmem:[%s5477_s12 + $0xc0] ss:$12 sps:$4 sm:$0xff]  }
  0xbe   : > { %867 = vmatmul.mubr.bf16.gmra.mrb[8].mxu0 %v5548_v42  ;;  %4468 = vmatmul.mubr.bf16.gmra.mrb[8].mxu1 %v4895_v43  ;;  %v4971_v43 = vld [vmem:[%s5477_s12 + $0x98] ss:$12 sps:$4 sm:$0xff]  }
  0xbf   : > { %4164 = vmatpush3.bf16.msra.mxu1 %v4897_v45  ;;  %874 = vmatprep.mubr.bf16.mxu0 %v5554_v47  ;;  %v5709_v45 = vld [vmem:[%s5477_s12 + $0x184] ss:$12 sps:$4 sm:$0xff]  }
  0xc0   : > { %4165 = vmatprep.subr.bf16.mxu1 %v4898_v46  ;;  %4471 = vmatprep.mubr.bf16.mxu1 %v4902_v48  ;;  %v4970_v46 = vld [vmem:[#allocation6 + $0x1a8] sm:$0xff]   ;;  %v4976_v48 = vld [vmem:[#allocation6 + $0x1f0] sm:$0xff]  }
  0xc1   : > { %4435 = vmatprep.subr.bf16.mxu0 %v5506_v13 }
  0xc2   : > { %4436 = vmatpush3.bf16.msra.mxu0 %v5506_v13  ;;  %v5632_v13 = vld [vmem:[%s5477_s12 + $0xf4] ss:$12 sps:$4 sm:$0xff]  }
  0xc3   : > { %4166 = vmatpush3.bf16.msra.mxu1 %v4899_v49  ;;  %4437 = vmatprep.subr.bf16.mxu0 %v5510_v16  ;;  %v4974_v49 = vld [vmem:[%s5477_s12 + $0xb0] ss:$12 sps:$4 sm:$0xff]  }
  0xc4   : > { %4167 = vmatprep.subr.bf16.mxu1 %v4905_v50  ;;  %v5715_v50 = vld [vmem:[%s5477_s12 + $0x180] ss:$12 sps:$4 sm:$0xff]  }
  0xc6   : > { %875 = vmatmul.mubr.bf16.gmra.mrb[12].mxu0 %v5561_v51  ;;  %4472 = vmatmul.mubr.bf16.gmra.mrb[12].mxu1 %v4904_v52  ;;  %v4977_v52 = vld [vmem:[#allocation6 + $0x1b0] sm:$0xff]  }
  0xc7   : > { %4168 = vmatpush3.bf16.msra.mxu1 %v4906_v53  ;;  %882 = vmatprep.mubr.bf16.mxu0 %v5567_v54  ;;  %v4980_v53 = vld [vmem:[%s5477_s12 + $0x20] ss:$12 sps:$4 sm:$0xff]  }
  0xc8   : > { %4169 = vmatprep.subr.bf16.mxu1 %v4907_v55  ;;  %1721 = vmatprep.mubr.bf16.mxu1 %v5529_v31  ;;  %v4957_v31 = vld [vmem:[#allocation6 + $0x188] sm:$0xff]   ;;  %v4978_v55 = vld [vmem:[#allocation6 + $0x1f8] sm:$0xff]  }
  0xc9   : > { %4438 = vmatpush3.bf16.msra.mxu0 %v5510_v16  ;;  %v5645_v16 = vld [vmem:[%s5477_s12 + $0x10c] ss:$12 sps:$4 sm:$0xff]  }
  0xca   : > { %4439 = vmatprep.subr.bf16.mxu0 %v5514_v19 }
  0xcb   : > { %4170 = vmatpush3.bf16.msra.mxu1 %v4908_v56  ;;  %v4979_v56 = vld [vmem:[#allocation6 + $0x1b8] sm:$0xff]  }
  0xcc   : > { %4475 = vmatprep.subr.bf16.mxu1 %v4912_v57 }
  0xcd   : > { %4440 = vmatpush3.bf16.msra.mxu0 %v5514_v19  ;;  %v5662_v19 = vld [vmem:[%s5477_s12 + $0x120] ss:$12 sps:$4 sm:$0xff]  }
  0xce   : > { %883 = vmatmul.mubr.bf16.gmra.mrb[16].mxu0 %v5575_v58  ;;  %1722 = vmatmul.mubr.bf16.vlgmr.msra.gmra.mrb[16].mxu1 %v5535_v34  ;;  %v4961_v34 = vld [vmem:[#allocation6 + $0x190] sm:$0xff]  }
  0xcf   : > { %4476 = vmatpush3.bf16.msra.mxu1 %v4912_v57  ;;  %890 = vmatprep.mubr.bf16.mxu0 %v5579_v59  ;;  %v4981_v57 = vld [vmem:[%s5477_s12 + $0x38] ss:$12 sps:$4 sm:$0xff]  }
  0xd0   : > { %1729 = vmatprep.mubr.bf16.mxu1 %v5540_v39  ;;  %4477 = vmatprep.subr.bf16.mxu1 %v4919_v60 }
  0xd1   : > { %4441 = vmatprep.subr.bf16.mxu0 %v5517_v22 }
  0xd2   : > { %4442 = vmatpush3.bf16.msra.mxu0 %v5517_v22  ;;  %v5675_v22 = vld [vmem:[%s5477_s12 + $0x154] ss:$12 sps:$4 sm:$0xff]  }
  0xd3   : > { %4478 = vmatpush3.bf16.msra.mxu1 %v4919_v60  ;;  %4291 = vmatprep.subr.bf16.mxu0 %v4953_v2  ;;  %v4983_v60 = vld [vmem:[%s5477_s12 + $0x50] ss:$12 sps:$4 sm:$0xff]   ;;  %v4986_v2 = vld [vmem:[%s5477_s12 + $0x80] ss:$12 sps:$4 sm:$0xff]  }
  0xd4   : > { %4479 = vmatprep.subr.bf16.mxu1 %v4926_v61 }
  0xd6   : > { %891 = vmatmul.mubr.bf16.gmra.mrb[20].mxu0 %v5588_v62  ;;  %1730 = vmatmul.mubr.bf16.gmra.mrb[20].mxu1 %v5548_v42 }
  0xd7   : > { %898 = vmatprep.mubr.bf16.mxu0 %v5592_v63  ;;  %1737 = vmatprep.mubr.bf16.mxu1 %v5554_v47 }
  0xd8   : > { %4480 = vmatpush3.bf16.msra.mxu1 %v4926_v61  ;;  %v4985_v61 = vld [vmem:[#allocation6 + $0x208] sm:$0xff]  }
  0xd9   : > { %4481 = vmatprep.subr.bf16.mxu1 %v4933_v0 }
  0xdc   : > { %4482 = vmatpush3.bf16.msra.mxu1 %v4933_v0  ;;  %v4988_v0 = vld [vmem:[#allocation6 + $0x210] sm:$0xff]  }
  0xdd   : > { %4483 = vmatprep.subr.bf16.mxu1 %v4940_v1 }
  0xde   : > { %899 = vmatmul.mubr.bf16.gmra.mrb[24].mxu0 %v5599_v3  ;;  %1738 = vmatmul.mubr.bf16.gmra.mrb[24].mxu1 %v5561_v51 }
  0xdf   : > { %906 = vmatprep.mubr.bf16.mxu0 %v5602_v4  ;;  %1745 = vmatprep.mubr.bf16.mxu1 %v5567_v54 }
  0xe0   : > { %4484 = vmatpush3.bf16.msra.mxu1 %v4940_v1  ;;  %v4984_v1 = vld [vmem:[%s5477_s12 + $0x68] ss:$12 sps:$4 sm:$0xff]  }
  0xe1   : > { %4485 = vmatprep.subr.bf16.mxu1 %v4947_v5 }
  0xe4   : > { %4486 = vmatpush3.bf16.msra.mxu1 %v4947_v5  ;;  %v4989_v5 = vld [vmem:[%s5477_s12 + $0xb0] ss:$12 sps:$4 sm:$0xff]  }
  0xe5   : > { %4487 = vmatprep.subr.bf16.mxu1 %v4955_v6 }
  0xe6   : > { %907 = vmatmul.mubr.bf16.gmra.mrb[28].mxu0 %v5609_v7  ;;  %1746 = vmatmul.mubr.bf16.gmra.mrb[28].mxu1 %v5575_v58 }
  0xe7   : > { %914 = vmatprep.mubr.bf16.mxu0 %v5612_v8  ;;  %1753 = vmatprep.mubr.bf16.mxu1 %v5579_v59 }
  0xe8   : > { %4488 = vmatpush3.bf16.msra.mxu1 %v4955_v6  ;;  %v4997_v6 = vld [vmem:[#allocation6 + $0x228] sm:$0xff]  }
  0xe9   : > { %4489 = vmatprep.subr.bf16.mxu1 %v4968_v9 }
  0xec   : > { %4490 = vmatpush3.bf16.msra.mxu1 %v4968_v9  ;;  %v4992_v9 = vld [vmem:[%s5477_s12 + $0xe0] ss:$12 sps:$4 sm:$0xff]  }
  0xed   : > { %4523 = vmatprep.subr.bf16.mxu1 %v5634_v14 }
  0xee   : > { %915 = vmatmul.mubr.bf16.gmra.mrb[32].mxu0 %v5619_v10  ;;  %1754 = vmatmul.mubr.bf16.gmra.mrb[32].mxu1 %v5588_v62 }
  0xef   : > { %922 = vmatprep.mubr.bf16.mxu0 %v5622_v11  ;;  %1761 = vmatprep.mubr.bf16.mxu1 %v5592_v63 }
  0xf6   : > { %923 = vmatmul.mubr.bf16.gmra.mrb[36].mxu0 %v5629_v12  ;;  %1762 = vmatmul.mubr.bf16.gmra.mrb[36].mxu1 %v5599_v3 }
  0xf7   : > { %930 = vmatprep.mubr.bf16.mxu0 %v5632_v13  ;;  %1769 = vmatprep.mubr.bf16.mxu1 %v5602_v4 }
  0xfe   : > { %931 = vmatmul.mubr.bf16.gmra.mrb[40].mxu0 %v5642_v15  ;;  %1770 = vmatmul.mubr.bf16.gmra.mrb[40].mxu1 %v5609_v7 }
  0xff   : > { %938 = vmatprep.mubr.bf16.mxu0 %v5645_v16  ;;  %1777 = vmatprep.mubr.bf16.mxu1 %v5612_v8 }
 0x106   : > { %939 = vmatmul.mubr.bf16.gmra.mrb[44].mxu0 %v5652_v17  ;;  %1778 = vmatmul.mubr.bf16.gmra.mrb[44].mxu1 %v5619_v10 }
 0x107   : > { %946 = vmatprep.mubr.bf16.mxu0 %v5655_v18  ;;  %1785 = vmatprep.mubr.bf16.mxu1 %v5622_v11 }
 0x10e   : > { %947 = vmatmul.mubr.bf16.gmra.mrb[48].mxu0 %v5662_v19  ;;  %1786 = vmatmul.mubr.bf16.gmra.mrb[48].mxu1 %v5629_v12 }
 0x10f   : > { %954 = vmatprep.mubr.bf16.mxu0 %v5665_v20  ;;  %1793 = vmatprep.mubr.bf16.mxu1 %v5632_v13 }
 0x116   : > { %955 = vmatmul.mubr.bf16.gmra.mrb[52].mxu0 %v5672_v21  ;;  %1794 = vmatmul.mubr.bf16.gmra.mrb[52].mxu1 %v5642_v15 }
 0x117   : > { %962 = vmatprep.mubr.bf16.mxu0 %v5675_v22  ;;  %1801 = vmatprep.mubr.bf16.mxu1 %v5645_v16 }
 0x11e   : > { %963 = vmatmul.mubr.bf16.gmra.mrb[56].mxu0 %v5682_v23  ;;  %1802 = vmatmul.mubr.bf16.gmra.mrb[56].mxu1 %v5652_v17 }
 0x11f   : > { %970 = vmatprep.mubr.bf16.mxu0 %v5685_v24  ;;  %1809 = vmatprep.mubr.bf16.mxu1 %v5655_v18 }
 0x126   : > { %971 = vmatmul.mubr.bf16.gmra.mrb[60].mxu0 %v5692_v25  ;;  %1810 = vmatmul.mubr.bf16.gmra.mrb[60].mxu1 %v5662_v19 }
 0x127   : > { %4443 = vmatprep.mubr.bf16.mxu0 %v4951_v26  ;;  %1817 = vmatprep.mubr.bf16.mxu1 %v5665_v20  ;;  %v4996_v26 = vld [vmem:[%s5477_s12 + $0x128] ss:$12 sps:$4 sm:$0xff]  }
 0x12e   : > { %4444 = vmatmul.mubr.bf16.vlgmr.msra.gmra.mrb[64].mxu0 %v4952_v27  ;;  %1818 = vmatmul.mubr.bf16.gmra.mrb[64].mxu1 %v5672_v21  ;;  %v4998_v27 = vld [vmem:[%s5477_s12 + $0x140] ss:$12 sps:$4 sm:$0xff]  }
 0x12f   : > { %4292 = vmatpush3.bf16.msra.mxu0 %v4954_v28  ;;  %4447 = vmatprep.mubr.bf16.mxu0 %v4958_v29  ;;  %v5002_v28 = vld [vmem:[%s5477_s12 + $0x188] ss:$12 sps:$4 sm:$0xff]  }
 0x130   : > { %4293 = vmatprep.subr.bf16.mxu0 %v4956_v30  ;;  %1825 = vmatprep.mubr.bf16.mxu1 %v5675_v22 }
 0x133   : > { %4294 = vmatpush3.bf16.msra.mxu0 %v4957_v31 }
 0x134   : > { %4295 = vmatprep.subr.bf16.mxu0 %v4960_v32 }
 0x136   : > { %4448 = vmatmul.mubr.bf16.gmra.mrb[68].mxu0 %v4959_v33  ;;  %1826 = vmatmul.mubr.bf16.gmra.mrb[68].mxu1 %v5682_v23 }
 0x137   : > { %4296 = vmatpush3.bf16.msra.mxu0 %v4961_v34  ;;  %4451 = vmatprep.mubr.bf16.mxu0 %v4964_v35  ;;  %v5006_v35 = vld [vmem:[%s5477_s12 + $0x68] ss:$12 sps:$4 sm:$0xff]  }
 0x138   : > { %4297 = vmatprep.subr.bf16.mxu0 %v4962_v36  ;;  %1833 = vmatprep.mubr.bf16.mxu1 %v5685_v24 }
 0x13b   : > { %4298 = vmatpush3.bf16.msra.mxu0 %v4963_v37 }
 0x13c   : > { %4299 = vmatprep.subr.bf16.mxu0 %v4966_v38  ;;  %v5007_v38 = vld [vmem:[%s5477_s12 + $0x80] ss:$12 sps:$4 sm:$0xff]  }
 0x13e   : > { %4452 = vmatmul.mubr.bf16.gmra.mrb[72].mxu0 %v4965_v40  ;;  %1834 = vmatmul.mubr.bf16.gmra.mrb[72].mxu1 %v5692_v25 }
 0x13f   : > { %4300 = vmatpush3.bf16.msra.mxu0 %v4967_v41  ;;  %4455 = vmatprep.mubr.bf16.mxu0 %v4971_v43  ;;  %v5008_v43 = vld [vmem:[%s5477_s12 + $0x98] ss:$12 sps:$4 sm:$0xff]  }
 0x140   : > { %4301 = vmatprep.subr.bf16.mxu0 %v4969_v44  ;;  %1841 = vmatprep.mubr.bf16.mxu1 %v5709_v45 }
 0x143   : > { %4302 = vmatpush3.bf16.msra.mxu0 %v4970_v46 }
 0x144   : > { %4303 = vmatprep.subr.bf16.mxu0 %v4976_v48  ;;  %v5009_v48 = vld [vmem:[%s5477_s12 + $0xb0] ss:$12 sps:$4 sm:$0xff]  }
 0x146   : > { %4456 = vmatmul.mubr.bf16.gmra.mrb[76].mxu0 %v4974_v49  ;;  %1842 = vmatmul.mubr.bf16.gmra.mrb[76].mxu1 %v5715_v50 }
 0x147   : > { %4304 = vmatpush3.bf16.msra.mxu0 %v4977_v52  ;;  %4491 = vmatprep.mubr.bf16.mxu1 %v4980_v53  ;;  %v5010_v53 = vld [vmem:[%s5477_s12 + $0xc8] ss:$12 sps:$4 sm:$0xff]  }
 0x148   : > { %4305 = vmatprep.subr.bf16.mxu0 %v4978_v55  ;;  %2656 = vmatprep.mubr.bf16.mxu0 %v5540_v39  ;;  %v4991_v39 = vld [vmem:[#allocation6 + $0x218] sm:$0xff]  }
 0x14b   : > { %4306 = vmatpush3.bf16.msra.mxu0 %v4979_v56 }
 0x14e   : > { %4492 = vmatmul.mubr.bf16.vlgmr.msra.gmra.mrb[80].mxu1 %v4981_v57  ;;  %2657 = vmatmul.mubr.bf16.vlgmr.msra.gmra.mrb[80].mxu0 %v5548_v42  ;;  %v4994_v42 = vld [vmem:[#allocation6 + $0x220] sm:$0xff]  }
 0x14f   : > { %4524 = vmatpush3.bf16.msra.mxu1 %v5634_v14  ;;  %4495 = vmatprep.mubr.bf16.mxu1 %v4983_v60  ;;  %v5003_v14 = vld [vmem:[#allocation6 + $0x238] sm:$0xff]  }
 0x150   : > { %2664 = vmatprep.mubr.bf16.mxu0 %v5554_v47  ;;  %4525 = vmatprep.subr.bf16.mxu1 %v4985_v61  ;;  %v4987_v47 = vld [vmem:[%s5477_s12 + $0x98] ss:$12 sps:$4 sm:$0xff]  }
 0x153   : > { %4526 = vmatpush3.bf16.msra.mxu1 %v4985_v61  ;;  %v5011_v61 = vld [vmem:[%s5477_s12 + $0xe0] ss:$12 sps:$4 sm:$0xff]  }
 0x154   : > { %4527 = vmatprep.subr.bf16.mxu1 %v4988_v0 }
 0x156   : > { %4496 = vmatmul.mubr.bf16.gmra.mrb[84].mxu1 %v4984_v1  ;;  %2665 = vmatmul.mubr.bf16.gmra.mrb[84].mxu0 %v5561_v51  ;;  %v5000_v51 = vld [vmem:[#allocation6 + $0x230] sm:$0xff]  }
 0x157   : > { %4499 = vmatprep.mubr.bf16.mxu1 %v4986_v2  ;;  %2672 = vmatprep.mubr.bf16.mxu0 %v5567_v54  ;;  %v4990_v54 = vld [vmem:[%s5477_s12 + $0xc8] ss:$12 sps:$4 sm:$0xff]  }
 0x158   : > { %4528 = vmatpush3.bf16.msra.mxu1 %v4988_v0 }
 0x159   : > { %4529 = vmatprep.subr.bf16.mxu1 %v4991_v39 }
 0x15c   : > { %4530 = vmatpush3.bf16.msra.mxu1 %v4991_v39 }
 0x15d   : > { %4531 = vmatprep.subr.bf16.mxu1 %v4994_v42 }
 0x15e   : > { %4500 = vmatmul.mubr.bf16.gmra.mrb[88].mxu1 %v4987_v47  ;;  %2673 = vmatmul.mubr.bf16.gmra.mrb[88].mxu0 %v5575_v58  ;;  %v4993_v58 = vld [vmem:[%s5477_s12 + $0xf8] ss:$12 sps:$4 sm:$0xff]  }
 0x15f   : > { %4503 = vmatprep.mubr.bf16.mxu1 %v4989_v5  ;;  %2680 = vmatprep.mubr.bf16.mxu0 %v5579_v59  ;;  %v4995_v59 = vld [vmem:[%s5477_s12 + $0x110] ss:$12 sps:$4 sm:$0xff]  }
 0x160   : > { %4532 = vmatpush3.bf16.msra.mxu1 %v4994_v42  ;;  %v5012_v42 = vld [vmem:[%s5477_s12 + $0xf8] ss:$12 sps:$4 sm:$0xff]  }
 0x161   : > { %4533 = vmatprep.subr.bf16.mxu1 %v4997_v6 }
 0x164   : > { %4534 = vmatpush3.bf16.msra.mxu1 %v4997_v6 }
 0x165   : > { %4535 = vmatprep.subr.bf16.mxu1 %v5000_v51 }
 0x166   : > { %4504 = vmatmul.mubr.bf16.gmra.mrb[92].mxu1 %v4990_v54  ;;  %2681 = vmatmul.mubr.bf16.gmra.mrb[92].mxu0 %v5588_v62  ;;  %v4999_v62 = vld [vmem:[%s5477_s12 + $0x158] ss:$12 sps:$4 sm:$0xff]  }
 0x167   : > { %4507 = vmatprep.mubr.bf16.mxu1 %v4992_v9  ;;  %2688 = vmatprep.mubr.bf16.mxu0 %v5592_v63  ;;  %v5001_v63 = vld [vmem:[%s5477_s12 + $0x170] ss:$12 sps:$4 sm:$0xff]  }
 0x168   : > { %4536 = vmatpush3.bf16.msra.mxu1 %v5000_v51 }
 0x169   : > { %4537 = vmatprep.subr.bf16.mxu1 %v5003_v14 }
 0x16c   : > { %4538 = vmatpush3.bf16.msra.mxu1 %v5003_v14  ;;  %v5013_v14 = vld [vmem:[%s5477_s12 + $0x110] ss:$12 sps:$4 sm:$0xff]  }
 0x16e   : > { %4508 = vmatmul.mubr.bf16.gmra.mrb[0].mxu1 %v4993_v58  ;;  %2689 = vmatmul.mubr.bf16.gmra.mrb[96].mxu0 %v5599_v3 }
 0x16f   : > { %4511 = vmatprep.mubr.bf16.mxu1 %v4995_v59  ;;  %2696 = vmatprep.mubr.bf16.mxu0 %v5602_v4 }
 0x176   : > { %4512 = vmatmul.mubr.bf16.gmra.mrb[4].mxu1 %v4996_v26  ;;  %2697 = vmatmul.mubr.bf16.gmra.mrb[100].mxu0 %v5609_v7  ;;  %v5004_v7 = vld [vmem:[%s5477_s12 + $0x38] ss:$12 sps:$4 sm:$0xff]  }
 0x177   : > { %4515 = vmatprep.mubr.bf16.mxu1 %v4998_v27  ;;  %2704 = vmatprep.mubr.bf16.mxu0 %v5612_v8 }
 0x17e   : > { %4516 = vmatmul.mubr.bf16.gmra.mrb[8].mxu1 %v4999_v62  ;;  %2705 = vmatmul.mubr.bf16.gmra.mrb[104].mxu0 %v5619_v10  ;;  %v5014_v62 = vld [vmem:[%s5477_s12 + $0x128] ss:$12 sps:$4 sm:$0xff]  }
 0x17f   : > { %4519 = vmatprep.mubr.bf16.mxu1 %v5001_v63  ;;  %2712 = vmatprep.mubr.bf16.mxu0 %v5622_v11  ;;  %v5005_v11 = vld [vmem:[%s5477_s12 + $0x50] ss:$12 sps:$4 sm:$0xff]  }
 0x181   : > { %v4035_v3 = vpop.f32.mrb[0].mxu0 }
 0x182   : > { %v4036_v4 = vpop.f32.mrb[1].mxu0 }
 0x183   : > { %v5750_v29 = vadd.f32 %v4036_v4, %v4035_v3  ;;  %v4038_v30 = vpop.f32.mrb[2].mxu0 }
 0x184   : > { %v4039_v31 = vpop.f32.mrb[3].mxu0 }
 0x185   : > { %v5753_v32 = vadd.f32 %v4039_v31, %v4038_v30  ;;  %v5015_v31 = vld [vmem:[%s5477_s12 + $0x140] ss:$12 sps:$4 sm:$0xff]  }
 0x186   : > { %4520 = vmatmul.mubr.bf16.gmra.mrb[12].mxu1 %v5002_v28  ;;  %2713 = vmatmul.mubr.bf16.gmra.mrb[108].mxu0 %v5629_v12 }
 0x187   : > { %2720 = vmatprep.mubr.bf16.mxu0 %v5632_v13  ;;  %4539 = vmatprep.mubr.bf16.mxu1 %v5004_v7 }
 0x189   : > { %v4041_v8 = vpop.f32.mrb[4].mxu0 }
 0x18a   : > { %v4042_v10 = vpop.f32.mrb[5].mxu0 }
 0x18b   : > { %v5758_v33 = vadd.f32 %v4042_v10, %v4041_v8  ;;  %v4044_v34 = vpop.f32.mrb[6].mxu0 }
 0x18c   : > { %v4045_v36 = vpop.f32.mrb[7].mxu0 }
 0x18d   : > { %v5761_v37 = vadd.f32 %v4045_v36, %v4044_v34 }
 0x18e   : > { %2721 = vmatmul.mubr.bf16.gmra.mrb[112].mxu0 %v5642_v15  ;;  %4540 = vmatmul.mubr.bf16.vlgmr.msra.gmra.mrb[80].mxu1 %v5005_v11 }
 0x18f   : > { %2728 = vmatprep.mubr.bf16.mxu0 %v5645_v16  ;;  %4543 = vmatprep.mubr.bf16.mxu1 %v5006_v35  ;;  %v5016_v35 = vld [vmem:[%s5477_s12 + $0x158] ss:$12 sps:$4 sm:$0xff]  }
 0x191   : > { %v4047_v12 = vpop.f32.mrb[8].mxu0 }
 0x192   : > { %v4048_v13 = vpop.f32.mrb[9].mxu0 }
 0x193   : > { %v5766_v40 = vadd.f32 %v4048_v13, %v4047_v12  ;;  %v4050_v41 = vpop.f32.mrb[10].mxu0 }
 0x194   : > { %v4051_v44 = vpop.f32.mrb[11].mxu0 }
 0x195   : > { %v5769_v46 = vadd.f32 %v4051_v44, %v4050_v41  ;;  %v5017_v44 = vld [vmem:[%s5477_s12 + $0x170] ss:$12 sps:$4 sm:$0xff]  }
 0x196   : > { %2729 = vmatmul.mubr.bf16.gmra.mrb[116].mxu0 %v5652_v17  ;;  %4544 = vmatmul.mubr.bf16.gmra.mrb[84].mxu1 %v5007_v38 }
 0x197   : > { %2736 = vmatprep.mubr.bf16.mxu0 %v5655_v18  ;;  %4547 = vmatprep.mubr.bf16.mxu1 %v5008_v43 }
 0x199   : > { %v4053_v15 = vpop.f32.mrb[12].mxu0 }
 0x19a   : > { %v4054_v16 = vpop.f32.mrb[13].mxu0 }
 0x19b   : > { %v5774_v49 = vadd.f32 %v4054_v16, %v4053_v15  ;;  %v4056_v52 = vpop.f32.mrb[14].mxu0 }
 0x19c   : > { %v4057_v55 = vpop.f32.mrb[15].mxu0 }
 0x19d   : > { %v5777_v56 = vadd.f32 %v4057_v55, %v4056_v52  ;;  %v5020_v55 = vld [vmem:[%s5477_s12 + $0x188] ss:$12 sps:$4 sm:$0xff]  }
 0x19e   : > { %2737 = vmatmul.mubr.bf16.gmra.mrb[120].mxu0 %v5662_v19  ;;  %4548 = vmatmul.mubr.bf16.gmra.mrb[88].mxu1 %v5009_v48 }
 0x19f   : > { %2744 = vmatprep.mubr.bf16.mxu0 %v5665_v20  ;;  %4551 = vmatprep.mubr.bf16.mxu1 %v5010_v53  ;;  %v5018_v53 = vld [vmem:[%s5477_s12 + $0x19c] ss:$12 sps:$4 sm:$0xff]  }
 0x1a1   : > { %v4059_v17 = vpop.f32.mrb[16].mxu0  ;;  %v4171_v18 = vpop.f32.mrb[16].mxu1 }
 0x1a2   : > { %v4060_v57 = vpop.f32.mrb[17].mxu0  ;;  %v4172_v60 = vpop.f32.mrb[17].mxu1 }
 0x1a3   : > { %v5782_v0 = vadd.f32 %v4060_v57, %v4059_v17  ;;  %v4062_v1 = vpop.f32.mrb[18].mxu0  ;;  %v5784_v2 = vadd.f32 %v4172_v60, %v4171_v18  ;;  %v4174_v39 = vpop.f32.mrb[18].mxu1 }
 0x1a4   : > { %v4063_v47 = vpop.f32.mrb[19].mxu0  ;;  %v4175_v5 = vpop.f32.mrb[19].mxu1 }
 0x1a5   : > { %v5787_v19 = vadd.f32 %v4063_v47, %v4062_v1  ;;  %v5789_v20 = vadd.f32 %v4175_v5, %v4174_v39  ;;  %v5021_v39 = vld [vmem:[%s5477_s12 + $0x198] ss:$12 sps:$4 sm:$0xff]  }
 0x1a6   : > { %2745 = vmatmul.mubr.bf16.gmra.mrb[124].mxu0 %v5672_v21  ;;  %4552 = vmatmul.mubr.bf16.gmra.mrb[92].mxu1 %v5011_v61 }
 0x1a7   : > { %2752 = vmatprep.mubr.bf16.mxu0 %v5675_v22  ;;  %4555 = vmatprep.mubr.bf16.mxu1 %v5012_v42  ;;  %v5022_v42 = vld [vmem:[%s5477_s12 + $0x1a0] ss:$12 sps:$4 sm:$0xff]  }
 0x1a9   : > { %v4065_v6 = vpop.f32.mrb[20].mxu0  ;;  %v4177_v51 = vpop.f32.mrb[20].mxu1 }
 0x1aa   : > { %v4066_v54 = vpop.f32.mrb[21].mxu0  ;;  %v4178_v9 = vpop.f32.mrb[21].mxu1 }
 0x1ab   : > { %v5794_v58 = vadd.f32 %v4066_v54, %v4065_v6  ;;  %v4068_v59 = vpop.f32.mrb[22].mxu0  ;;  %v5796_v26 = vadd.f32 %v4178_v9, %v4177_v51  ;;  %v4180_v27 = vpop.f32.mrb[22].mxu1 }
 0x1ac   : > { %v4069_v63 = vpop.f32.mrb[23].mxu0  ;;  %v4181_v3 = vpop.f32.mrb[23].mxu1 }
 0x1ad   : > { %v5799_v21 = vadd.f32 %v4069_v63, %v4068_v59  ;;  %v5801_v22 = vadd.f32 %v4181_v3, %v4180_v27 }
 0x1ae   : > { %2753 = vmatmul.mubr.bf16.gmra.mrb[128].mxu0 %v5682_v23  ;;  %4556 = vmatmul.mubr.bf16.gmra.mrb[0].mxu1 %v5013_v14 }
 0x1af   : > { %2760 = vmatprep.mubr.bf16.mxu0 %v5685_v24  ;;  %4559 = vmatprep.mubr.bf16.mxu1 %v5014_v62 }
 0x1b1   : > { %v4071_v4 = vpop.f32.mrb[24].mxu0  ;;  %v4183_v28 = vpop.f32.mrb[24].mxu1 }
 0x1b2   : > { %v4072_v30 = vpop.f32.mrb[25].mxu0  ;;  %v4184_v7 = vpop.f32.mrb[25].mxu1 }
 0x1b3   : > { %v5806_v8 = vadd.f32 %v4072_v30, %v4071_v4  ;;  %v4074_v10 = vpop.f32.mrb[26].mxu0  ;;  %v5808_v11 = vadd.f32 %v4184_v7, %v4183_v28  ;;  %v4186_v34 = vpop.f32.mrb[26].mxu1 }
 0x1b4   : > { %v4075_v36 = vpop.f32.mrb[27].mxu0  ;;  %v4187_v12 = vpop.f32.mrb[27].mxu1 }
 0x1b5   : > { %v5811_v23 = vadd.f32 %v4075_v36, %v4074_v10  ;;  %v5813_v24 = vadd.f32 %v4187_v12, %v4186_v34 }
 0x1b6   : > { %2761 = vmatmul.mubr.bf16.gmra.mrb[132].mxu0 %v5692_v25  ;;  %4560 = vmatmul.mubr.bf16.gmra.mrb[4].mxu1 %v5015_v31 }
 0x1b7   : > { %2768 = vmatprep.mubr.bf16.mxu0 %v5709_v45  ;;  %4563 = vmatprep.mubr.bf16.mxu1 %v5016_v35 }
 0x1b9   : > { %v4077_v13 = vpop.f32.mrb[28].mxu0  ;;  %v4189_v38 = vpop.f32.mrb[28].mxu1 }
 0x1ba   : > { %v4078_v41 = vpop.f32.mrb[29].mxu0  ;;  %v4190_v43 = vpop.f32.mrb[29].mxu1 }
 0x1bb   : > { %v5818_v15 = vadd.f32 %v4078_v41, %v4077_v13  ;;  %v4080_v16 = vpop.f32.mrb[30].mxu0  ;;  %v5820_v48 = vadd.f32 %v4190_v43, %v4189_v38  ;;  %v4192_v52 = vpop.f32.mrb[30].mxu1 }
 0x1bc   : > { %v4081_v25 = vpop.f32.mrb[31].mxu0  ;;  %v4193_v17 = vpop.f32.mrb[31].mxu1 }
 0x1bd   : > { %v5824_v18 = vadd.f32 %v4081_v25, %v4080_v16  ;;  %v5826_v45 = vadd.f32 %v4193_v17, %v4192_v52 }
 0x1be   : > { %2769 = vmatmul.mubr.bf16.gmra.mrb[136].mxu0 %v5715_v50  ;;  %4564 = vmatmul.mubr.bf16.gmra.mrb[8].mxu1 %v5017_v44 }
 0x1bf   : > { %2776 = vmatprep.mubr.bf16.mxu0 %v5018_v53  ;;  %4567 = vmatprep.mubr.bf16.mxu1 %v5020_v55 }
 0x1c1   : > { %v4083_v57 = vpop.f32.mrb[32].mxu0  ;;  %v4195_v60 = vpop.f32.mrb[32].mxu1 }
 0x1c2   : > { %v4084_v61 = vpop.f32.mrb[33].mxu0  ;;  %v4196_v1 = vpop.f32.mrb[33].mxu1 }
 0x1c3   : > { %v4085_v47 = vadd.f32 %v4084_v61, %v4083_v57  ;;  %v4086_v5 = vpop.f32.mrb[34].mxu0  ;;  %v5831_v6 = vadd.f32 %v4196_v1, %v4195_v60  ;;  %v4198_v51 = vpop.f32.mrb[34].mxu1 }
 0x1c4   : > { %v4087_v54 = vpop.f32.mrb[35].mxu0  ;;  %v4199_v9 = vpop.f32.mrb[35].mxu1 }
 0x1c5   : > { %v4088_v14 = vadd.f32 %v4087_v54, %v4086_v5  ;;  %v5833_v59 = vadd.f32 %v4199_v9, %v4198_v51 }
 0x1c6   : > { %2777 = vmatmul.mubr.bf16.gmra.mrb[140].mxu0 %v5021_v39  ;;  %4568 = vmatmul.mubr.bf16.gmra.mrb[12].mxu1 %v5022_v42 }
 0x1c9   : > { %v4089_v50 = vpop.f32.mrb[36].mxu0  ;;  %v4201_v27 = vpop.f32.mrb[36].mxu1 }
 0x1ca   : > { %v4090_v62 = vpop.f32.mrb[37].mxu0  ;;  %v4202_v63 = vpop.f32.mrb[37].mxu1 }
 0x1cb   : > { %v4091_v3 = vadd.f32 %v4090_v62, %v4089_v50  ;;  %v4092_v4 = vpop.f32.mrb[38].mxu0  ;;  %v5835_v28 = vadd.f32 %v4202_v63, %v4201_v27  ;;  %v4204_v30 = vpop.f32.mrb[38].mxu1 }
 0x1cc   : > { %v4093_v7 = vpop.f32.mrb[39].mxu0  ;;  %v4205_v31 = vpop.f32.mrb[39].mxu1 }
 0x1cd   : > { %v4094_v10 = vadd.f32 %v4093_v7, %v4092_v4  ;;  %v5837_v34 = vadd.f32 %v4205_v31, %v4204_v30 }
 0x1d1   : > { %v4095_v35 = vpop.f32.mrb[40].mxu0  ;;  %v4207_v36 = vpop.f32.mrb[40].mxu1 }
 0x1d2   : > { %v4096_v12 = vpop.f32.mrb[41].mxu0  ;;  %v4208_v13 = vpop.f32.mrb[41].mxu1 }
 0x1d3   : > { %v4097_v38 = vadd.f32 %v4096_v12, %v4095_v35  ;;  %v4098_v41 = vpop.f32.mrb[42].mxu0  ;;  %v5839_v43 = vadd.f32 %v4208_v13, %v4207_v36  ;;  %v4210_v44 = vpop.f32.mrb[42].mxu1 }
 0x1d4   : > { %v4099_v16 = vpop.f32.mrb[43].mxu0  ;;  %v4211_v52 = vpop.f32.mrb[43].mxu1 }
 0x1d5   : > { %v4100_v53 = vadd.f32 %v4099_v16, %v4098_v41  ;;  %v5841_v55 = vadd.f32 %v4211_v52, %v4210_v44 }
 0x1d9   : > { %v4101_v25 = vpop.f32.mrb[44].mxu0  ;;  %v4213_v17 = vpop.f32.mrb[44].mxu1 }
 0x1da   : > { %v4102_v57 = vpop.f32.mrb[45].mxu0  ;;  %v4214_v60 = vpop.f32.mrb[45].mxu1 }
 0x1db   : > { %v4103_v61 = vadd.f32 %v4102_v57, %v4101_v25  ;;  %v4104_v1 = vpop.f32.mrb[46].mxu0  ;;  %v5843_v39 = vadd.f32 %v4214_v60, %v4213_v17  ;;  %v4216_v42 = vpop.f32.mrb[46].mxu1 }
 0x1dc   : > { %v4105_v5 = vpop.f32.mrb[47].mxu0  ;;  %v4217_v51 = vpop.f32.mrb[47].mxu1 }
 0x1dd   : > { %v4106_v54 = vadd.f32 %v4105_v5, %v4104_v1  ;;  %v5845_v9 = vadd.f32 %v4217_v51, %v4216_v42 }
 0x1e1   : > { %v4107_v50 = vpop.f32.mrb[48].mxu0  ;;  %v4219_v27 = vpop.f32.mrb[48].mxu1 }
 0x1e2   : > { %v4108_v62 = vpop.f32.mrb[49].mxu0  ;;  %v4220_v63 = vpop.f32.mrb[49].mxu1 }
 0x1e3   : > { %v5847_v4 = vadd.f32 %v4108_v62, %v4107_v50  ;;  %v4221_v30 = vadd.f32 %v4220_v63, %v4219_v27  ;;  %v4110_v7 = vpop.f32.mrb[50].mxu0  ;;  %v4222_v31 = vpop.f32.mrb[50].mxu1 }
 0x1e4   : > { %v4111_v35 = vpop.f32.mrb[51].mxu0  ;;  %v4223_v36 = vpop.f32.mrb[51].mxu1 }
 0x1e5   : > { %v5849_v12 = vadd.f32 %v4221_v30, %v4085_v47  ;;  %v5851_v13 = vadd.f32 %v4111_v35, %v4110_v7  ;;  %v4224_v41 = vadd.f32 %v4223_v36, %v4222_v31 }
 0x1e7   : > { %v5853_v44 = vadd.f32 %v4224_v41, %v4088_v14 }
 0x1e9   : > { %v4113_v16 = vpop.f32.mrb[52].mxu0  ;;  %v4225_v52 = vpop.f32.mrb[52].mxu1 }
 0x1ea   : > { %v4114_v25 = vpop.f32.mrb[53].mxu0  ;;  %v4226_v17 = vpop.f32.mrb[53].mxu1 }
 0x1eb   : > { %v5855_v57 = vadd.f32 %v4114_v25, %v4113_v16  ;;  %v4227_v60 = vadd.f32 %v4226_v17, %v4225_v52  ;;  %v4116_v1 = vpop.f32.mrb[54].mxu0  ;;  %v4228_v42 = vpop.f32.mrb[54].mxu1 }
 0x1ec   : > { %v4117_v5 = vpop.f32.mrb[55].mxu0  ;;  %v4229_v51 = vpop.f32.mrb[55].mxu1 }
 0x1ed   : > { %v5857_v50 = vadd.f32 %v4227_v60, %v4091_v3  ;;  %v5859_v47 = vadd.f32 %v4117_v5, %v4116_v1  ;;  %v4230_v27 = vadd.f32 %v4229_v51, %v4228_v42 }
 0x1ef   : > { %v5861_v62 = vadd.f32 %v4230_v27, %v4094_v10 }
 0x1f1   : > { %6217 = vst [vmem:[#allocation17_spill] sm:$0xff] %v5861_v62  ;;  %v4119_v14 = vpop.f32.mrb[56].mxu0  ;;  %v4231_v63 = vpop.f32.mrb[56].mxu1 }
 0x1f2   : > { %v4120_v30 = vpop.f32.mrb[57].mxu0  ;;  %v4232_v7 = vpop.f32.mrb[57].mxu1 }
 0x1f3   : > { %v5863_v31 = vadd.f32 %v4120_v30, %v4119_v14  ;;  %v4233_v35 = vadd.f32 %v4232_v7, %v4231_v63  ;;  %v4122_v36 = vpop.f32.mrb[58].mxu0  ;;  %v4234_v41 = vpop.f32.mrb[58].mxu1 }
 0x1f4   : > { %v4123_v16 = vpop.f32.mrb[59].mxu0  ;;  %v4235_v52 = vpop.f32.mrb[59].mxu1 }
 0x1f5   : > { %v5865_v25 = vadd.f32 %v4233_v35, %v4097_v38  ;;  %v5867_v3 = vadd.f32 %v4123_v16, %v4122_v36  ;;  %v4236_v17 = vadd.f32 %v4235_v52, %v4234_v41 }
 0x1f7   : > { %v5869_v60 = vadd.f32 %v4236_v17, %v4100_v53 }
 0x1f9   : > { %6218 = vst [vmem:[#allocation18_spill] sm:$0xff] %v5869_v60  ;;  %v4125_v10 = vpop.f32.mrb[60].mxu0  ;;  %v4237_v1 = vpop.f32.mrb[60].mxu1 }
 0x1fa   : > { %v4126_v42 = vpop.f32.mrb[61].mxu0  ;;  %v4238_v5 = vpop.f32.mrb[61].mxu1 }
 0x1fb   : > { %v5871_v51 = vadd.f32 %v4126_v42, %v4125_v10  ;;  %v4239_v27 = vadd.f32 %v4238_v5, %v4237_v1  ;;  %v4128_v14 = vpop.f32.mrb[62].mxu0  ;;  %v4240_v63 = vpop.f32.mrb[62].mxu1 }
 0x1fc   : > { %v4129_v30 = vpop.f32.mrb[63].mxu0  ;;  %v4241_v7 = vpop.f32.mrb[63].mxu1 }
 0x1fd   : > { %v5873_v62 = vadd.f32 %v4239_v27, %v4103_v61  ;;  %v5875_v38 = vadd.f32 %v4129_v30, %v4128_v14  ;;  %v4242_v35 = vadd.f32 %v4241_v7, %v4240_v63 }
 0x1ff   : > { %v5877_v36 = vadd.f32 %v4242_v35, %v4106_v54 }
 0x201   : > { %v4445_v53 = vpop.f32.mrb[64].mxu0  ;;  %v4243_v41 = vpop.f32.mrb[64].mxu1 }
 0x202   : > { %v1022_v16 = vadd.f32 %v4445_v53, %v5758_v33  ;;  %v1013_v52 = vpop.f32.mrb[65].mxu0  ;;  %v4244_v17 = vpop.f32.mrb[65].mxu1 }
 0x203   : > { %v1014_v10 = vadd.f32 %v5750_v29, %v1013_v52  ;;  %v4245_v1 = vadd.f32 %v4244_v17, %v4243_v41  ;;  %v4446_v42 = vpop.f32.mrb[66].mxu0  ;;  %v4246_v5 = vpop.f32.mrb[66].mxu1 }
 0x204   : > { %v5882_v60 = vadd.f32 %v5796_v26, %v1022_v16  ;;  %v1025_v61 = vadd.f32 %v4446_v42, %v5761_v37  ;;  %v1016_v27 = vpop.f32.mrb[67].mxu0  ;;  %v4247_v14 = vpop.f32.mrb[67].mxu1 }
 0x205   : > { %v5886_v54 = vadd.f32 %v5784_v2, %v1014_v10  ;;  %v5889_v63 = vadd.f32 %v4245_v1, %v5847_v4  ;;  %v1017_v33 = vadd.f32 %v5753_v32, %v1016_v27  ;;  %v4248_v30 = vadd.f32 %v4247_v14, %v4246_v5 }
 0x206   : > { %v5893_v29 = vadd.f32 %v5801_v22, %v1025_v61 }
 0x207   : > { %v5896_v7 = vadd.f32 %v5789_v20, %v1017_v33  ;;  %v5899_v26 = vadd.f32 %v4248_v30, %v5851_v13 }
 0x209   : > { %v4449_v37 = vpop.f32.mrb[68].mxu0  ;;  %v4249_v35 = vpop.f32.mrb[68].mxu1 }
 0x20a   : > { %v1038_v2 = vadd.f32 %v4449_v37, %v5774_v49  ;;  %v1029_v53 = vpop.f32.mrb[69].mxu0  ;;  %v4250_v41 = vpop.f32.mrb[69].mxu1 }
 0x20b   : > { %v1030_v4 = vadd.f32 %v5766_v40, %v1029_v53  ;;  %v4251_v16 = vadd.f32 %v4250_v41, %v4249_v35  ;;  %v4450_v32 = vpop.f32.mrb[70].mxu0  ;;  %v4252_v52 = vpop.f32.mrb[70].mxu1 }
 0x20c   : > { %v5904_v22 = vadd.f32 %v5820_v48, %v1038_v2  ;;  %v1041_v20 = vadd.f32 %v4450_v32, %v5777_v56  ;;  %v1032_v17 = vpop.f32.mrb[71].mxu0  ;;  %v4253_v10 = vpop.f32.mrb[71].mxu1 }
 0x20d   : > { %v5908_v13 = vadd.f32 %v5808_v11, %v1030_v4  ;;  %v5911_v1 = vadd.f32 %v4251_v16, %v5855_v57  ;;  %v1033_v49 = vadd.f32 %v5769_v46, %v1032_v17  ;;  %v4254_v42 = vadd.f32 %v4253_v10, %v4252_v52 }
 0x20e   : > { %v5915_v40 = vadd.f32 %v5826_v45, %v1041_v20 }
 0x20f   : > { %v5918_v5 = vadd.f32 %v5813_v24, %v1033_v49  ;;  %v5921_v48 = vadd.f32 %v4254_v42, %v5859_v47 }
 0x211   : > { %v4453_v56 = vpop.f32.mrb[72].mxu0  ;;  %v4255_v61 = vpop.f32.mrb[72].mxu1 }
 0x212   : > { %v1054_v11 = vadd.f32 %v4453_v56, %v5794_v58  ;;  %v1045_v27 = vpop.f32.mrb[73].mxu0  ;;  %v4256_v14 = vpop.f32.mrb[73].mxu1 }
 0x213   : > { %v1046_v57 = vadd.f32 %v5782_v0, %v1045_v27  ;;  %v4257_v33 = vadd.f32 %v4256_v14, %v4255_v61  ;;  %v4454_v46 = vpop.f32.mrb[74].mxu0  ;;  %v4258_v30 = vpop.f32.mrb[74].mxu1 }
 0x214   : > { %v5926_v45 = vadd.f32 %v5835_v28, %v1054_v11  ;;  %v1057_v24 = vadd.f32 %v4454_v46, %v5799_v21  ;;  %v1048_v37 = vpop.f32.mrb[75].mxu0  ;;  %v4259_v35 = vpop.f32.mrb[75].mxu1 }
 0x215   : > { %v5930_v47 = vadd.f32 %v5831_v6, %v1046_v57  ;;  %v5933_v2 = vadd.f32 %v4257_v33, %v5863_v31  ;;  %v1049_v58 = vadd.f32 %v5787_v19, %v1048_v37  ;;  %v4260_v53 = vadd.f32 %v4259_v35, %v4258_v30 }
 0x216   : > { %v5937_v0 = vadd.f32 %v5837_v34, %v1057_v24 }
 0x217   : > { %v4632_v41 = vadd.f32 %v5833_v59, %v1049_v58  ;;  %v5941_v28 = vadd.f32 %v4260_v53, %v5867_v3 }
 0x219   : > { %v4457_v21 = vpop.f32.mrb[76].mxu0  ;;  %v4261_v4 = vpop.f32.mrb[76].mxu1 }
 0x21a   : > { %v1070_v16 = vadd.f32 %v4457_v21, %v5818_v15  ;;  %v1061_v6 = vpop.f32.mrb[77].mxu0  ;;  %v4262_v32 = vpop.f32.mrb[77].mxu1 }
 0x21b   : > { %v1062_v31 = vadd.f32 %v5806_v8, %v1061_v6  ;;  %v4263_v52 = vadd.f32 %v4262_v32, %v4261_v4  ;;  %v4458_v20 = vpop.f32.mrb[78].mxu0  ;;  %v4264_v19 = vpop.f32.mrb[78].mxu1 }
 0x21c   : > { %v5946_v17 = vadd.f32 %v5843_v39, %v1070_v16  ;;  %v1073_v34 = vadd.f32 %v4458_v20, %v5824_v18  ;;  %v1064_v59 = vpop.f32.mrb[79].mxu0  ;;  %v4265_v10 = vpop.f32.mrb[79].mxu1 }
 0x21d   : > { %v4640_v3 = vadd.f32 %v5839_v43, %v1062_v31  ;;  %v5951_v49 = vadd.f32 %v4263_v52, %v5871_v51  ;;  %v1065_v15 = vadd.f32 %v5811_v23, %v1064_v59  ;;  %v4266_v42 = vadd.f32 %v4265_v10, %v4264_v19 }
 0x21e   : > { %v5955_v8 = vadd.f32 %v5845_v9, %v1073_v34 }
 0x21f   : > { %v4648_v56 = vadd.f32 %v5841_v55, %v1065_v15  ;;  %v5959_v39 = vadd.f32 %v4266_v42, %v5875_v38 }
 0x221   : > { %v4307_v61 = vpop.f32.mrb[80].mxu0 }
 0x222   : > { %v4308_v18 = vpop.f32.mrb[81].mxu0 }
 0x223   : > { %v4309_v11 = vadd.f32 %v4308_v18, %v4307_v61  ;;  %v4310_v27 = vpop.f32.mrb[82].mxu0 }
 0x224   : > { %v4311_v14 = vpop.f32.mrb[83].mxu0 }
 0x225   : > { %v4312_v43 = vadd.f32 %v4311_v14, %v4310_v27  ;;  %v5962_v51 = vadd.f32 %v5886_v54, %v4309_v11 }
 0x227   : > { %v5965_v23 = vadd.f32 %v5896_v7, %v4312_v43 }
 0x229   : > { %v4313_v57 = vpop.f32.mrb[84].mxu0 }
 0x22a   : > { %v4314_v9 = vpop.f32.mrb[85].mxu0 }
 0x22b   : > { %v4315_v33 = vadd.f32 %v4314_v9, %v4313_v57  ;;  %v4316_v46 = vpop.f32.mrb[86].mxu0 }
 0x22c   : > { %v4317_v55 = vpop.f32.mrb[87].mxu0 }
 0x22d   : > { %v4318_v30 = vadd.f32 %v4317_v55, %v4316_v46  ;;  %v4589_v38 = vadd.f32 %v5882_v60, %v4315_v33 }
 0x22f   : > { %v4597_v24 = vadd.f32 %v5893_v29, %v4318_v30 }
 0x231   : > { %v4319_v37 = vpop.f32.mrb[88].mxu0 }
 0x232   : > { %v4320_v35 = vpop.f32.mrb[89].mxu0 }
 0x233   : > { %v4321_v58 = vadd.f32 %v4320_v35, %v4319_v37  ;;  %v4322_v53 = vpop.f32.mrb[90].mxu0 }
 0x234   : > { %v4323_v21 = vpop.f32.mrb[91].mxu0 }
 0x235   : > { %v4324_v54 = vadd.f32 %v4323_v21, %v4322_v53  ;;  %v5970_v4 = vadd.f32 %v5908_v13, %v4321_v58 }
 0x237   : > { %v5973_v7 = vadd.f32 %v5918_v5, %v4324_v54 }
 0x239   : > { %v4325_v16 = vpop.f32.mrb[92].mxu0 }
 0x23a   : > { %v4326_v6 = vpop.f32.mrb[93].mxu0 }
 0x23b   : > { %v4327_v32 = vadd.f32 %v4326_v6, %v4325_v16  ;;  %v4328_v31 = vpop.f32.mrb[94].mxu0 }
 0x23c   : > { %v4329_v52 = vpop.f32.mrb[95].mxu0 }
 0x23d   : > { %v4330_v60 = vadd.f32 %v4329_v52, %v4328_v31  ;;  %v5976_v29 = vadd.f32 %v5904_v22, %v4327_v32  ;;  %v6002_v32 = vld [vmem:[#allocation8] ss:$0 sm:$0xff]  ;;  %v6004_v52 = vld [vmem:[#allocation9] ss:$0 sm:$0xff] }
 0x23f   : > { %v5979_v20 = vadd.f32 %v5915_v40, %v4330_v60 }
 0x241   : > { %v4331_v19 = vpop.f32.mrb[96].mxu0 }
 0x242   : > { %v4332_v34 = vpop.f32.mrb[97].mxu0 }
 0x243   : > { %v4333_v59 = vadd.f32 %v4332_v34, %v4331_v19  ;;  %v4334_v13 = vpop.f32.mrb[98].mxu0 }
 0x244   : > { %v4335_v10 = vpop.f32.mrb[99].mxu0 }
 0x245   : > { %v4336_v15 = vadd.f32 %v4335_v10, %v4334_v13  ;;  %v5982_v5 = vadd.f32 %v5930_v47, %v4333_v59 }
 0x247   : > { %v5984_v42 = vadd.f32 %v4632_v41, %v4336_v15 }
 0x249   : > { %v4337_v61 = vpop.f32.mrb[100].mxu0 }
 0x24a   : > { %v4338_v18 = vpop.f32.mrb[101].mxu0 }
 0x24b   : > { %v4339_v11 = vadd.f32 %v4338_v18, %v4337_v61  ;;  %v4340_v27 = vpop.f32.mrb[102].mxu0 }
 0x24c   : > { %v4341_v22 = vpop.f32.mrb[103].mxu0 }
 0x24d   : > { %v4342_v14 = vadd.f32 %v4341_v22, %v4340_v27  ;;  %v5987_v40 = vadd.f32 %v5926_v45, %v4339_v11 }
 0x24f   : > { %v5990_v43 = vadd.f32 %v5937_v0, %v4342_v14 }
 0x251   : > { %v4343_v57 = vpop.f32.mrb[104].mxu0 }
 0x252   : > { %v4344_v9 = vpop.f32.mrb[105].mxu0 }
 0x253   : > { %v4345_v33 = vadd.f32 %v4344_v9, %v4343_v57  ;;  %v4346_v46 = vpop.f32.mrb[106].mxu0 }
 0x254   : > { %v4347_v47 = vpop.f32.mrb[107].mxu0 }
 0x255   : > { %v4348_v55 = vadd.f32 %v4347_v47, %v4346_v46  ;;  %v5992_v41 = vadd.f32 %v4640_v3, %v4345_v33 }
 0x257   : > { %v5994_v30 = vadd.f32 %v4648_v56, %v4348_v55 }
 0x259   : > { %v4349_v37 = vpop.f32.mrb[108].mxu0 }
 0x25a   : > { %v4350_v35 = vpop.f32.mrb[109].mxu0 }
 0x25b   : > { %v4351_v58 = vadd.f32 %v4350_v35, %v4349_v37  ;;  %v4352_v53 = vpop.f32.mrb[110].mxu0 }
 0x25c   : > { %v4353_v21 = vpop.f32.mrb[111].mxu0 }
 0x25d   : > { %v4354_v45 = vadd.f32 %v4353_v21, %v4352_v53  ;;  %v5997_v54 = vadd.f32 %v5946_v17, %v4351_v58 }
 0x25f   : > { %v6000_v0 = vadd.f32 %v5955_v8, %v4354_v45 }
 0x261   : > { %v4355_v16 = vpop.f32.mrb[112].mxu0  ;;  %v4541_v6 = vpop.f32.mrb[80].mxu1 }
 0x262   : > { %v4590_v3 = vadd.f32 %v4589_v38, %v4541_v6  ;;  %v4356_v31 = vpop.f32.mrb[113].mxu0  ;;  %v2819_v56 = vpop.f32.mrb[81].mxu1 }
 0x263   : > { %v4357_v60 = vadd.f32 %v4356_v31, %v4355_v16  ;;  %v4594_v19 = vadd.f32 %v5962_v51, %v2819_v56  ;;  %v4358_v34 = vpop.f32.mrb[114].mxu0  ;;  %v4542_v59 = vpop.f32.mrb[82].mxu1 }
 0x264   : > { %v3083_v17 = vmul.f32 %v4590_v3, %v6002_v32  ;;  %v4598_v13 = vadd.f32 %v4597_v24, %v4542_v59  ;;  %v4359_v8 = vpop.f32.mrb[115].mxu0  ;;  %v2822_v10 = vpop.f32.mrb[83].mxu1 }
 0x265   : > { %v3081_v15 = vmul.f32 %v4594_v19, %v6002_v32  ;;  %v4360_v61 = vadd.f32 %v4359_v8, %v4358_v34  ;;  %v4602_v38 = vadd.f32 %v5965_v23, %v2822_v10  ;;  %v6011_v18 = vadd.f32 %v5849_v12, %v4357_v60 }
 0x266   : > { %v3122_v11 = vadd.f32 %v6004_v52, %v3083_v17  ;;  %v3084_v51 = vmul.f32 %v4598_v13, %v6002_v32  ;;  %v6219_v13 = vld [vmem:[#allocation17_spill] sm:$0xff] }
 0x267   : > { %v3120_v27 = vadd.f32 %v6004_v52, %v3081_v15  ;;  %v3082_v22 = vmul.f32 %v4602_v38, %v6002_v32  ;;  %v6018_v24 = vadd.f32 %v5853_v44, %v4360_v61 }
 0x268   : > { %v3123_v14 = vadd.f32 %v6004_v52, %v3084_v51  ;;  %v3154_v12 = vmax.f32 %v3122_v11, 0.0 }
 0x269   : > { %v3121_v57 = vadd.f32 %v6004_v52, %v3082_v22  ;;  %v4361_v23 = vpop.f32.mrb[116].mxu0  ;;  %v4545_v9 = vpop.f32.mrb[84].mxu1  ;;  %v3152_v37 = vmax.f32 %v3120_v27, 0.0 }
 0x26a   : > { %v3155_v33 = vmax.f32 %v3123_v14, 0.0  ;;  %v4606_v46 = vadd.f32 %v5976_v29, %v4545_v9  ;;  %v4362_v47 = vpop.f32.mrb[117].mxu0  ;;  %v2835_v55 = vpop.f32.mrb[85].mxu1 }
 0x26b   : > { %v3153_v35 = vmax.f32 %v3121_v57, 0.0  ;;  %v4363_v58 = vadd.f32 %v4362_v47, %v4361_v23  ;;  %v4610_v53 = vadd.f32 %v5970_v4, %v2835_v55  ;;  %v4364_v44 = vpop.f32.mrb[118].mxu0  ;;  %v4546_v21 = vpop.f32.mrb[86].mxu1 }
 0x26c   : > { %v3932_v45 = vpack.c.bf16 %v3155_v33, %v3154_v12  ;;  %v3087_v16 = vmul.f32 %v4606_v46, %v6002_v32  ;;  %v4614_v6 = vadd.f32 %v5979_v20, %v4546_v21  ;;  %v4365_v3 = vpop.f32.mrb[119].mxu0  ;;  %v2838_v31 = vpop.f32.mrb[87].mxu1 }
 0x26d   : > { %v3927_v56 = vpack.c.bf16 %v3153_v35, %v3152_v37  ;;  %v3085_v60 = vmul.f32 %v4610_v53, %v6002_v32  ;;  %v4366_v29 = vadd.f32 %v4365_v3, %v4364_v44  ;;  %v4618_v19 = vadd.f32 %v5973_v7, %v2838_v31 }
 0x26e   : > { %4004 = vst [vmem:[%s6029_s25 + $0x8] sm:$0xff] %v3932_v45   ;;  %v3126_v4 = vadd.f32 %v6004_v52, %v3087_v16  ;;  %v3088_v34 = vmul.f32 %v4614_v6, %v6002_v32  ;;  %v6035_v59 = vadd.f32 %v5857_v50, %v4363_v58  ;;  %v6220_v16 = vld [vmem:[#allocation18_spill] sm:$0xff] }
 0x26f   : > { %3928 = vst [vmem:[%s6029_s25] sm:$0xff] %v3927_v56   ;;  %v3124_v20 = vadd.f32 %v6004_v52, %v3085_v60  ;;  %v3086_v17 = vmul.f32 %v4618_v19, %v6002_v32  ;;  %v6041_v8 = vadd.f32 %v6219_v13, %v4366_v29 }
 0x270   : > { %v3127_v7 = vadd.f32 %v6004_v52, %v3088_v34  ;;  %v3158_v38 = vmax.f32 %v3126_v4, 0.0 }
 0x271   : > { %v3125_v10 = vadd.f32 %v6004_v52, %v3086_v17  ;;  %v4367_v15 = vpop.f32.mrb[120].mxu0  ;;  %v4549_v61 = vpop.f32.mrb[88].mxu1  ;;  %v3156_v22 = vmax.f32 %v3124_v20, 0.0 }
 0x272   : > { %v3159_v11 = vmax.f32 %v3127_v7, 0.0  ;;  %v4622_v51 = vadd.f32 %v5987_v40, %v4549_v61  ;;  %v4368_v50 = vpop.f32.mrb[121].mxu0  ;;  %v2851_v27 = vpop.f32.mrb[89].mxu1 }
 0x273   : > { %v3157_v14 = vmax.f32 %v3125_v10, 0.0  ;;  %v4369_v57 = vadd.f32 %v4368_v50, %v4367_v15  ;;  %v4626_v23 = vadd.f32 %v5982_v5, %v2851_v27  ;;  %v4370_v9 = vpop.f32.mrb[122].mxu0  ;;  %v4550_v12 = vpop.f32.mrb[90].mxu1 }
 0x274   : > { %v3942_v33 = vpack.c.bf16 %v3159_v11, %v3158_v38  ;;  %v3091_v46 = vmul.f32 %v4622_v51, %v6002_v32  ;;  %v4630_v47 = vadd.f32 %v5990_v43, %v4550_v12  ;;  %v4371_v55 = vpop.f32.mrb[123].mxu0  ;;  %v2854_v37 = vpop.f32.mrb[91].mxu1 }
 0x275   : > { %v3937_v35 = vpack.c.bf16 %v3157_v14, %v3156_v22  ;;  %v3089_v40 = vmul.f32 %v4626_v23, %v6002_v32  ;;  %v4372_v58 = vadd.f32 %v4371_v55, %v4370_v9  ;;  %v4634_v53 = vadd.f32 %v5984_v42, %v2854_v37 }
 0x276   : > { %4006 = vst [vmem:[%s6029_s25 + $0x18] sm:$0xff] %v3942_v33   ;;  %v3130_v44 = vadd.f32 %v6004_v52, %v3091_v46  ;;  %v3092_v5 = vmul.f32 %v4630_v47, %v6002_v32  ;;  %v6055_v21 = vadd.f32 %v5865_v25, %v4369_v57 }
 0x277   : > { %4005 = vst [vmem:[%s6029_s25 + $0x10] sm:$0xff] %v3937_v35   ;;  %v3128_v45 = vadd.f32 %v6004_v52, %v3089_v40  ;;  %v3090_v43 = vmul.f32 %v4634_v53, %v6002_v32  ;;  %v6061_v6 = vadd.f32 %v6220_v16, %v4372_v58 }
 0x278   : > { %v3131_v3 = vadd.f32 %v6004_v52, %v3092_v5  ;;  %v3162_v60 = vmax.f32 %v3130_v44, 0.0 }
 0x279   : > { %v3129_v42 = vadd.f32 %v6004_v52, %v3090_v43  ;;  %v4373_v31 = vpop.f32.mrb[124].mxu0  ;;  %v4553_v56 = vpop.f32.mrb[92].mxu1  ;;  %v3160_v34 = vmax.f32 %v3128_v45, 0.0 }
 0x27a   : > { %v3163_v29 = vmax.f32 %v3131_v3, 0.0  ;;  %v4638_v19 = vadd.f32 %v5997_v54, %v4553_v56  ;;  %v4374_v25 = vpop.f32.mrb[125].mxu0  ;;  %v2867_v4 = vpop.f32.mrb[93].mxu1 }
 0x27b   : > { %v3161_v20 = vmax.f32 %v3129_v42, 0.0  ;;  %v4375_v17 = vadd.f32 %v4374_v25, %v4373_v31  ;;  %v4642_v13 = vadd.f32 %v5992_v41, %v2867_v4  ;;  %v4376_v7 = vpop.f32.mrb[126].mxu0  ;;  %v4554_v10 = vpop.f32.mrb[94].mxu1 }
 0x27c   : > { %v3952_v15 = vpack.c.bf16 %v3163_v29, %v3162_v60  ;;  %v3095_v61 = vmul.f32 %v4638_v19, %v6002_v32  ;;  %v4646_v38 = vadd.f32 %v6000_v0, %v4554_v10  ;;  %v4377_v11 = vpop.f32.mrb[127].mxu0  ;;  %v2870_v51 = vpop.f32.mrb[95].mxu1 }
 0x27d   : > { %v3947_v50 = vpack.c.bf16 %v3161_v20, %v3160_v34  ;;  %v3093_v54 = vmul.f32 %v4642_v13, %v6002_v32  ;;  %v4378_v27 = vadd.f32 %v4377_v11, %v4376_v7  ;;  %v4650_v22 = vadd.f32 %v5994_v30, %v2870_v51 }
 0x27e   : > { %4008 = vst [vmem:[%s6029_s25 + $0x28] sm:$0xff] %v3952_v15   ;;  %v3134_v14 = vadd.f32 %v6004_v52, %v3095_v61  ;;  %v3096_v41 = vmul.f32 %v4646_v38, %v6002_v32  ;;  %v4664_v57 = vadd.f32 %v5873_v62, %v4375_v17 }
 0x27f   : > { %4007 = vst [vmem:[%s6029_s25 + $0x20] sm:$0xff] %v3947_v50   ;;  %v3132_v23 = vadd.f32 %v6004_v52, %v3093_v54  ;;  %v3094_v0 = vmul.f32 %v4650_v22, %v6002_v32  ;;  %v4670_v9 = vadd.f32 %v5877_v36, %v4378_v27 }
 0x280   : > { %v3135_v12 = vadd.f32 %v6004_v52, %v3096_v41  ;;  %v3166_v47 = vmax.f32 %v3134_v14, 0.0 }
 0x281   : > { %v3133_v33 = vadd.f32 %v6004_v52, %v3094_v0  ;;  %v4379_v46 = vpop.f32.mrb[128].mxu0  ;;  %v4557_v30 = vpop.f32.mrb[0].mxu1  ;;  %v3164_v62 = vmax.f32 %v3132_v23, 0.0 }
 0x282   : > { %v3167_v55 = vmax.f32 %v3135_v12, 0.0  ;;  %v4653_v37 = vadd.f32 %v6035_v59, %v4557_v30  ;;  %v4380_v35 = vpop.f32.mrb[129].mxu0  ;;  %v2883_v40 = vpop.f32.mrb[1].mxu1 }
 0x283   : > { %v3165_v58 = vmax.f32 %v3133_v33, 0.0  ;;  %v4381_v53 = vadd.f32 %v4380_v35, %v4379_v46  ;;  %v4656_v44 = vadd.f32 %v6011_v18, %v2883_v40  ;;  %v4382_v36 = vpop.f32.mrb[130].mxu0  ;;  %v4558_v5 = vpop.f32.mrb[2].mxu1 }
 0x284   : > { %v3962_v45 = vpack.c.bf16 %v3167_v55, %v3166_v47  ;;  %v3099_v43 = vmul.f32 %v4653_v37, %v6002_v32  ;;  %v4659_v16 = vadd.f32 %v6041_v8, %v4558_v5  ;;  %v4383_v3 = vpop.f32.mrb[131].mxu0  ;;  %v2886_v42 = vpop.f32.mrb[3].mxu1 }
 0x285   : > { %v3957_v31 = vpack.c.bf16 %v3165_v58, %v3164_v62  ;;  %v3097_v59 = vmul.f32 %v4656_v44, %v6002_v32  ;;  %v4384_v56 = vadd.f32 %v4383_v3, %v4382_v36  ;;  %v4662_v60 = vadd.f32 %v6018_v24, %v2886_v42 }
 0x286   : > { %4010 = vst [vmem:[%s6029_s25 + $0x38] sm:$0xff] %v3962_v45   ;;  %v3138_v29 = vadd.f32 %v6004_v52, %v3099_v43  ;;  %v3100_v18 = vmul.f32 %v4659_v16, %v6002_v32  ;;  %v4679_v19 = vadd.f32 %v5889_v63, %v4381_v53 }
 0x287   : > { %4009 = vst [vmem:[%s6029_s25 + $0x30] sm:$0xff] %v3957_v31   ;;  %v3136_v25 = vadd.f32 %v6004_v52, %v3097_v59  ;;  %v3098_v8 = vmul.f32 %v4662_v60, %v6002_v32  ;;  %v4685_v4 = vadd.f32 %v5899_v26, %v4384_v56 }
 0x288   : > { %v3139_v34 = vadd.f32 %v6004_v52, %v3100_v18  ;;  %v3170_v13 = vmax.f32 %v3138_v29, 0.0 }
 0x289   : > { %v3137_v20 = vadd.f32 %v6004_v52, %v3098_v8  ;;  %v4385_v17 = vpop.f32.mrb[132].mxu0  ;;  %v4561_v24 = vpop.f32.mrb[4].mxu1  ;;  %v3168_v63 = vmax.f32 %v3136_v25, 0.0 }
 0x28a   : > { %v3171_v7 = vmax.f32 %v3139_v34, 0.0  ;;  %v4665_v10 = vadd.f32 %v4664_v57, %v4561_v24  ;;  %v4386_v15 = vpop.f32.mrb[133].mxu0  ;;  %v2899_v61 = vpop.f32.mrb[5].mxu1 }
 0x28b   : > { %v3169_v38 = vmax.f32 %v3137_v20, 0.0  ;;  %v4387_v11 = vadd.f32 %v4386_v15, %v4385_v17  ;;  %v4668_v51 = vadd.f32 %v6055_v21, %v2899_v61  ;;  %v4388_v50 = vpop.f32.mrb[134].mxu0  ;;  %v4562_v26 = vpop.f32.mrb[6].mxu1 }
 0x28c   : > { %v3972_v54 = vpack.c.bf16 %v3171_v7, %v3170_v13  ;;  %v3103_v27 = vmul.f32 %v4665_v10, %v6002_v32  ;;  %v4671_v22 = vadd.f32 %v4670_v9, %v4562_v26  ;;  %v4389_v14 = vpop.f32.mrb[135].mxu0  ;;  %v2902_v41 = vpop.f32.mrb[7].mxu1 }
 0x28d   : > { %v3967_v23 = vpack.c.bf16 %v3169_v38, %v3168_v63  ;;  %v3101_v57 = vmul.f32 %v4668_v51, %v6002_v32  ;;  %v4390_v0 = vadd.f32 %v4389_v14, %v4388_v50  ;;  %v4674_v12 = vadd.f32 %v6061_v6, %v2902_v41 }
 0x28e   : > { %4012 = vst [vmem:[%s6029_s25 + $0x48] sm:$0xff] %v3972_v54   ;;  %v3142_v33 = vadd.f32 %v6004_v52, %v3103_v27  ;;  %v3104_v21 = vmul.f32 %v4671_v22, %v6002_v32  ;;  %v4676_v46 = vadd.f32 %v5911_v1, %v4387_v11 }
 0x28f   : > { %4011 = vst [vmem:[%s6029_s25 + $0x40] sm:$0xff] %v3967_v23   ;;  %v3140_v30 = vadd.f32 %v6004_v52, %v3101_v57  ;;  %v3102_v9 = vmul.f32 %v4674_v12, %v6002_v32  ;;  %v4682_v47 = vadd.f32 %v5921_v48, %v4390_v0 }
 0x290   : > { %v3143_v55 = vadd.f32 %v6004_v52, %v3104_v21  ;;  %v3174_v40 = vmax.f32 %v3142_v33, 0.0 }
 0x291   : > { %v3141_v37 = vadd.f32 %v6004_v52, %v3102_v9  ;;  %v4391_v35 = vpop.f32.mrb[136].mxu0  ;;  %v4565_v6 = vpop.f32.mrb[8].mxu1  ;;  %v3172_v1 = vmax.f32 %v3140_v30, 0.0 }
 0x292   : > { %v3175_v62 = vmax.f32 %v3143_v55, 0.0  ;;  %v4677_v58 = vadd.f32 %v4676_v46, %v4565_v6  ;;  %v4392_v53 = vpop.f32.mrb[137].mxu0  ;;  %v2915_v44 = vpop.f32.mrb[9].mxu1 }
 0x293   : > { %v3173_v36 = vmax.f32 %v3141_v37, 0.0  ;;  %v4393_v5 = vadd.f32 %v4392_v53, %v4391_v35  ;;  %v4680_v45 = vadd.f32 %v4679_v19, %v2915_v44  ;;  %v4394_v43 = vpop.f32.mrb[138].mxu0  ;;  %v4566_v16 = vpop.f32.mrb[10].mxu1 }
 0x294   : > { %v3982_v48 = vpack.c.bf16 %v3175_v62, %v3174_v40  ;;  %v3107_v3 = vmul.f32 %v4677_v58, %v6002_v32  ;;  %v4683_v42 = vadd.f32 %v4682_v47, %v4566_v16  ;;  %v4395_v31 = vpop.f32.mrb[139].mxu0  ;;  %v2918_v59 = vpop.f32.mrb[11].mxu1 }
 0x295   : > { %v3977_v56 = vpack.c.bf16 %v3173_v36, %v3172_v1  ;;  %v3105_v60 = vmul.f32 %v4680_v45, %v6002_v32  ;;  %v4396_v29 = vadd.f32 %v4395_v31, %v4394_v43  ;;  %v4686_v18 = vadd.f32 %v4685_v4, %v2918_v59 }
 0x296   : > { %4014 = vst [vmem:[%s6029_s25 + $0x58] sm:$0xff] %v3982_v48   ;;  %v3146_v25 = vadd.f32 %v6004_v52, %v3107_v3  ;;  %v3108_v8 = vmul.f32 %v4683_v42, %v6002_v32  ;;  %v4691_v19 = vadd.f32 %v5933_v2, %v4393_v5 }
 0x297   : > { %4013 = vst [vmem:[%s6029_s25 + $0x50] sm:$0xff] %v3977_v56   ;;  %v3144_v34 = vadd.f32 %v6004_v52, %v3105_v60  ;;  %v3106_v20 = vmul.f32 %v4686_v18, %v6002_v32  ;;  %v4697_v17 = vadd.f32 %v5941_v28, %v4396_v29 }
 0x298   : > { %v3147_v24 = vadd.f32 %v6004_v52, %v3108_v8  ;;  %v3178_v10 = vmax.f32 %v3146_v25, 0.0 }
 0x299   : > { %v3145_v13 = vadd.f32 %v6004_v52, %v3106_v20  ;;  %v4397_v7 = vpop.f32.mrb[140].mxu0  ;;  %v4569_v4 = vpop.f32.mrb[12].mxu1  ;;  %v3176_v2 = vmax.f32 %v3144_v34, 0.0 }
 0x29a   : > { %v3179_v15 = vmax.f32 %v3147_v24, 0.0  ;;  %v4398_v61 = vpop.f32.mrb[141].mxu0  ;;  %v2931_v63 = vpop.f32.mrb[13].mxu1 }
 0x29b   : > { %v3177_v38 = vmax.f32 %v3145_v13, 0.0  ;;  %v4399_v11 = vadd.f32 %v4398_v61, %v4397_v7  ;;  %v4692_v51 = vadd.f32 %v4691_v19, %v2931_v63  ;;  %v4400_v50 = vpop.f32.mrb[142].mxu0  ;;  %v4570_v26 = vpop.f32.mrb[14].mxu1 }
 0x29c   : > { %v3992_v54 = vpack.c.bf16 %v3179_v15, %v3178_v10  ;;  %v4401_v28 = vpop.f32.mrb[143].mxu0  ;;  %v2934_v27 = vpop.f32.mrb[15].mxu1 }
 0x29d   : > { %v3987_v22 = vpack.c.bf16 %v3177_v38, %v3176_v2  ;;  %v4688_v14 = vadd.f32 %v5951_v49, %v4399_v11  ;;  %v3109_v41 = vmul.f32 %v4692_v51, %v6002_v32  ;;  %v4402_v23 = vadd.f32 %v4401_v28, %v4400_v50 }
 0x29e   : > { %4016 = vst [vmem:[%s6029_s25 + $0x68] sm:$0xff] %v3992_v54   ;;  %v4698_v57 = vadd.f32 %v4697_v17, %v2934_v27 }
 0x29f   : > { %4015 = vst [vmem:[%s6029_s25 + $0x60] sm:$0xff] %v3987_v22   ;;  %v4689_v0 = vadd.f32 %v4688_v14, %v4569_v4  ;;  %v4694_v12 = vadd.f32 %v5959_v39, %v4402_v23  ;;  %v3148_v33 = vadd.f32 %v6004_v52, %v3109_v41 }
 0x2a0   : > { %v3110_v21 = vmul.f32 %v4698_v57, %v6002_v32 }
 0x2a1   : > { %v3111_v46 = vmul.f32 %v4689_v0, %v6002_v32  ;;  %v4695_v30 = vadd.f32 %v4694_v12, %v4570_v26  ;;  %v3180_v55 = vmax.f32 %v3148_v33, 0.0 }
 0x2a2   : > { %v3149_v49 = vadd.f32 %v6004_v52, %v3110_v21 }
 0x2a3   : > { %v3150_v9 = vadd.f32 %v6004_v52, %v3111_v46  ;;  %v3112_v47 = vmul.f32 %v4695_v30, %v6002_v32 }
 0x2a4   : > { %v3181_v37 = vmax.f32 %v3149_v49, 0.0 }
 0x2a5   : > { %v3151_v39 = vadd.f32 %v6004_v52, %v3112_v47  ;;  %v3182_v6 = vmax.f32 %v3150_v9, 0.0 }
 0x2a6   : > { %v3997_v35 = vpack.c.bf16 %v3181_v37, %v3180_v55 }
 0x2a7   : > { %v3183_v40 = vmax.f32 %v3151_v39, 0.0 }
 0x2a8   : > { %4017 = vst [vmem:[%s6029_s25 + $0x70] sm:$0xff] %v3997_v35  }
 0x2a9   : > { %v4002_v32 = vpack.c.bf16 %v3183_v40, %v3182_v6 }
 0x2ab   : > { %4018 = vst [vmem:[%s6029_s25 + $0x78] sm:$0xff] %v4002_v32  }
 0x2ac   : > { %5150 = shalt.err (!%p5147_p0)
}
 0x2ad   : > { %s5151_s29 = scalar_lea.hbm %s6141_s6, 2048  ;;  %s5155_s10 = scalar_lea.hbm %s6197_s4, 4096 }
 0x2ae   : > { %p5152_p4 = scmp.ne.s32.totalorder %s6141_s6, %s5151_s29  ;;  %p5156_p12 = scmp.lt.u32.totalorder %s6141_s6, %s6197_s4 }
 0x2af   : > { %p5157_p1 = scmp.lt.u32.totalorder %s5155_s10, %s5151_s29  ;;  %p5159_p13 = scmp.lt.u32.totalorder %s5151_s29, %s6141_s6 }
 0x2b0   : > { %p5153_p2 = pnand %p5152_p4, %p5417_p10 }
 0x2b1   : > { %p5158_p11 = por %p5157_p1, %p5156_p12 }
 0x2b2   : > { %p5154_p8 = pneg %p5153_p2 }
 0x2b3   : > { %p5160_p6 = por %p5159_p13, %p5158_p11 }
 0x2b5   : > { %p5161_p3 = pnand %p5160_p6, %p5154_p8 }
 0x2b7   : > { %5164 = shalt.err (!%p5161_p3)
}
 0x2b8   : > { %s5238_s25 = smov 64   ;;  %s5239_s27 = smov 4  }
 0x2b9   : > { %4764 = dma.vmem_to_hbm [thread:$0]  (%p5417_p10), %s6143_s11, 2048, %s6141_s6, %s3345_s7, %s5238_s25, %s5238_s25, %s5239_s27  }
 0x2ba PF: > { %s6221_s21 = sld [smem:[#allocation16_spill]]  ;;  %s3377_s28 = sand.u32 1, %s5207_s15  }
 0x2bb   : > { %p6223_p7 = scmp.ge.s32.totalorder %s5227_s20, 2  ;;  %s3378_s8 = scalar_lea.sflag [#allocation5], %s3377_s28 }
 0x2c0   : > { %p6222_p5 = scmp.ne.s32.totalorder %s6221_s21, 0 }
 0x2c2   : > { %p4781_p9 = pnand %p6223_p7, %p6222_p5 }
 0x2c4   : > { %5202 = dma.done.wait (!%p4781_p9), %s3378_s8, 2048  }
 0x2c5   : > { %5204 = vsyncadd (!%p4781_p9), %s3378_s8, 4294965248  ;;  %s22_s20 = sadd.s32 1, %s5227_s20   ;;  %s6224_s15 = smov %s5211_s16 }
 0x2c6   : > { %p19_p0 = scmp.ge.s32.totalorder %s22_s20, 4   ;;  %s6225_s16 = smov %s5215_s17 }
 0x2c7   : > { %s6226_s17 = smov %s5433_s24  ;;  %s6227_s18 = smov %s5223_s19 }
 0x2c8   : > { %s6228_s19 = smov %s6230_s26  ;;  %21 = sbr.rel (!%p19_p0) target bundleno = 8 (0x8), region = 101 }
 0x2cf   :  { %3383 = vsyncpa [#allocation4], 1 }
 0x2d0   :  { %3385 = vsyncpa [#allocation4 + $0x1], 1 }
 0x2d1   :  { %3386 = vsyncpa [#allocation7], 1 }
 0x2d2   :  { %3387 = vsyncpa [#allocation10], 1 }
 0x2d3   :  { %3388 = vsyncpa [#allocation5], 1 }
 0x2d4   :  { %3390 = vsyncpa [#allocation5 + $0x1], 1 }

</bundles_post_ra>
